<compile_context>
chip_gen: v7x
topology: tpu7x:2x2x1
jax: 0.10.0
libtpu: 0.0.40
codegen_flags: <defaults>
</compile_context>

<pallas_src>
import jax
import jax.numpy as jnp
from jax.experimental import pallas as pl
from jax.experimental.pallas import tpu as pltpu


MATMUL_DTYPE = jnp.bfloat16   # MXU input dtype; jnp.float32 for bit-closer numerics


def _round_up(v, m):
    return ((v + m - 1) // m) * m


# ----------------------------------------------------------------------------
# In-kernel building blocks (operate on VMEM-resident values / scratch refs)
# ----------------------------------------------------------------------------
def _fill_padded(pad_ref, x):
    """Write activation x into pad_ref's interior, zeroing ONLY the 1-px halo.

    Do not move the zeroing under pl.when(program_id == 0): scratch is per-core,
    so under megacore parallel scheduling one core would see an uninitialized halo.
    """
    B, H, W, C = x.shape
    dt = pad_ref.dtype
    zrow = jnp.zeros((B, 1, W + 2, C), dt)
    pad_ref[:, 0:1, :, :] = zrow                      # top row (incl. corners)
    pad_ref[:, H + 1:H + 2, :, :] = zrow              # bottom row
    zcol = jnp.zeros((B, H, 1, C), dt)
    pad_ref[:, 1:H + 1, 0:1, :] = zcol                # left column
    pad_ref[:, 1:H + 1, W + 1:W + 2, :] = zcol        # right column
    pad_ref[:, 1:H + 1, 1:W + 1, :] = x.astype(dt)    # interior


def _conv3x3_bn_relu(pad_ref, w_col, scale, shift):
    """3x3 'same' conv from a pre-padded VMEM buffer as ONE im2col MXU matmul
    (K = 9*Cin), with folded-BN + ReLU epilogue in f32.

    pad_ref: (B, H+2, W+2, Cin) scratch, interior filled + halo zeroed
    w_col:   (9*Cin, Cout), rows ordered (ky*3+kx)*Cin + cin
    returns  (B, H, W, Cout) float32
    """
    B, Hp, Wp, Cin = pad_ref.shape
    H, W = Hp - 2, Wp - 2
    Cout = w_col.shape[1]
    patches = [pad_ref[:, ky:ky + H, kx:kx + W, :]
               for ky in range(3) for kx in range(3)]
    col = jnp.concatenate(patches, axis=-1).reshape(B * H * W, 9 * Cin)
    y = jnp.dot(col.astype(w_col.dtype), w_col,
                preferred_element_type=jnp.float32)          # single MXU push, M = B*H*W
    y = jnp.maximum(y * scale + shift, 0.0)                  # BN + ReLU in f32 (v5e-safe)
    return y.reshape(B, H, W, Cout)


def _maxpool2x2(x):
    # (B, H, W, C) f32 -> (B, H//2, W//2, C) f32, kernel=2 stride=2 (VPU epilogue).
    B, H, W, C = x.shape
    x = x.reshape(B, H // 2, 2, W, C).max(axis=2)        # H axis: major-dim split, cheap
    # W axis: a strided-slice form jnp.maximum(x[:, :, 0::2], x[:, :, 1::2]) would skip
    # the sublane-split relayout, but strided value slices are not reliably lowered by
    # Mosaic; keep the proven reshape (runs on the already 2x-reduced tensor).
    x = x.reshape(B, H // 2, W // 2, 2, C).max(axis=3)
    return x


def _avgpool_to_4x4(x):
    # AdaptiveAvgPool2d((4, 4)).
    # TODO(synk): only supports H, W divisible by 4 (true for the 16x16 test input);
    # PyTorch handles arbitrary sizes.
    B, H, W, C = x.shape
    if H == 4 and W == 4:
        return x
    x = x.reshape(B, 4, H // 4, W, C).mean(axis=2)
    x = x.reshape(B, 4, 4, W // 4, C).mean(axis=3)
    return x


# ----------------------------------------------------------------------------
# Fused kernel: entire forward for one batch tile per grid step
# ----------------------------------------------------------------------------
def _fused_cnn_kernel(col1_ref,
                      w1_ref, s1_ref, t1_ref,
                      w2_ref, s2_ref, t2_ref,
                      w3_ref, s3_ref, t3_ref,
                      w4_ref, s4_ref, t4_ref,
                      fw1_ref, fb1_ref, fw2_ref, fb2_ref,
                      o_ref,
                      pad2_ref, pad3_ref, pad4_ref):
    B = col1_ref.shape[0]
    H = pad2_ref.shape[1] - 2
    W = pad2_ref.shape[2] - 2
    c1 = w1_ref.shape[1]

    # conv1: im2col was hoisted to the wrapper; one MXU matmul with B folded into M.
    col1 = col1_ref[...].reshape(B * H * W, col1_ref.shape[2])
    y = jnp.dot(col1, w1_ref[...], preferred_element_type=jnp.float32)
    x = jnp.maximum(y * s1_ref[...] + t1_ref[...], 0.0).reshape(B, H, W, c1)

    # conv2 + maxpool
    _fill_padded(pad2_ref, x)
    x = _conv3x3_bn_relu(pad2_ref, w2_ref[...], s2_ref[...], t2_ref[...])
    x = _maxpool2x2(x)

    # conv3, conv4 + maxpool
    _fill_padded(pad3_ref, x)
    x = _conv3x3_bn_relu(pad3_ref, w3_ref[...], s3_ref[...], t3_ref[...])
    _fill_padded(pad4_ref, x)
    x = _conv3x3_bn_relu(pad4_ref, w4_ref[...], s4_ref[...], t4_ref[...])
    x = _maxpool2x2(x)

    # adaptive avgpool (identity for 16x16 inputs) + flatten in HWC order;
    # one short lane-concat chain per *block* (B rows), not per element.
    x = _avgpool_to_4x4(x)                                # (B, 4, 4, C2) f32
    xb = x.astype(fw1_ref.dtype)
    flat = jnp.concatenate([xb[:, h, w, :] for h in range(4) for w in range(4)],
                           axis=1)                        # (B, 16*C2)

    # classifier: fc1 (M = B) + ReLU + fc2 into a lane-dense 128-wide padded block.
    h1 = jnp.dot(flat, fw1_ref[...], preferred_element_type=jnp.float32) + fb1_ref[...]
    h1 = jnp.maximum(h1, 0.0)
    logits = jnp.dot(h1.astype(fw2_ref.dtype), fw2_ref[...],
                     preferred_element_type=jnp.float32) + fb2_ref[...]
    o_ref[:, 0, :] = logits


# ----------------------------------------------------------------------------
# One-time weight preparation (hoisted out of the per-call path)
# ----------------------------------------------------------------------------
def prepare_params(params, eps=1e-5, matmul_dtype=MATMUL_DTYPE):
    num_classes, c2 = params["fc2_w"].shape
    cin = params["conv1"].shape[1]
    k1_pad = _round_up(9 * cin, 8)            # 27 -> 32 for in_channel=3

    def conv_prep(w_oihw, k_pad=None):
        # PyTorch (Cout, Cin, 3, 3) -> im2col col layout (9*Cin, Cout)
        cout, cin_, kh, kw = w_oihw.shape
        w = jnp.transpose(w_oihw, (2, 3, 1, 0)).reshape(kh * kw * cin_, cout)
        if k_pad is not None and k_pad > w.shape[0]:
            w = jnp.pad(w, ((0, k_pad - w.shape[0]), (0, 0)))
        return w.astype(matmul_dtype)

    def bn_prep(bn):
        gamma, beta, mean, var = bn
        inv = jax.lax.rsqrt(var + eps)
        scale = (gamma * inv).reshape(1, -1).astype(jnp.float32)
        shift = (beta - mean * gamma * inv).reshape(1, -1).astype(jnp.float32)
        return scale, shift

    prep = {}
    for i in range(1, 5):
        s, t = bn_prep(params[f"bn{i}"])
        prep[f"w{i}"] = conv_prep(params[f"conv{i}"], k1_pad if i == 1 else None)
        prep[f"s{i}"] = s
        prep[f"t{i}"] = t

    # fc1: PyTorch (c2, c2*4*4) with CHW flatten order -> HWC order -> (16*c2, c2)
    prep["fw1"] = (params["fc1_w"].reshape(c2, c2, 4, 4)
                   .transpose(0, 2, 3, 1)
                   .reshape(c2, c2 * 16).T).astype(matmul_dtype)
    prep["fb1"] = params["fc1_b"].reshape(1, c2).astype(jnp.float32)

    # fc2: pad output dim to a lane-dense multiple of 128 (sliced back in wrapper)
    outp = max(128, _round_up(num_classes, 128))
    prep["fw2"] = (jnp.zeros((c2, outp), matmul_dtype)
                   .at[:, :num_classes].set(params["fc2_w"].T.astype(matmul_dtype)))
    prep["fb2"] = (jnp.zeros((1, outp), jnp.float32)
                   .at[:, :num_classes].set(params["fc2_b"].astype(jnp.float32)))
    return prep


# ----------------------------------------------------------------------------
# Wrapper: one fused pallas_call for the whole forward
# ----------------------------------------------------------------------------
def _conv1_im2col(x_nchw, k_pad, dtype):
    """XLA-side im2col for conv1 (Cin=3 is the worst-layout stage in-kernel)."""
    x = jnp.transpose(x_nchw, (0, 2, 3, 1)).astype(jnp.float32)     # NCHW -> NHWC
    N, H, W, C = x.shape
    xp = jnp.pad(x, ((0, 0), (1, 1), (1, 1), (0, 0)))
    cols = jnp.concatenate([xp[:, ky:ky + H, kx:kx + W, :]
                            for ky in range(3) for kx in range(3)], axis=-1)
    cols = cols.reshape(N, H * W, 9 * C)
    if k_pad > 9 * C:
        cols = jnp.pad(cols, ((0, 0), (0, 0), (0, k_pad - 9 * C)))
    return cols.astype(dtype)


def cnn_small_bn_forward(x_nchw, prep, num_classes=10, b_tile=None):
    N, _, H, W = x_nchw.shape
    c1 = prep["w1"].shape[1]
    c2 = prep["w3"].shape[1]
    outp = prep["fw2"].shape[1]
    k1_pad = prep["w1"].shape[0]
    act_dtype = jnp.float32   # pad/activation scratch dtype (see header note)

    # Batch tiling: at most ceil(N/2) so the "parallel" batch axis still yields
    # >= 2 grid steps (both v7x TensorCores), capped at 8 to bound VMEM footprint
    # (v7x has 64 MiB VMEM vs 128 MiB on v5e/v6e).
    if b_tile is None:
        b_tile = max(1, min(8, -(-N // 2)))
    n_pad = _round_up(N, b_tile)

    cols1 = _conv1_im2col(x_nchw, k1_pad, prep["w1"].dtype)          # (N, H*W, k1_pad)
    if n_pad > N:
        cols1 = jnp.pad(cols1, ((0, n_pad - N), (0, 0), (0, 0)))

    weights = (prep["w1"], prep["s1"], prep["t1"],
               prep["w2"], prep["s2"], prep["t2"],
               prep["w3"], prep["s3"], prep["t3"],
               prep["w4"], prep["s4"], prep["t4"],
               prep["fw1"], prep["fb1"], prep["fw2"], prep["fb2"])

    def whole(a):
        # Whole-array VMEM-resident block with a constant block index: fetched once,
        # never re-DMA'd across grid steps.
        # TODO(synk): pipeline_mode=pl.Buffered(1) would also drop the idle second
        # weight buffer (~0.3 MiB); omitted to avoid relying on that knob.
        idx = (0,) * a.ndim
        return pl.BlockSpec(a.shape, lambda n, _idx=idx: _idx)

    out = pl.pallas_call(
        _fused_cnn_kernel,
        out_shape=jax.ShapeDtypeStruct((n_pad, 1, outp), jnp.float32),
        grid=(n_pad // b_tile,),
        in_specs=[pl.BlockSpec((b_tile, H * W, k1_pad), lambda n: (n, 0, 0))]
                 + [whole(a) for a in weights],
        out_specs=pl.BlockSpec((b_tile, 1, outp), lambda n: (n, 0, 0)),
        scratch_shapes=[
            pltpu.VMEM((b_tile, H + 2, W + 2, c1), act_dtype),             # conv2 pad
            pltpu.VMEM((b_tile, H // 2 + 2, W // 2 + 2, c1), act_dtype),   # conv3 pad
            pltpu.VMEM((b_tile, H // 2 + 2, W // 2 + 2, c2), act_dtype),   # conv4 pad
        ],
        compiler_params=pltpu.CompilerParams(
            # batch axis stays "parallel" so v7x's two TensorCores both get grid steps
            dimension_semantics=("parallel",),
            # explicit scoped-VMEM limit: above the 16 MiB v5e default, below the
            # 64 MiB physical VMEM on v7x (real footprint here is only a few MiB)
            vmem_limit_bytes=48 * 1024 * 1024,
        ),
    )(cols1, *weights)

    return out.reshape(n_pad, outp)[:N, :num_classes]


# ----------------------------------------------------------------------------
# Pure-JAX (XLA) reference of the PyTorch module, for a sanity check
# ----------------------------------------------------------------------------
def _reference_forward(x_nchw, params, eps=1e-5):
    def conv_bn_relu(x, w, bn):
        gamma, beta, mean, var = bn
        y = jax.lax.conv_general_dilated(
            x, w, window_strides=(1, 1), padding=((1, 1), (1, 1)),
            dimension_numbers=("NCHW", "OIHW", "NCHW"))
        inv = jax.lax.rsqrt(var + eps)
        y = ((y - mean[None, :, None, None]) * (gamma * inv)[None, :, None, None]
             + beta[None, :, None, None])
        return jnp.maximum(y, 0.0)

    def maxpool(x):
        n, c, h, w = x.shape
        return x.reshape(n, c, h // 2, 2, w // 2, 2).max(axis=(3, 5))

    x = conv_bn_relu(x_nchw, params["conv1"], params["bn1"])
    x = conv_bn_relu(x, params["conv2"], params["bn2"])
    x = maxpool(x)
    x = conv_bn_relu(x, params["conv3"], params["bn3"])
    x = conv_bn_relu(x, params["conv4"], params["bn4"])
    x = maxpool(x)
    n, c, h, w = x.shape
    x = x.reshape(n, c, 4, h // 4, 4, w // 4).mean(axis=(3, 5))   # adaptive avgpool
    x = x.reshape(n, c * 16)                                      # CHW flatten (PyTorch)
    x = jnp.maximum(x @ params["fc1_w"].T + params["fc1_b"], 0.0)
    return x @ params["fc2_w"].T + params["fc2_b"]


# ----------------------------------------------------------------------------
# Deterministic raw (PyTorch-layout) parameter initialization
# ----------------------------------------------------------------------------
def init_params(key, in_channel=3, num_classes=10, width=1):
    c1, c2 = 32 * width, 64 * width
    ks = jax.random.split(key, 12)

    def conv_w(k, cout, cin):
        return jax.random.normal(k, (cout, cin, 3, 3), jnp.float32) * 0.1

    def bn(k, c):
        k1, k2, k3, k4 = jax.random.split(k, 4)
        gamma = jax.random.uniform(k1, (c,), jnp.float32, 0.5, 1.5)
        beta = jax.random.normal(k2, (c,), jnp.float32) * 0.1
        mean = jax.random.normal(k3, (c,), jnp.float32) * 0.1
        var = jax.random.uniform(k4, (c,), jnp.float32, 0.5, 1.5)
        return (gamma, beta, mean, var)

    return {
        "conv1": conv_w(ks[0], c1, in_channel), "bn1": bn(ks[1], c1),
        "conv2": conv_w(ks[2], c1, c1),         "bn2": bn(ks[3], c1),
        "conv3": conv_w(ks[4], c2, c1),         "bn3": bn(ks[5], c2),
        "conv4": conv_w(ks[6], c2, c2),         "bn4": bn(ks[7], c2),
        # PyTorch Linear weights are (out_features, in_features)
        "fc1_w": jax.random.normal(ks[8], (c2, c2 * 4 * 4), jnp.float32) * 0.05,
        "fc1_b": jax.random.normal(ks[9], (c2,), jnp.float32) * 0.05,
        "fc2_w": jax.random.normal(ks[10], (num_classes, c2), jnp.float32) * 0.05,
        "fc2_b": jax.random.normal(ks[11], (num_classes,), jnp.float32) * 0.05,
    }


if __name__ == "__main__":
    key = jax.random.PRNGKey(0)
    pkey, xkey = jax.random.split(key)
    raw_params = init_params(pkey, in_channel=3, num_classes=10, width=1)
    prep = prepare_params(raw_params)            # weight-layout transforms done once

    # PyTorch-style NCHW input: batch=2, channels=3, spatial=16
    x = jax.random.normal(xkey, (2, 3, 16, 16), jnp.float32)

    fwd = jax.jit(cnn_small_bn_forward)
    out = jax.block_until_ready(fwd(x, prep))
    assert out.shape == (2, 10), out.shape
    assert out.dtype == jnp.float32

    # sanity check vs. an XLA reference (loose tolerance: kernel uses bf16 MXU inputs)
    ref = _reference_forward(x, raw_params)
    rel_err = float(jnp.max(jnp.abs(out - ref)) / (jnp.max(jnp.abs(ref)) + 1e-6))
    assert rel_err < 0.08, f"kernel/reference mismatch: rel_err={rel_err:.4f}"

    print("KERNEL_OK")
</pallas_src>

<mosaic_0001>
module attributes {stable_mosaic.version = 11 : i64} {
  func.func @_fused_cnn_kernel(%arg0: i32, %arg1: memref<1x256x32xbf16, #tpu.memory_space<vmem>>, %arg2: memref<32x32xbf16, #tpu.memory_space<vmem>>, %arg3: memref<1x32xf32, #tpu.memory_space<vmem>>, %arg4: memref<1x32xf32, #tpu.memory_space<vmem>>, %arg5: memref<288x32xbf16, #tpu.memory_space<vmem>>, %arg6: memref<1x32xf32, #tpu.memory_space<vmem>>, %arg7: memref<1x32xf32, #tpu.memory_space<vmem>>, %arg8: memref<288x64xbf16, #tpu.memory_space<vmem>>, %arg9: memref<1x64xf32, #tpu.memory_space<vmem>>, %arg10: memref<1x64xf32, #tpu.memory_space<vmem>>, %arg11: memref<576x64xbf16, #tpu.memory_space<vmem>>, %arg12: memref<1x64xf32, #tpu.memory_space<vmem>>, %arg13: memref<1x64xf32, #tpu.memory_space<vmem>>, %arg14: memref<1024x64xbf16, #tpu.memory_space<vmem>>, %arg15: memref<1x64xf32, #tpu.memory_space<vmem>>, %arg16: memref<64x128xbf16, #tpu.memory_space<vmem>>, %arg17: memref<1x128xf32, #tpu.memory_space<vmem>>, %arg18: memref<1x1x128xf32, #tpu.memory_space<vmem>>, %arg19: memref<1x18x18x32xf32, #tpu.memory_space<vmem>>, %arg20: memref<1x10x10x32xf32, #tpu.memory_space<vmem>>, %arg21: memref<1x10x10x64xf32, #tpu.memory_space<vmem>>) attributes {dimension_semantics = [#tpu.dimension_semantics<parallel>], iteration_bounds = array<i64: 2>, scalar_prefetch = 0 : i64, scratch_operands = 3 : i64, tpu.core_type = #tpu.core_type<tc>, window_params = [{transform_indices = @transform_0, window_bounds = array<i64: 1, 256, 32>}, {pipeline_mode = #tpu.pipeline_mode<synchronous>, transform_indices = @transform_1, window_bounds = array<i64: 32, 32>}, {pipeline_mode = #tpu.pipeline_mode<synchronous>, transform_indices = @transform_2, window_bounds = array<i64: 1, 32>}, {pipeline_mode = #tpu.pipeline_mode<synchronous>, transform_indices = @transform_3, window_bounds = array<i64: 1, 32>}, {pipeline_mode = #tpu.pipeline_mode<synchronous>, transform_indices = @transform_4, window_bounds = array<i64: 288, 32>}, {pipeline_mode = #tpu.pipeline_mode<synchronous>, transform_indices = @transform_5, window_bounds = array<i64: 1, 32>}, {pipeline_mode = #tpu.pipeline_mode<synchronous>, transform_indices = @transform_6, window_bounds = array<i64: 1, 32>}, {pipeline_mode = #tpu.pipeline_mode<synchronous>, transform_indices = @transform_7, window_bounds = array<i64: 288, 64>}, {pipeline_mode = #tpu.pipeline_mode<synchronous>, transform_indices = @transform_8, window_bounds = array<i64: 1, 64>}, {pipeline_mode = #tpu.pipeline_mode<synchronous>, transform_indices = @transform_9, window_bounds = array<i64: 1, 64>}, {pipeline_mode = #tpu.pipeline_mode<synchronous>, transform_indices = @transform_10, window_bounds = array<i64: 576, 64>}, {pipeline_mode = #tpu.pipeline_mode<synchronous>, transform_indices = @transform_11, window_bounds = array<i64: 1, 64>}, {pipeline_mode = #tpu.pipeline_mode<synchronous>, transform_indices = @transform_12, window_bounds = array<i64: 1, 64>}, {pipeline_mode = #tpu.pipeline_mode<synchronous>, transform_indices = @transform_13, window_bounds = array<i64: 1024, 64>}, {pipeline_mode = #tpu.pipeline_mode<synchronous>, transform_indices = @transform_14, window_bounds = array<i64: 1, 64>}, {pipeline_mode = #tpu.pipeline_mode<synchronous>, transform_indices = @transform_15, window_bounds = array<i64: 64, 128>}, {pipeline_mode = #tpu.pipeline_mode<synchronous>, transform_indices = @transform_16, window_bounds = array<i64: 1, 128>}, {transform_indices = @transform_17, window_bounds = array<i64: 1, 1, 128>}]} {
    %c0 = arith.constant 0 : index
    %c0_0 = arith.constant 0 : index
    %c0_1 = arith.constant 0 : index
    %0 = vector.load %arg1[%c0, %c0_0, %c0_1] : memref<1x256x32xbf16, #tpu.memory_space<vmem>>, vector<1x256x32xbf16>
    %1 = vector.shape_cast %0 : vector<1x256x32xbf16> to vector<256x32xbf16>
    %c0_2 = arith.constant 0 : index
    %c0_3 = arith.constant 0 : index
    %2 = vector.load %arg2[%c0_2, %c0_3] : memref<32x32xbf16, #tpu.memory_space<vmem>>, vector<32x32xbf16>
    %cst = arith.constant dense<0.000000e+00> : vector<256x32xf32>
    %3 = tpu.matmul %1, %2, %cst {dimension_numbers = #tpu.dot_dimension_numbers<[1], [0], [0], [1], [0, 0, 1, 1], [], []>} : vector<256x32xbf16>, vector<32x32xbf16>, vector<256x32xf32> -> vector<256x32xf32>
    %c0_4 = arith.constant 0 : index
    %c0_5 = arith.constant 0 : index
    %4 = vector.load %arg3[%c0_4, %c0_5] : memref<1x32xf32, #tpu.memory_space<vmem>>, vector<1x32xf32>
    %5 = vector.broadcast %4 : vector<1x32xf32> to vector<256x32xf32>
    %6 = arith.mulf %3, %5 : vector<256x32xf32>
    %c0_6 = arith.constant 0 : index
    %c0_7 = arith.constant 0 : index
    %7 = vector.load %arg4[%c0_6, %c0_7] : memref<1x32xf32, #tpu.memory_space<vmem>>, vector<1x32xf32>
    %8 = vector.broadcast %7 : vector<1x32xf32> to vector<256x32xf32>
    %9 = arith.addf %6, %8 : vector<256x32xf32>
    %cst_8 = arith.constant 0.000000e+00 : f32
    %10 = vector.broadcast %cst_8 : f32 to vector<256x32xf32>
    %11 = arith.maximumf %9, %10 : vector<256x32xf32>
    %12 = vector.shape_cast %11 : vector<256x32xf32> to vector<1x16x16x32xf32>
    %cst_9 = arith.constant 0.000000e+00 : f32
    %13 = vector.broadcast %cst_9 : f32 to vector<1x1x18x32xf32>
    %c0_10 = arith.constant 0 : index
    %c0_11 = arith.constant 0 : index
    %c0_12 = arith.constant 0 : index
    %c0_13 = arith.constant 0 : index
    %14 = vector.load %arg19[%c0_10, %c0_11, %c0_12, %c0_13] : memref<1x18x18x32xf32, #tpu.memory_space<vmem>>, vector<1x1x18x32xf32>
    tpu.vector_store %arg19[%c0_10, %c0_11, %c0_12, %c0_13], %13 {strides = array<i32>} : memref<1x18x18x32xf32, #tpu.memory_space<vmem>>, vector<1x1x18x32xf32>,
    %c0_14 = arith.constant 0 : index
    %c17 = arith.constant 17 : index
    %c0_15 = arith.constant 0 : index
    %c0_16 = arith.constant 0 : index
    %15 = vector.load %arg19[%c0_14, %c17, %c0_15, %c0_16] : memref<1x18x18x32xf32, #tpu.memory_space<vmem>>, vector<1x1x18x32xf32>
    tpu.vector_store %arg19[%c0_14, %c17, %c0_15, %c0_16], %13 {strides = array<i32>} : memref<1x18x18x32xf32, #tpu.memory_space<vmem>>, vector<1x1x18x32xf32>,
    %cst_17 = arith.constant 0.000000e+00 : f32
    %16 = vector.broadcast %cst_17 : f32 to vector<1x16x1x32xf32>
    %c0_18 = arith.constant 0 : index
    %c1 = arith.constant 1 : index
    %c0_19 = arith.constant 0 : index
    %c0_20 = arith.constant 0 : index
    %17 = vector.load %arg19[%c0_18, %c1, %c0_19, %c0_20] : memref<1x18x18x32xf32, #tpu.memory_space<vmem>>, vector<1x16x1x32xf32>
    tpu.vector_store %arg19[%c0_18, %c1, %c0_19, %c0_20], %16 {strides = array<i32>} : memref<1x18x18x32xf32, #tpu.memory_space<vmem>>, vector<1x16x1x32xf32>,
    %c0_21 = arith.constant 0 : index
    %c1_22 = arith.constant 1 : index
    %c17_23 = arith.constant 17 : index
    %c0_24 = arith.constant 0 : index
    %18 = vector.load %arg19[%c0_21, %c1_22, %c17_23, %c0_24] : memref<1x18x18x32xf32, #tpu.memory_space<vmem>>, vector<1x16x1x32xf32>
    tpu.vector_store %arg19[%c0_21, %c1_22, %c17_23, %c0_24], %16 {strides = array<i32>} : memref<1x18x18x32xf32, #tpu.memory_space<vmem>>, vector<1x16x1x32xf32>,
    %c0_25 = arith.constant 0 : index
    %c1_26 = arith.constant 1 : index
    %c1_27 = arith.constant 1 : index
    %c0_28 = arith.constant 0 : index
    %19 = vector.load %arg19[%c0_25, %c1_26, %c1_27, %c0_28] : memref<1x18x18x32xf32, #tpu.memory_space<vmem>>, vector<1x16x16x32xf32>
    tpu.vector_store %arg19[%c0_25, %c1_26, %c1_27, %c0_28], %12 {strides = array<i32>} : memref<1x18x18x32xf32, #tpu.memory_space<vmem>>, vector<1x16x16x32xf32>,
    %c0_29 = arith.constant 0 : index
    %c0_30 = arith.constant 0 : index
    %20 = vector.load %arg5[%c0_29, %c0_30] : memref<288x32xbf16, #tpu.memory_space<vmem>>, vector<288x32xbf16>
    %c0_31 = arith.constant 0 : index
    %c0_32 = arith.constant 0 : index
    %21 = vector.load %arg6[%c0_31, %c0_32] : memref<1x32xf32, #tpu.memory_space<vmem>>, vector<1x32xf32>
    %c0_33 = arith.constant 0 : index
    %c0_34 = arith.constant 0 : index
    %22 = vector.load %arg7[%c0_33, %c0_34] : memref<1x32xf32, #tpu.memory_space<vmem>>, vector<1x32xf32>
    %c0_35 = arith.constant 0 : index
    %c0_36 = arith.constant 0 : index
    %c0_37 = arith.constant 0 : index
    %c0_38 = arith.constant 0 : index
    %23 = vector.load %arg19[%c0_35, %c0_36, %c0_37, %c0_38] : memref<1x18x18x32xf32, #tpu.memory_space<vmem>>, vector<1x16x16x32xf32>
    %c0_39 = arith.constant 0 : index
    %c0_40 = arith.constant 0 : index
    %c1_41 = arith.constant 1 : index
    %c0_42 = arith.constant 0 : index
    %24 = vector.load %arg19[%c0_39, %c0_40, %c1_41, %c0_42] : memref<1x18x18x32xf32, #tpu.memory_space<vmem>>, vector<1x16x16x32xf32>
    %c0_43 = arith.constant 0 : index
    %c0_44 = arith.constant 0 : index
    %c2 = arith.constant 2 : index
    %c0_45 = arith.constant 0 : index
    %25 = vector.load %arg19[%c0_43, %c0_44, %c2, %c0_45] : memref<1x18x18x32xf32, #tpu.memory_space<vmem>>, vector<1x16x16x32xf32>
    %c0_46 = arith.constant 0 : index
    %c1_47 = arith.constant 1 : index
    %c0_48 = arith.constant 0 : index
    %c0_49 = arith.constant 0 : index
    %26 = vector.load %arg19[%c0_46, %c1_47, %c0_48, %c0_49] : memref<1x18x18x32xf32, #tpu.memory_space<vmem>>, vector<1x16x16x32xf32>
    %c0_50 = arith.constant 0 : index
    %c1_51 = arith.constant 1 : index
    %c1_52 = arith.constant 1 : index
    %c0_53 = arith.constant 0 : index
    %27 = vector.load %arg19[%c0_50, %c1_51, %c1_52, %c0_53] : memref<1x18x18x32xf32, #tpu.memory_space<vmem>>, vector<1x16x16x32xf32>
    %c0_54 = arith.constant 0 : index
    %c1_55 = arith.constant 1 : index
    %c2_56 = arith.constant 2 : index
    %c0_57 = arith.constant 0 : index
    %28 = vector.load %arg19[%c0_54, %c1_55, %c2_56, %c0_57] : memref<1x18x18x32xf32, #tpu.memory_space<vmem>>, vector<1x16x16x32xf32>
    %c0_58 = arith.constant 0 : index
    %c2_59 = arith.constant 2 : index
    %c0_60 = arith.constant 0 : index
    %c0_61 = arith.constant 0 : index
    %29 = vector.load %arg19[%c0_58, %c2_59, %c0_60, %c0_61] : memref<1x18x18x32xf32, #tpu.memory_space<vmem>>, vector<1x16x16x32xf32>
    %c0_62 = arith.constant 0 : index
    %c2_63 = arith.constant 2 : index
    %c1_64 = arith.constant 1 : index
    %c0_65 = arith.constant 0 : index
    %30 = vector.load %arg19[%c0_62, %c2_63, %c1_64, %c0_65] : memref<1x18x18x32xf32, #tpu.memory_space<vmem>>, vector<1x16x16x32xf32>
    %c0_66 = arith.constant 0 : index
    %c2_67 = arith.constant 2 : index
    %c2_68 = arith.constant 2 : index
    %c0_69 = arith.constant 0 : index
    %31 = vector.load %arg19[%c0_66, %c2_67, %c2_68, %c0_69] : memref<1x18x18x32xf32, #tpu.memory_space<vmem>>, vector<1x16x16x32xf32>
    %32 = tpu.concatenate %23, %24, %25, %26, %27, %28, %29, %30, %31 in 3 : vector<1x16x16x32xf32>, vector<1x16x16x32xf32>, vector<1x16x16x32xf32>, vector<1x16x16x32xf32>, vector<1x16x16x32xf32>, vector<1x16x16x32xf32>, vector<1x16x16x32xf32>, vector<1x16x16x32xf32>, vector<1x16x16x32xf32> -> vector<1x16x16x288xf32>
    %33 = vector.shape_cast %32 : vector<1x16x16x288xf32> to vector<256x288xf32>
    %34 = arith.truncf %33 : vector<256x288xf32> to vector<256x288xbf16>
    %cst_70 = arith.constant dense<0.000000e+00> : vector<256x32xf32>
    %35 = tpu.matmul %34, %20, %cst_70 {dimension_numbers = #tpu.dot_dimension_numbers<[1], [0], [0], [1], [0, 0, 1, 1], [], []>} : vector<256x288xbf16>, vector<288x32xbf16>, vector<256x32xf32> -> vector<256x32xf32>
    %36 = vector.broadcast %21 : vector<1x32xf32> to vector<256x32xf32>
    %37 = arith.mulf %35, %36 : vector<256x32xf32>
    %38 = vector.broadcast %22 : vector<1x32xf32> to vector<256x32xf32>
    %39 = arith.addf %37, %38 : vector<256x32xf32>
    %cst_71 = arith.constant 0.000000e+00 : f32
    %40 = vector.broadcast %cst_71 : f32 to vector<256x32xf32>
    %41 = arith.maximumf %39, %40 : vector<256x32xf32>
    %42 = vector.shape_cast %41 : vector<256x32xf32> to vector<1x16x16x32xf32>
    %43 = vector.shape_cast %42 : vector<1x16x16x32xf32> to vector<1x8x2x16x32xf32>
    %cst_72 = arith.constant dense<0xFF800000> : vector<1x8x16x32xf32>
    %44 = vector.multi_reduction <maximumf>, %43, %cst_72 [2] : vector<1x8x2x16x32xf32> to vector<1x8x16x32xf32>
    %45 = vector.shape_cast %44 : vector<1x8x16x32xf32> to vector<1x8x8x2x32xf32>
    %cst_73 = arith.constant dense<0xFF800000> : vector<1x8x8x32xf32>
    %46 = vector.multi_reduction <maximumf>, %45, %cst_73 [3] : vector<1x8x8x2x32xf32> to vector<1x8x8x32xf32>
    %cst_74 = arith.constant 0.000000e+00 : f32
    %47 = vector.broadcast %cst_74 : f32 to vector<1x1x10x32xf32>
    %c0_75 = arith.constant 0 : index
    %c0_76 = arith.constant 0 : index
    %c0_77 = arith.constant 0 : index
    %c0_78 = arith.constant 0 : index
    %48 = vector.load %arg20[%c0_75, %c0_76, %c0_77, %c0_78] : memref<1x10x10x32xf32, #tpu.memory_space<vmem>>, vector<1x1x10x32xf32>
    tpu.vector_store %arg20[%c0_75, %c0_76, %c0_77, %c0_78], %47 {strides = array<i32>} : memref<1x10x10x32xf32, #tpu.memory_space<vmem>>, vector<1x1x10x32xf32>,
    %c0_79 = arith.constant 0 : index
    %c9 = arith.constant 9 : index
    %c0_80 = arith.constant 0 : index
    %c0_81 = arith.constant 0 : index
    %49 = vector.load %arg20[%c0_79, %c9, %c0_80, %c0_81] : memref<1x10x10x32xf32, #tpu.memory_space<vmem>>, vector<1x1x10x32xf32>
    tpu.vector_store %arg20[%c0_79, %c9, %c0_80, %c0_81], %47 {strides = array<i32>} : memref<1x10x10x32xf32, #tpu.memory_space<vmem>>, vector<1x1x10x32xf32>,
    %cst_82 = arith.constant 0.000000e+00 : f32
    %50 = vector.broadcast %cst_82 : f32 to vector<1x8x1x32xf32>
    %c0_83 = arith.constant 0 : index
    %c1_84 = arith.constant 1 : index
    %c0_85 = arith.constant 0 : index
    %c0_86 = arith.constant 0 : index
    %51 = vector.load %arg20[%c0_83, %c1_84, %c0_85, %c0_86] : memref<1x10x10x32xf32, #tpu.memory_space<vmem>>, vector<1x8x1x32xf32>
    tpu.vector_store %arg20[%c0_83, %c1_84, %c0_85, %c0_86], %50 {strides = array<i32>} : memref<1x10x10x32xf32, #tpu.memory_space<vmem>>, vector<1x8x1x32xf32>,
    %c0_87 = arith.constant 0 : index
    %c1_88 = arith.constant 1 : index
    %c9_89 = arith.constant 9 : index
    %c0_90 = arith.constant 0 : index
    %52 = vector.load %arg20[%c0_87, %c1_88, %c9_89, %c0_90] : memref<1x10x10x32xf32, #tpu.memory_space<vmem>>, vector<1x8x1x32xf32>
    tpu.vector_store %arg20[%c0_87, %c1_88, %c9_89, %c0_90], %50 {strides = array<i32>} : memref<1x10x10x32xf32, #tpu.memory_space<vmem>>, vector<1x8x1x32xf32>,
    %c0_91 = arith.constant 0 : index
    %c1_92 = arith.constant 1 : index
    %c1_93 = arith.constant 1 : index
    %c0_94 = arith.constant 0 : index
    %53 = vector.load %arg20[%c0_91, %c1_92, %c1_93, %c0_94] : memref<1x10x10x32xf32, #tpu.memory_space<vmem>>, vector<1x8x8x32xf32>
    tpu.vector_store %arg20[%c0_91, %c1_92, %c1_93, %c0_94], %46 {strides = array<i32>} : memref<1x10x10x32xf32, #tpu.memory_space<vmem>>, vector<1x8x8x32xf32>,
    %c0_95 = arith.constant 0 : index
    %c0_96 = arith.constant 0 : index
    %54 = vector.load %arg8[%c0_95, %c0_96] : memref<288x64xbf16, #tpu.memory_space<vmem>>, vector<288x64xbf16>
    %c0_97 = arith.constant 0 : index
    %c0_98 = arith.constant 0 : index
    %55 = vector.load %arg9[%c0_97, %c0_98] : memref<1x64xf32, #tpu.memory_space<vmem>>, vector<1x64xf32>
    %c0_99 = arith.constant 0 : index
    %c0_100 = arith.constant 0 : index
    %56 = vector.load %arg10[%c0_99, %c0_100] : memref<1x64xf32, #tpu.memory_space<vmem>>, vector<1x64xf32>
    %c0_101 = arith.constant 0 : index
    %c0_102 = arith.constant 0 : index
    %c0_103 = arith.constant 0 : index
    %c0_104 = arith.constant 0 : index
    %57 = vector.load %arg20[%c0_101, %c0_102, %c0_103, %c0_104] : memref<1x10x10x32xf32, #tpu.memory_space<vmem>>, vector<1x8x8x32xf32>
    %c0_105 = arith.constant 0 : index
    %c0_106 = arith.constant 0 : index
    %c1_107 = arith.constant 1 : index
    %c0_108 = arith.constant 0 : index
    %58 = vector.load %arg20[%c0_105, %c0_106, %c1_107, %c0_108] : memref<1x10x10x32xf32, #tpu.memory_space<vmem>>, vector<1x8x8x32xf32>
    %c0_109 = arith.constant 0 : index
    %c0_110 = arith.constant 0 : index
    %c2_111 = arith.constant 2 : index
    %c0_112 = arith.constant 0 : index
    %59 = vector.load %arg20[%c0_109, %c0_110, %c2_111, %c0_112] : memref<1x10x10x32xf32, #tpu.memory_space<vmem>>, vector<1x8x8x32xf32>
    %c0_113 = arith.constant 0 : index
    %c1_114 = arith.constant 1 : index
    %c0_115 = arith.constant 0 : index
    %c0_116 = arith.constant 0 : index
    %60 = vector.load %arg20[%c0_113, %c1_114, %c0_115, %c0_116] : memref<1x10x10x32xf32, #tpu.memory_space<vmem>>, vector<1x8x8x32xf32>
    %c0_117 = arith.constant 0 : index
    %c1_118 = arith.constant 1 : index
    %c1_119 = arith.constant 1 : index
    %c0_120 = arith.constant 0 : index
    %61 = vector.load %arg20[%c0_117, %c1_118, %c1_119, %c0_120] : memref<1x10x10x32xf32, #tpu.memory_space<vmem>>, vector<1x8x8x32xf32>
    %c0_121 = arith.constant 0 : index
    %c1_122 = arith.constant 1 : index
    %c2_123 = arith.constant 2 : index
    %c0_124 = arith.constant 0 : index
    %62 = vector.load %arg20[%c0_121, %c1_122, %c2_123, %c0_124] : memref<1x10x10x32xf32, #tpu.memory_space<vmem>>, vector<1x8x8x32xf32>
    %c0_125 = arith.constant 0 : index
    %c2_126 = arith.constant 2 : index
    %c0_127 = arith.constant 0 : index
    %c0_128 = arith.constant 0 : index
    %63 = vector.load %arg20[%c0_125, %c2_126, %c0_127, %c0_128] : memref<1x10x10x32xf32, #tpu.memory_space<vmem>>, vector<1x8x8x32xf32>
    %c0_129 = arith.constant 0 : index
    %c2_130 = arith.constant 2 : index
    %c1_131 = arith.constant 1 : index
    %c0_132 = arith.constant 0 : index
    %64 = vector.load %arg20[%c0_129, %c2_130, %c1_131, %c0_132] : memref<1x10x10x32xf32, #tpu.memory_space<vmem>>, vector<1x8x8x32xf32>
    %c0_133 = arith.constant 0 : index
    %c2_134 = arith.constant 2 : index
    %c2_135 = arith.constant 2 : index
    %c0_136 = arith.constant 0 : index
    %65 = vector.load %arg20[%c0_133, %c2_134, %c2_135, %c0_136] : memref<1x10x10x32xf32, #tpu.memory_space<vmem>>, vector<1x8x8x32xf32>
    %66 = tpu.concatenate %57, %58, %59, %60, %61, %62, %63, %64, %65 in 3 : vector<1x8x8x32xf32>, vector<1x8x8x32xf32>, vector<1x8x8x32xf32>, vector<1x8x8x32xf32>, vector<1x8x8x32xf32>, vector<1x8x8x32xf32>, vector<1x8x8x32xf32>, vector<1x8x8x32xf32>, vector<1x8x8x32xf32> -> vector<1x8x8x288xf32>
    %67 = vector.shape_cast %66 : vector<1x8x8x288xf32> to vector<64x288xf32>
    %68 = arith.truncf %67 : vector<64x288xf32> to vector<64x288xbf16>
    %cst_137 = arith.constant dense<0.000000e+00> : vector<64x64xf32>
    %69 = tpu.matmul %68, %54, %cst_137 {dimension_numbers = #tpu.dot_dimension_numbers<[1], [0], [0], [1], [0, 0, 1, 1], [], []>} : vector<64x288xbf16>, vector<288x64xbf16>, vector<64x64xf32> -> vector<64x64xf32>
    %70 = vector.broadcast %55 : vector<1x64xf32> to vector<64x64xf32>
    %71 = arith.mulf %69, %70 : vector<64x64xf32>
    %72 = vector.broadcast %56 : vector<1x64xf32> to vector<64x64xf32>
    %73 = arith.addf %71, %72 : vector<64x64xf32>
    %cst_138 = arith.constant 0.000000e+00 : f32
    %74 = vector.broadcast %cst_138 : f32 to vector<64x64xf32>
    %75 = arith.maximumf %73, %74 : vector<64x64xf32>
    %76 = vector.shape_cast %75 : vector<64x64xf32> to vector<1x8x8x64xf32>
    %cst_139 = arith.constant 0.000000e+00 : f32
    %77 = vector.broadcast %cst_139 : f32 to vector<1x1x10x64xf32>
    %c0_140 = arith.constant 0 : index
    %c0_141 = arith.constant 0 : index
    %c0_142 = arith.constant 0 : index
    %c0_143 = arith.constant 0 : index
    %78 = vector.load %arg21[%c0_140, %c0_141, %c0_142, %c0_143] : memref<1x10x10x64xf32, #tpu.memory_space<vmem>>, vector<1x1x10x64xf32>
    tpu.vector_store %arg21[%c0_140, %c0_141, %c0_142, %c0_143], %77 {strides = array<i32>} : memref<1x10x10x64xf32, #tpu.memory_space<vmem>>, vector<1x1x10x64xf32>,
    %c0_144 = arith.constant 0 : index
    %c9_145 = arith.constant 9 : index
    %c0_146 = arith.constant 0 : index
    %c0_147 = arith.constant 0 : index
    %79 = vector.load %arg21[%c0_144, %c9_145, %c0_146, %c0_147] : memref<1x10x10x64xf32, #tpu.memory_space<vmem>>, vector<1x1x10x64xf32>
    tpu.vector_store %arg21[%c0_144, %c9_145, %c0_146, %c0_147], %77 {strides = array<i32>} : memref<1x10x10x64xf32, #tpu.memory_space<vmem>>, vector<1x1x10x64xf32>,
    %cst_148 = arith.constant 0.000000e+00 : f32
    %80 = vector.broadcast %cst_148 : f32 to vector<1x8x1x64xf32>
    %c0_149 = arith.constant 0 : index
    %c1_150 = arith.constant 1 : index
    %c0_151 = arith.constant 0 : index
    %c0_152 = arith.constant 0 : index
    %81 = vector.load %arg21[%c0_149, %c1_150, %c0_151, %c0_152] : memref<1x10x10x64xf32, #tpu.memory_space<vmem>>, vector<1x8x1x64xf32>
    tpu.vector_store %arg21[%c0_149, %c1_150, %c0_151, %c0_152], %80 {strides = array<i32>} : memref<1x10x10x64xf32, #tpu.memory_space<vmem>>, vector<1x8x1x64xf32>,
    %c0_153 = arith.constant 0 : index
    %c1_154 = arith.constant 1 : index
    %c9_155 = arith.constant 9 : index
    %c0_156 = arith.constant 0 : index
    %82 = vector.load %arg21[%c0_153, %c1_154, %c9_155, %c0_156] : memref<1x10x10x64xf32, #tpu.memory_space<vmem>>, vector<1x8x1x64xf32>
    tpu.vector_store %arg21[%c0_153, %c1_154, %c9_155, %c0_156], %80 {strides = array<i32>} : memref<1x10x10x64xf32, #tpu.memory_space<vmem>>, vector<1x8x1x64xf32>,
    %c0_157 = arith.constant 0 : index
    %c1_158 = arith.constant 1 : index
    %c1_159 = arith.constant 1 : index
    %c0_160 = arith.constant 0 : index
    %83 = vector.load %arg21[%c0_157, %c1_158, %c1_159, %c0_160] : memref<1x10x10x64xf32, #tpu.memory_space<vmem>>, vector<1x8x8x64xf32>
    tpu.vector_store %arg21[%c0_157, %c1_158, %c1_159, %c0_160], %76 {strides = array<i32>} : memref<1x10x10x64xf32, #tpu.memory_space<vmem>>, vector<1x8x8x64xf32>,
    %c0_161 = arith.constant 0 : index
    %c0_162 = arith.constant 0 : index
    %84 = vector.load %arg11[%c0_161, %c0_162] : memref<576x64xbf16, #tpu.memory_space<vmem>>, vector<576x64xbf16>
    %c0_163 = arith.constant 0 : index
    %c0_164 = arith.constant 0 : index
    %85 = vector.load %arg12[%c0_163, %c0_164] : memref<1x64xf32, #tpu.memory_space<vmem>>, vector<1x64xf32>
    %c0_165 = arith.constant 0 : index
    %c0_166 = arith.constant 0 : index
    %86 = vector.load %arg13[%c0_165, %c0_166] : memref<1x64xf32, #tpu.memory_space<vmem>>, vector<1x64xf32>
    %c0_167 = arith.constant 0 : index
    %c0_168 = arith.constant 0 : index
    %c0_169 = arith.constant 0 : index
    %c0_170 = arith.constant 0 : index
    %87 = vector.load %arg21[%c0_167, %c0_168, %c0_169, %c0_170] : memref<1x10x10x64xf32, #tpu.memory_space<vmem>>, vector<1x8x8x64xf32>
    %c0_171 = arith.constant 0 : index
    %c0_172 = arith.constant 0 : index
    %c1_173 = arith.constant 1 : index
    %c0_174 = arith.constant 0 : index
    %88 = vector.load %arg21[%c0_171, %c0_172, %c1_173, %c0_174] : memref<1x10x10x64xf32, #tpu.memory_space<vmem>>, vector<1x8x8x64xf32>
    %c0_175 = arith.constant 0 : index
    %c0_176 = arith.constant 0 : index
    %c2_177 = arith.constant 2 : index
    %c0_178 = arith.constant 0 : index
    %89 = vector.load %arg21[%c0_175, %c0_176, %c2_177, %c0_178] : memref<1x10x10x64xf32, #tpu.memory_space<vmem>>, vector<1x8x8x64xf32>
    %c0_179 = arith.constant 0 : index
    %c1_180 = arith.constant 1 : index
    %c0_181 = arith.constant 0 : index
    %c0_182 = arith.constant 0 : index
    %90 = vector.load %arg21[%c0_179, %c1_180, %c0_181, %c0_182] : memref<1x10x10x64xf32, #tpu.memory_space<vmem>>, vector<1x8x8x64xf32>
    %c0_183 = arith.constant 0 : index
    %c1_184 = arith.constant 1 : index
    %c1_185 = arith.constant 1 : index
    %c0_186 = arith.constant 0 : index
    %91 = vector.load %arg21[%c0_183, %c1_184, %c1_185, %c0_186] : memref<1x10x10x64xf32, #tpu.memory_space<vmem>>, vector<1x8x8x64xf32>
    %c0_187 = arith.constant 0 : index
    %c1_188 = arith.constant 1 : index
    %c2_189 = arith.constant 2 : index
    %c0_190 = arith.constant 0 : index
    %92 = vector.load %arg21[%c0_187, %c1_188, %c2_189, %c0_190] : memref<1x10x10x64xf32, #tpu.memory_space<vmem>>, vector<1x8x8x64xf32>
    %c0_191 = arith.constant 0 : index
    %c2_192 = arith.constant 2 : index
    %c0_193 = arith.constant 0 : index
    %c0_194 = arith.constant 0 : index
    %93 = vector.load %arg21[%c0_191, %c2_192, %c0_193, %c0_194] : memref<1x10x10x64xf32, #tpu.memory_space<vmem>>, vector<1x8x8x64xf32>
    %c0_195 = arith.constant 0 : index
    %c2_196 = arith.constant 2 : index
    %c1_197 = arith.constant 1 : index
    %c0_198 = arith.constant 0 : index
    %94 = vector.load %arg21[%c0_195, %c2_196, %c1_197, %c0_198] : memref<1x10x10x64xf32, #tpu.memory_space<vmem>>, vector<1x8x8x64xf32>
    %c0_199 = arith.constant 0 : index
    %c2_200 = arith.constant 2 : index
    %c2_201 = arith.constant 2 : index
    %c0_202 = arith.constant 0 : index
    %95 = vector.load %arg21[%c0_199, %c2_200, %c2_201, %c0_202] : memref<1x10x10x64xf32, #tpu.memory_space<vmem>>, vector<1x8x8x64xf32>
    %96 = tpu.concatenate %87, %88, %89, %90, %91, %92, %93, %94, %95 in 3 : vector<1x8x8x64xf32>, vector<1x8x8x64xf32>, vector<1x8x8x64xf32>, vector<1x8x8x64xf32>, vector<1x8x8x64xf32>, vector<1x8x8x64xf32>, vector<1x8x8x64xf32>, vector<1x8x8x64xf32>, vector<1x8x8x64xf32> -> vector<1x8x8x576xf32>
    %97 = vector.shape_cast %96 : vector<1x8x8x576xf32> to vector<64x576xf32>
    %98 = arith.truncf %97 : vector<64x576xf32> to vector<64x576xbf16>
    %cst_203 = arith.constant dense<0.000000e+00> : vector<64x64xf32>
    %99 = tpu.matmul %98, %84, %cst_203 {dimension_numbers = #tpu.dot_dimension_numbers<[1], [0], [0], [1], [0, 0, 1, 1], [], []>} : vector<64x576xbf16>, vector<576x64xbf16>, vector<64x64xf32> -> vector<64x64xf32>
    %100 = vector.broadcast %85 : vector<1x64xf32> to vector<64x64xf32>
    %101 = arith.mulf %99, %100 : vector<64x64xf32>
    %102 = vector.broadcast %86 : vector<1x64xf32> to vector<64x64xf32>
    %103 = arith.addf %101, %102 : vector<64x64xf32>
    %cst_204 = arith.constant 0.000000e+00 : f32
    %104 = vector.broadcast %cst_204 : f32 to vector<64x64xf32>
    %105 = arith.maximumf %103, %104 : vector<64x64xf32>
    %106 = vector.shape_cast %105 : vector<64x64xf32> to vector<1x8x8x64xf32>
    %107 = vector.shape_cast %106 : vector<1x8x8x64xf32> to vector<1x4x2x8x64xf32>
    %cst_205 = arith.constant dense<0xFF800000> : vector<1x4x8x64xf32>
    %108 = vector.multi_reduction <maximumf>, %107, %cst_205 [2] : vector<1x4x2x8x64xf32> to vector<1x4x8x64xf32>
    %109 = vector.shape_cast %108 : vector<1x4x8x64xf32> to vector<1x4x4x2x64xf32>
    %cst_206 = arith.constant dense<0xFF800000> : vector<1x4x4x64xf32>
    %110 = vector.multi_reduction <maximumf>, %109, %cst_206 [3] : vector<1x4x4x2x64xf32> to vector<1x4x4x64xf32>
    %111 = arith.truncf %110 : vector<1x4x4x64xf32> to vector<1x4x4x64xbf16>
    %112 = vector.extract_strided_slice %111 {offsets = [0, 0, 0, 0], sizes = [1, 1, 1, 64], strides = [1, 1, 1, 1]} : vector<1x4x4x64xbf16> to vector<1x1x1x64xbf16>
    %113 = vector.shape_cast %112 : vector<1x1x1x64xbf16> to vector<1x64xbf16>
    %114 = vector.extract_strided_slice %111 {offsets = [0, 0, 1, 0], sizes = [1, 1, 1, 64], strides = [1, 1, 1, 1]} : vector<1x4x4x64xbf16> to vector<1x1x1x64xbf16>
    %115 = vector.shape_cast %114 : vector<1x1x1x64xbf16> to vector<1x64xbf16>
    %116 = vector.extract_strided_slice %111 {offsets = [0, 0, 2, 0], sizes = [1, 1, 1, 64], strides = [1, 1, 1, 1]} : vector<1x4x4x64xbf16> to vector<1x1x1x64xbf16>
    %117 = vector.shape_cast %116 : vector<1x1x1x64xbf16> to vector<1x64xbf16>
    %118 = vector.extract_strided_slice %111 {offsets = [0, 0, 3, 0], sizes = [1, 1, 1, 64], strides = [1, 1, 1, 1]} : vector<1x4x4x64xbf16> to vector<1x1x1x64xbf16>
    %119 = vector.shape_cast %118 : vector<1x1x1x64xbf16> to vector<1x64xbf16>
    %120 = vector.extract_strided_slice %111 {offsets = [0, 1, 0, 0], sizes = [1, 1, 1, 64], strides = [1, 1, 1, 1]} : vector<1x4x4x64xbf16> to vector<1x1x1x64xbf16>
    %121 = vector.shape_cast %120 : vector<1x1x1x64xbf16> to vector<1x64xbf16>
    %122 = vector.extract_strided_slice %111 {offsets = [0, 1, 1, 0], sizes = [1, 1, 1, 64], strides = [1, 1, 1, 1]} : vector<1x4x4x64xbf16> to vector<1x1x1x64xbf16>
    %123 = vector.shape_cast %122 : vector<1x1x1x64xbf16> to vector<1x64xbf16>
    %124 = vector.extract_strided_slice %111 {offsets = [0, 1, 2, 0], sizes = [1, 1, 1, 64], strides = [1, 1, 1, 1]} : vector<1x4x4x64xbf16> to vector<1x1x1x64xbf16>
    %125 = vector.shape_cast %124 : vector<1x1x1x64xbf16> to vector<1x64xbf16>
    %126 = vector.extract_strided_slice %111 {offsets = [0, 1, 3, 0], sizes = [1, 1, 1, 64], strides = [1, 1, 1, 1]} : vector<1x4x4x64xbf16> to vector<1x1x1x64xbf16>
    %127 = vector.shape_cast %126 : vector<1x1x1x64xbf16> to vector<1x64xbf16>
    %128 = vector.extract_strided_slice %111 {offsets = [0, 2, 0, 0], sizes = [1, 1, 1, 64], strides = [1, 1, 1, 1]} : vector<1x4x4x64xbf16> to vector<1x1x1x64xbf16>
    %129 = vector.shape_cast %128 : vector<1x1x1x64xbf16> to vector<1x64xbf16>
    %130 = vector.extract_strided_slice %111 {offsets = [0, 2, 1, 0], sizes = [1, 1, 1, 64], strides = [1, 1, 1, 1]} : vector<1x4x4x64xbf16> to vector<1x1x1x64xbf16>
    %131 = vector.shape_cast %130 : vector<1x1x1x64xbf16> to vector<1x64xbf16>
    %132 = vector.extract_strided_slice %111 {offsets = [0, 2, 2, 0], sizes = [1, 1, 1, 64], strides = [1, 1, 1, 1]} : vector<1x4x4x64xbf16> to vector<1x1x1x64xbf16>
    %133 = vector.shape_cast %132 : vector<1x1x1x64xbf16> to vector<1x64xbf16>
    %134 = vector.extract_strided_slice %111 {offsets = [0, 2, 3, 0], sizes = [1, 1, 1, 64], strides = [1, 1, 1, 1]} : vector<1x4x4x64xbf16> to vector<1x1x1x64xbf16>
    %135 = vector.shape_cast %134 : vector<1x1x1x64xbf16> to vector<1x64xbf16>
    %136 = vector.extract_strided_slice %111 {offsets = [0, 3, 0, 0], sizes = [1, 1, 1, 64], strides = [1, 1, 1, 1]} : vector<1x4x4x64xbf16> to vector<1x1x1x64xbf16>
    %137 = vector.shape_cast %136 : vector<1x1x1x64xbf16> to vector<1x64xbf16>
    %138 = vector.extract_strided_slice %111 {offsets = [0, 3, 1, 0], sizes = [1, 1, 1, 64], strides = [1, 1, 1, 1]} : vector<1x4x4x64xbf16> to vector<1x1x1x64xbf16>
    %139 = vector.shape_cast %138 : vector<1x1x1x64xbf16> to vector<1x64xbf16>
    %140 = vector.extract_strided_slice %111 {offsets = [0, 3, 2, 0], sizes = [1, 1, 1, 64], strides = [1, 1, 1, 1]} : vector<1x4x4x64xbf16> to vector<1x1x1x64xbf16>
    %141 = vector.shape_cast %140 : vector<1x1x1x64xbf16> to vector<1x64xbf16>
    %142 = vector.extract_strided_slice %111 {offsets = [0, 3, 3, 0], sizes = [1, 1, 1, 64], strides = [1, 1, 1, 1]} : vector<1x4x4x64xbf16> to vector<1x1x1x64xbf16>
    %143 = vector.shape_cast %142 : vector<1x1x1x64xbf16> to vector<1x64xbf16>
    %144 = tpu.concatenate %113, %115, %117, %119, %121, %123, %125, %127, %129, %131, %133, %135, %137, %139, %141, %143 in 1 : vector<1x64xbf16>, vector<1x64xbf16>, vector<1x64xbf16>, vector<1x64xbf16>, vector<1x64xbf16>, vector<1x64xbf16>, vector<1x64xbf16>, vector<1x64xbf16>, vector<1x64xbf16>, vector<1x64xbf16>, vector<1x64xbf16>, vector<1x64xbf16>, vector<1x64xbf16>, vector<1x64xbf16>, vector<1x64xbf16>, vector<1x64xbf16> -> vector<1x1024xbf16>
    %c0_207 = arith.constant 0 : index
    %c0_208 = arith.constant 0 : index
    %145 = vector.load %arg14[%c0_207, %c0_208] : memref<1024x64xbf16, #tpu.memory_space<vmem>>, vector<1024x64xbf16>
    %cst_209 = arith.constant dense<0.000000e+00> : vector<1x64xf32>
    %146 = tpu.matmul %144, %145, %cst_209 {dimension_numbers = #tpu.dot_dimension_numbers<[1], [0], [0], [1], [0, 0, 1, 1], [], []>} : vector<1x1024xbf16>, vector<1024x64xbf16>, vector<1x64xf32> -> vector<1x64xf32>
    %c0_210 = arith.constant 0 : index
    %c0_211 = arith.constant 0 : index
    %147 = vector.load %arg15[%c0_210, %c0_211] : memref<1x64xf32, #tpu.memory_space<vmem>>, vector<1x64xf32>
    %148 = arith.addf %146, %147 : vector<1x64xf32>
    %cst_212 = arith.constant 0.000000e+00 : f32
    %149 = vector.broadcast %cst_212 : f32 to vector<1x64xf32>
    %150 = arith.maximumf %148, %149 : vector<1x64xf32>
    %151 = arith.truncf %150 : vector<1x64xf32> to vector<1x64xbf16>
    %c0_213 = arith.constant 0 : index
    %c0_214 = arith.constant 0 : index
    %152 = vector.load %arg16[%c0_213, %c0_214] : memref<64x128xbf16, #tpu.memory_space<vmem>>, vector<64x128xbf16>
    %cst_215 = arith.constant dense<0.000000e+00> : vector<1x128xf32>
    %153 = tpu.matmul %151, %152, %cst_215 {dimension_numbers = #tpu.dot_dimension_numbers<[1], [0], [0], [1], [0, 0, 1, 1], [], []>} : vector<1x64xbf16>, vector<64x128xbf16>, vector<1x128xf32> -> vector<1x128xf32>
    %c0_216 = arith.constant 0 : index
    %c0_217 = arith.constant 0 : index
    %154 = vector.load %arg17[%c0_216, %c0_217] : memref<1x128xf32, #tpu.memory_space<vmem>>, vector<1x128xf32>
    %155 = arith.addf %153, %154 : vector<1x128xf32>
    %c0_218 = arith.constant 0 : index
    %c0_219 = arith.constant 0 : index
    %c0_220 = arith.constant 0 : index
    %156 = vector.load %arg18[%c0_218, %c0_219, %c0_220] : memref<1x1x128xf32, #tpu.memory_space<vmem>>, vector<1x1x128xf32>
    %157 = vector.shape_cast %156 : vector<1x1x128xf32> to vector<1x128xf32>
    %158 = vector.shape_cast %155 : vector<1x128xf32> to vector<1x1x128xf32>
    tpu.vector_store %arg18[%c0_218, %c0_219, %c0_220], %158 {strides = array<i32>} : memref<1x1x128xf32, #tpu.memory_space<vmem>>, vector<1x1x128xf32>,
    return
  }
  func.func @transform_0(%arg0: i32) -> (i32, i32, i32) {
    %c0_i32 = arith.constant 0 : i32
    %c0_i32_0 = arith.constant 0 : i32
    %c0_i32_1 = arith.constant 0 : i32
    return %arg0, %c0_i32, %c0_i32_0 : i32, i32, i32
  }
  func.func @transform_1(%arg0: i32) -> (i32, i32) {
    %c0_i32 = arith.constant 0 : i32
    %c0_i32_0 = arith.constant 0 : i32
    %c0_i32_1 = arith.constant 0 : i32
    return %c0_i32, %c0_i32_0 : i32, i32
  }
  func.func @transform_2(%arg0: i32) -> (i32, i32) {
    %c0_i32 = arith.constant 0 : i32
    %c0_i32_0 = arith.constant 0 : i32
    %c0_i32_1 = arith.constant 0 : i32
    return %c0_i32, %c0_i32_0 : i32, i32
  }
  func.func @transform_3(%arg0: i32) -> (i32, i32) {
    %c0_i32 = arith.constant 0 : i32
    %c0_i32_0 = arith.constant 0 : i32
    %c0_i32_1 = arith.constant 0 : i32
    return %c0_i32, %c0_i32_0 : i32, i32
  }
  func.func @transform_4(%arg0: i32) -> (i32, i32) {
    %c0_i32 = arith.constant 0 : i32
    %c0_i32_0 = arith.constant 0 : i32
    %c0_i32_1 = arith.constant 0 : i32
    return %c0_i32, %c0_i32_0 : i32, i32
  }
  func.func @transform_5(%arg0: i32) -> (i32, i32) {
    %c0_i32 = arith.constant 0 : i32
    %c0_i32_0 = arith.constant 0 : i32
    %c0_i32_1 = arith.constant 0 : i32
    return %c0_i32, %c0_i32_0 : i32, i32
  }
  func.func @transform_6(%arg0: i32) -> (i32, i32) {
    %c0_i32 = arith.constant 0 : i32
    %c0_i32_0 = arith.constant 0 : i32
    %c0_i32_1 = arith.constant 0 : i32
    return %c0_i32, %c0_i32_0 : i32, i32
  }
  func.func @transform_7(%arg0: i32) -> (i32, i32) {
    %c0_i32 = arith.constant 0 : i32
    %c0_i32_0 = arith.constant 0 : i32
    %c0_i32_1 = arith.constant 0 : i32
    return %c0_i32, %c0_i32_0 : i32, i32
  }
  func.func @transform_8(%arg0: i32) -> (i32, i32) {
    %c0_i32 = arith.constant 0 : i32
    %c0_i32_0 = arith.constant 0 : i32
    %c0_i32_1 = arith.constant 0 : i32
    return %c0_i32, %c0_i32_0 : i32, i32
  }
  func.func @transform_9(%arg0: i32) -> (i32, i32) {
    %c0_i32 = arith.constant 0 : i32
    %c0_i32_0 = arith.constant 0 : i32
    %c0_i32_1 = arith.constant 0 : i32
    return %c0_i32, %c0_i32_0 : i32, i32
  }
  func.func @transform_10(%arg0: i32) -> (i32, i32) {
    %c0_i32 = arith.constant 0 : i32
    %c0_i32_0 = arith.constant 0 : i32
    %c0_i32_1 = arith.constant 0 : i32
    return %c0_i32, %c0_i32_0 : i32, i32
  }
  func.func @transform_11(%arg0: i32) -> (i32, i32) {
    %c0_i32 = arith.constant 0 : i32
    %c0_i32_0 = arith.constant 0 : i32
    %c0_i32_1 = arith.constant 0 : i32
    return %c0_i32, %c0_i32_0 : i32, i32
  }
  func.func @transform_12(%arg0: i32) -> (i32, i32) {
    %c0_i32 = arith.constant 0 : i32
    %c0_i32_0 = arith.constant 0 : i32
    %c0_i32_1 = arith.constant 0 : i32
    return %c0_i32, %c0_i32_0 : i32, i32
  }
  func.func @transform_13(%arg0: i32) -> (i32, i32) {
    %c0_i32 = arith.constant 0 : i32
    %c0_i32_0 = arith.constant 0 : i32
    %c0_i32_1 = arith.constant 0 : i32
    return %c0_i32, %c0_i32_0 : i32, i32
  }
  func.func @transform_14(%arg0: i32) -> (i32, i32) {
    %c0_i32 = arith.constant 0 : i32
    %c0_i32_0 = arith.constant 0 : i32
    %c0_i32_1 = arith.constant 0 : i32
    return %c0_i32, %c0_i32_0 : i32, i32
  }
  func.func @transform_15(%arg0: i32) -> (i32, i32) {
    %c0_i32 = arith.constant 0 : i32
    %c0_i32_0 = arith.constant 0 : i32
    %c0_i32_1 = arith.constant 0 : i32
    return %c0_i32, %c0_i32_0 : i32, i32
  }
  func.func @transform_16(%arg0: i32) -> (i32, i32) {
    %c0_i32 = arith.constant 0 : i32
    %c0_i32_0 = arith.constant 0 : i32
    %c0_i32_1 = arith.constant 0 : i32
    return %c0_i32, %c0_i32_0 : i32, i32
  }
  func.func @transform_17(%arg0: i32) -> (i32, i32, i32) {
    %c0_i32 = arith.constant 0 : i32
    %c0_i32_0 = arith.constant 0 : i32
    %c0_i32_1 = arith.constant 0 : i32
    return %arg0, %c0_i32, %c0_i32_0 : i32, i32, i32
  }
}

</mosaic_0001>

<bundles_post_ra>
// kernel: cnn_small_bn_forward.1
= control target key start
LH: loop header
LB: loop body
LE: loop exit
PB: predicated region body
PF: predicated region fallthrough
CT: control target
= control target key end

     0   :  { %s10843_s0 = inlined_call_operand.vmem [shape: bf16[2,256,32], index: 0, kind: input, shape index: {}]   ;;  %s10844_s1 = inlined_call_operand.vmem [shape: bf16[32,32], index: 1, kind: input, shape index: {}]   ;;  %s10845_s2 = inlined_call_operand.vmem [shape: f32[1,32], index: 2, kind: input, shape index: {}]   ;;  %s10846_s3 = inlined_call_operand.vmem [shape: f32[1,32], index: 3, kind: input, shape index: {}]   ;;  %s10847_s4 = inlined_call_operand.vmem [shape: bf16[288,32], index: 4, kind: input, shape index: {}]   ;;  %s10848_s5 = inlined_call_operand.vmem [shape: f32[1,32], index: 5, kind: input, shape index: {}]   ;;  %s10849_s6 = inlined_call_operand.vmem [shape: f32[1,32], index: 6, kind: input, shape index: {}]   ;;  %s10850_s7 = inlined_call_operand.vmem [shape: bf16[288,64], index: 7, kind: input, shape index: {}]   ;;  %s10851_s8 = inlined_call_operand.vmem [shape: f32[1,64], index: 8, kind: input, shape index: {}]   ;;  %s10852_s9 = inlined_call_operand.vmem [shape: f32[1,64], index: 9, kind: input, shape index: {}]   ;;  %s10853_s10 = inlined_call_operand.vmem [shape: bf16[576,64], index: 10, kind: input, shape index: {}]   ;;  %s10854_s11 = inlined_call_operand.vmem [shape: f32[1,64], index: 11, kind: input, shape index: {}]   ;;  %s10855_s12 = inlined_call_operand.vmem [shape: f32[1,64], index: 12, kind: input, shape index: {}]   ;;  %s10856_s13 = inlined_call_operand.vmem [shape: bf16[1024,64], index: 13, kind: input, shape index: {}]   ;;  %s10857_s14 = inlined_call_operand.vmem [shape: f32[1,64], index: 14, kind: input, shape index: {}]   ;;  %s10858_s15 = inlined_call_operand.vmem [shape: bf16[64,128], index: 15, kind: input, shape index: {}]   ;;  %s10859_s16 = inlined_call_operand.vmem [shape: f32[1,128], index: 16, kind: input, shape index: {}]   ;;  %s10860_s17 = inlined_call_operand.hbm [shape: f32[2,1,128], index: 17, kind: output, shape index: {}]  }
   0x1   :  { %10873 = sst [smem:[#allocation13_spill]] %s10843_s0 }
   0x2   :  { %10874 = sst [smem:[#allocation14_spill]] %s10844_s1 }
   0x3   :  { %10875 = sst [smem:[#allocation15_spill]] %s10845_s2 }
   0x4   :  { %10876 = sst [smem:[#allocation16_spill]] %s10846_s3 }
   0x5   :  { %22 = vsyncpa [#allocation6], 0 }
   0x6   :  { %24 = vsyncpa [#allocation6 + $0x1], 0  ;;  %s8332_s24 = smov 0   ;;  %s8334_s25 = smov 0  }
   0x7   :  { %s8336_s26 = smov 0   ;;  %s8338_s27 = smov 0  }
   0x8 LB: > { %10877 = sst [smem:[#allocation8_spill]] %s8221_s24  ;;  %s8353_s28 = sadd.s32 4294967295, %s8233_s27   ;;  %s8233_s27 = sphi %s8338_s27, %s10893_s27   ;;  %s8229_s26 = sphi %s8336_s26, %s10895_s26   ;;  %s8225_s25 = sphi %s8334_s25, %s10897_s25   ;;  %s8221_s24 = sphi %s8332_s24, %s10896_s24  }
   0x9   : > { %10878 = sst [smem:[#allocation9_spill]] %s8229_s26  ;;  %s6576_s29 = sadd.s32 4294967294, %s8233_s27  }
   0xa   : > { %s8357_s0 = sadd.s32 1, %s8233_s27   ;;  %s399_s30 = sadd.s32 1, %s8229_s26 }
   0xb   : > { %10879 = sst [smem:[#allocation10_spill]] %s8357_s0  ;;  %s396_s18 = ssub.s32 %s8233_s27, %s8357_s0 }
   0xc   : > { %p409_p0 = scmp.ne.s32.totalorder %s8229_s26, %s8225_s25  ;;  %p397_p1 = scmp.eq.s32.totalorder %s396_s18, 0 }
   0xd   : > { %p410_p2 = scmp.eq.s32.totalorder %s8353_s28, 1  ;;  %p415_p3 = scmp.ne.s32.totalorder %s8225_s25, %s8221_s24 }
   0xe   : > { %p416_p4 = scmp.eq.s32.totalorder %s6576_s29, 1  ;;  %p6579_p7 = scmp.ge.s32.totalorder %s8233_s27, 1 }
   0xf   : > { %s8368_s19 = scalar_select %p397_p1, %s8229_s26, %s399_s30  }
  0x10   : > { %p8370_p5 = por %p410_p2, %p409_p0  ;;  %p8374_p6 = por %p416_p4, %p415_p3 }
  0x11   : > { %10880 = sst [smem:[#allocation11_spill]] %s8368_s19  ;;  %p490_p8 = scmp.lt.s32.totalorder %s8233_s27, 3 }
  0x12   : > { %s10882_s20 = scalar_select %p8374_p6, 1, 0 }
  0x13   : > { %p491_p9 = pnand %p6579_p7, %p490_p8 }
  0x14   : > { %10883 = sst [smem:[#allocation12_spill]] %s10882_s20  ;;  %s10884_s23 = sld [smem:[#allocation14_spill]] (!%p491_p9)  ;;  %vm675_vm0 = vcmask (!%p491_p9), 261120   ;;  %vm997_vm1 = vcmask (!%p491_p9), 254976   ;;  %v10871_v18 = vmov (!%p491_p9), 0.0   ;;  %vm1004_vm2 = vcmask (!%p491_p9), 253952  }
  0x15   : > { %494 = sbr.rel (%p491_p9) target bundleno = 2207 (0x89f), region = 88  ;;  %p541_p10 = scmp.lt.s32.totalorder (!%p491_p9), %s8353_s28, 1  ;;  %995 = vst.msk [vmem:[#allocation2] sm:$0xff] (!%p491_p9), %vm675_vm0, %v10871_v18  ;;  %996 = vst.msk [vmem:[#allocation2 + $0x8] sm:$0xff] (!%p491_p9), %vm675_vm0, %v10871_v18  ;;  %v8023_v25 = vld [vmem:[%s10847_s4 + $0x80] sm:$0xff] (!%p491_p9)   ;;  %v8024_v26 = vld [vmem:[%s10847_s4 + $0x88] sm:$0xff] (!%p491_p9)  }
  0x16   : > { %s10885_s20 = sld [smem:[#allocation13_spill]] (!%p491_p9)  ;;  %998 = vst.msk [vmem:[#allocation2 + $0x10] sm:$0x3] (!%p491_p9), %vm997_vm1, %v10871_v18  ;;  %1002 = vst.msk [vmem:[#allocation2 + $0x1a8] sm:$0x3] (!%p491_p9), %vm997_vm1, %v10871_v18  ;;  %s10867_s26 = smov (!%p491_p9), 32  }
  0x17   : > { %1000 = vst.msk [vmem:[#allocation2 + $0x198] sm:$0xff] (!%p491_p9), %vm675_vm0, %v10871_v18  ;;  %1001 = vst.msk [vmem:[#allocation2 + $0x1a0] sm:$0xff] (!%p491_p9), %vm675_vm0, %v10871_v18  ;;  %v8025_v27 = vld [vmem:[%s10847_s4 + $0x40] sm:$0xff] (!%p491_p9)   ;;  %v8027_v29 = vld [vmem:[%s10847_s4 + $0x48] sm:$0xff] (!%p491_p9)   ;;  %s10886_s2 = sld [smem:[#allocation15_spill]] (!%p491_p9)  ;;  %s10887_s3 = sld [smem:[#allocation16_spill]] (!%p491_p9) }
  0x18   : > { %3840 = vst.msk [vmem:[#allocation3] sm:$0xff] (!%p491_p9), %vm675_vm0, %v10871_v18  ;;  %3843 = vst.msk [vmem:[#allocation3 + $0x90] sm:$0xff] (!%p491_p9), %vm675_vm0, %v10871_v18  ;;  %6811 = vmatprep.subr.bf16.mxu1 (!%p491_p9), %v8025_v27  ;;  %v8026_v28 = vld [vmem:[%s10847_s4] sm:$0xff] (!%p491_p9)   ;;  %v8028_v33 = vld [vmem:[%s10847_s4 + $0x8] sm:$0xff] (!%p491_p9)   ;;  %vm2196_vm3 = vcmask (!%p491_p9), 523264   ;;  %s10888_s29 = smov (!%p491_p9), 64  }
  0x19   : > { %3841 = vst.msk [vmem:[#allocation3 + $0x8] sm:$0x3] (!%p491_p9), %vm997_vm1, %v10871_v18  ;;  %3844 = vst.msk [vmem:[#allocation3 + $0x98] sm:$0x3] (!%p491_p9), %vm997_vm1, %v10871_v18  ;;  %6812 = vmatpush3.bf16.msra.mxu1 (!%p491_p9), %v8026_v28  ;;  %v8029_v36 = vld [vmem:[%s10847_s4 + $0x50] sm:$0xff] (!%p491_p9)   ;;  %v8031_v50 = vld [vmem:[%s10847_s4 + $0x58] sm:$0xff] (!%p491_p9)  }
  0x1a   : > { %v8005_v0 = vld [vmem:[%s10884_s23] sm:$0xff] (!%p491_p9)   ;;  %v8006_v1 = vld [vmem:[%s10884_s23 + $0x8] sm:$0xff] (!%p491_p9)   ;;  %1022 = vst.msk [vmem:[#allocation2 + $0x41] sm:$0x1] (!%p491_p9), %vm1004_vm2, %v10871_v18  ;;  %1005 = vst.msk [vmem:[#allocation2 + $0x18] sm:$0x1] (!%p491_p9), %vm1004_vm2, %v10871_v18  ;;  %6813 = vmatprep.subr.bf16.mxu1 (!%p491_p9), %v8027_v29 }
  0x1b   : > { %7168 = vmatprep.subr.bf16.mxu0 (!%p491_p9), %v8005_v0  ;;  %1006 = vst.msk [vmem:[#allocation2 + $0x30] sm:$0x1] (!%p491_p9), %vm1004_vm2, %v10871_v18  ;;  %1007 = vst.msk [vmem:[#allocation2 + $0x48] sm:$0x1] (!%p491_p9), %vm1004_vm2, %v10871_v18  ;;  %v8030_v44 = vld [vmem:[%s10847_s4 + $0x10] sm:$0xff] (!%p491_p9)   ;;  %v8032_v53 = vld [vmem:[%s10847_s4 + $0x18] sm:$0xff] (!%p491_p9)  }
  0x1c   : > { %s542_s18 = scalar_select %p541_p10, %s8353_s28, 1  ;;  %7169 = vmatpush3.bf16.msra.mxu0 %v8005_v0  ;;  %1008 = vst.msk [vmem:[#allocation2 + $0x60] sm:$0x1] %vm1004_vm2, %v10871_v18  ;;  %1009 = vst.msk [vmem:[#allocation2 + $0x78] sm:$0x1] %vm1004_vm2, %v10871_v18  ;;  %v1171_v19 = vld [vmem:[#allocation2 + $0x2] sm:$0xff] }
  0x1d   : > { %7170 = vmatprep.subr.bf16.mxu0 %v8006_v1  ;;  %1010 = vst.msk [vmem:[#allocation2 + $0x90] sm:$0x1] %vm1004_vm2, %v10871_v18  ;;  %1011 = vst.msk [vmem:[#allocation2 + $0xa8] sm:$0x1] %vm1004_vm2, %v10871_v18  ;;  %v1172_v20 = vld [vmem:[#allocation2 + $0xa] sm:$0xff]  ;;  %v1139_v21 = vld [vmem:[#allocation2 + $0x1] sm:$0xff]  ;;  %6814 = vmatpush3.bf16.msra.mxu1 %v8028_v33 }
  0x1e   : > { %s6792_s19 = sshll.u32 %s542_s18, 7  ;;  %1012 = vst.msk [vmem:[#allocation2 + $0xc0] sm:$0x1] %vm1004_vm2, %v10871_v18  ;;  %1013 = vst.msk [vmem:[#allocation2 + $0xd8] sm:$0x1] %vm1004_vm2, %v10871_v18  ;;  %v7330_v22 = vpack.i.bf16 %v1172_v20, %v1171_v19  ;;  %v1140_v23 = vld [vmem:[#allocation2 + $0x9] sm:$0xff]  ;;  %6815 = vmatprep.subr.bf16.mxu1 %v8029_v36 }
  0x1f   : > { %s8391_s24 = scalar_lea.vmem %s10885_s20, %s6792_s19  ;;  %1014 = vst.msk [vmem:[#allocation2 + $0xf0] sm:$0x1] %vm1004_vm2, %v10871_v18  ;;  %1015 = vst.msk [vmem:[#allocation2 + $0x108] sm:$0x1] %vm1004_vm2, %v10871_v18  ;;  %v7325_v24 = vpack.i.bf16 %v1140_v23, %v1139_v21  ;;  %v8561_v30 = vld [vmem:[%s10886_s2] ss:$0 sm:$0xff] }
  0x20   : > { %v8007_v2 = vld [vmem:[%s8391_s24] sm:$0xff]   ;;  %7171 = vmatpush3.bf16.msra.mxu0 %v8006_v1  ;;  %v8008_v3 = vld [vmem:[%s8391_s24 + $0x8] sm:$0xff]   ;;  %v8009_v4 = vld [vmem:[%s8391_s24 + $0x10] sm:$0xff]   ;;  %1016 = vst.msk [vmem:[#allocation2 + $0x120] sm:$0x1] %vm1004_vm2, %v10871_v18  ;;  %s8238_s20 = smov 96  }
  0x21   : > { %7172 = vmatprep.mubr.msk.bf16.mxu0 %vm675_vm0, %v8007_v2  ;;  %v8010_v5 = vld [vmem:[%s8391_s24 + $0x18] sm:$0xff]   ;;  %v8011_v6 = vld [vmem:[%s8391_s24 + $0x20] sm:$0xff]   ;;  %v8012_v7 = vld [vmem:[%s8391_s24 + $0x28] sm:$0xff]   ;;  %1017 = vst.msk [vmem:[#allocation2 + $0x138] sm:$0x1] %vm1004_vm2, %v10871_v18  ;;  %7326 = vrot.lane.b32.xlu0 %v7325_v24, %s10867_s26  ;;  %vm2229_vm4 = vcmask 785408  }
  0x22   : > { %v8013_v8 = vld [vmem:[%s8391_s24 + $0x30] sm:$0xff]   ;;  %v8014_v9 = vld [vmem:[%s8391_s24 + $0x38] sm:$0xff]   ;;  %v8015_v10 = vld [vmem:[%s8391_s24 + $0x40] sm:$0xff]   ;;  %1018 = vst.msk [vmem:[#allocation2 + $0x150] sm:$0x1] %vm1004_vm2, %v10871_v18  ;;  %7204 = vmatprep.subr.bf16.mxu0 %v8023_v25  ;;  %6816 = vmatpush3.bf16.msra.mxu1 %v8030_v44  ;;  %vm3926_vm5 = vcmask 1041409  }
  0x23   : > { %7173 = vmatmul.mubr.msk.bf16.vlgmr.msra.gmra.mrb[0].mxu0 %vm675_vm0, %v8008_v3  ;;  %v8016_v11 = vld [vmem:[%s8391_s24 + $0x48] sm:$0xff]   ;;  %v8017_v12 = vld [vmem:[%s8391_s24 + $0x50] sm:$0xff]   ;;  %v8018_v13 = vld [vmem:[%s8391_s24 + $0x58] sm:$0xff]   ;;  %1019 = vst.msk [vmem:[#allocation2 + $0x168] sm:$0x1] %vm1004_vm2, %v10871_v18  ;;  %6817 = vmatprep.subr.bf16.mxu1 %v8031_v50  ;;  %vm3928_vm6 = vcmask 1042434  }
  0x24   : > { %7176 = vmatprep.mubr.msk.bf16.mxu0 %vm675_vm0, %v8009_v4  ;;  %v8019_v14 = vld [vmem:[%s8391_s24 + $0x60] sm:$0xff]   ;;  %v8020_v15 = vld [vmem:[%s8391_s24 + $0x68] sm:$0xff]   ;;  %v8021_v16 = vld [vmem:[%s8391_s24 + $0x70] sm:$0xff]   ;;  %1020 = vst.msk [vmem:[#allocation2 + $0x180] sm:$0x1] %vm1004_vm2, %v10871_v18  ;;  %7205 = vmatpush3.bf16.msra.mxu0 %v8023_v25  ;;  %vm3930_vm7 = vcmask 1043459  }
  0x25   : > { %v8022_v17 = vld [vmem:[%s8391_s24 + $0x78] sm:$0xff]   ;;  %1021 = vst.msk [vmem:[#allocation2 + $0x29] sm:$0x1] %vm1004_vm2, %v10871_v18  ;;  %1023 = vst.msk [vmem:[#allocation2 + $0x59] sm:$0x1] %vm1004_vm2, %v10871_v18  ;;  %s10869_s24 = smov 64   ;;  %7206 = vmatprep.subr.bf16.mxu0 %v8024_v26 }
  0x26   : > { %1024 = vst.msk [vmem:[#allocation2 + $0x71] sm:$0x1] %vm1004_vm2, %v10871_v18  ;;  %1025 = vst.msk [vmem:[#allocation2 + $0x89] sm:$0x1] %vm1004_vm2, %v10871_v18  ;;  %7331 = vrot.lane.b32.xlu1 %v7330_v22, %s10869_s24  ;;  %v8566_v32 = vld [vmem:[%s10887_s3] ss:$0 sm:$0xff]  ;;  %6818 = vmatpush3.bf16.msra.mxu1 %v8032_v53 }
  0x27   : > { %1026 = vst.msk [vmem:[#allocation2 + $0xa1] sm:$0x1] %vm1004_vm2, %v10871_v18  ;;  %1027 = vst.msk [vmem:[#allocation2 + $0xb9] sm:$0x1] %vm1004_vm2, %v10871_v18  ;;  %v8033_v61 = vld [vmem:[%s10847_s4 + $0x60] sm:$0xff]   ;;  %v8036_v23 = vld [vmem:[%s10847_s4 + $0x28] sm:$0xff]  }
  0x28   : > { %1028 = vst.msk [vmem:[#allocation2 + $0xd1] sm:$0x1] %vm1004_vm2, %v10871_v18  ;;  %1029 = vst.msk [vmem:[#allocation2 + $0xe9] sm:$0x1] %vm1004_vm2, %v10871_v18  ;;  %7207 = vmatpush3.bf16.msra.mxu0 %v8024_v26  ;;  %v8034_v0 = vld [vmem:[%s10847_s4 + $0x20] sm:$0xff]   ;;  %6819 = vmatprep.subr.bf16.mxu1 %v8033_v61  ;;  %v8037_v27 = vld [vmem:[%s10847_s4 + $0x70] sm:$0xff]  }
  0x29   : > { %1030 = vst.msk [vmem:[#allocation2 + $0x101] sm:$0x1] %vm1004_vm2, %v10871_v18  ;;  %1031 = vst.msk [vmem:[#allocation2 + $0x119] sm:$0x1] %vm1004_vm2, %v10871_v18  ;;  %s10889_s24 = smov 32   ;;  %vm3932_vm8 = vcmask 1044484  }
  0x2a   : > { %1032 = vst.msk [vmem:[#allocation2 + $0x131] sm:$0x1] %vm1004_vm2, %v10871_v18  ;;  %1033 = vst.msk [vmem:[#allocation2 + $0x149] sm:$0x1] %vm1004_vm2, %v10871_v18  ;;  %6820 = vmatpush3.bf16.msra.mxu1 %v8034_v0  ;;  %vm3934_vm9 = vcmask 1045509   ;;  %vm3936_vm10 = vcmask 1046534  }
  0x2b   : > { %7177 = vmatmul.mubr.msk.bf16.gmra.mrb[4].mxu0 %vm675_vm0, %v8010_v5  ;;  %1034 = vst.msk [vmem:[#allocation2 + $0x161] sm:$0x1] %vm1004_vm2, %v10871_v18  ;;  %1035 = vst.msk [vmem:[#allocation2 + $0x179] sm:$0x1] %vm1004_vm2, %v10871_v18  ;;  %vm3938_vm11 = vcmask 1047559   ;;  %vm4655_vm12 = vcmask 517120  }
  0x2c   : > { %7180 = vmatprep.mubr.msk.bf16.mxu0 %vm675_vm0, %v8011_v6  ;;  %1036 = vst.msk [vmem:[#allocation2 + $0x191] sm:$0x1] %vm1004_vm2, %v10871_v18  ;;  %3846 = vst.msk [vmem:[#allocation3 + $0x10] sm:$0x1] %vm1004_vm2, %v10871_v18  ;;  %vm4661_vm13 = vcmask 516096   ;;  %vm8240_vm14 = vmmov 0  }
  0x2d   : > { %3847 = vst.msk [vmem:[#allocation3 + $0x20] sm:$0x1] %vm1004_vm2, %v10871_v18  ;;  %3848 = vst.msk [vmem:[#allocation3 + $0x30] sm:$0x1] %vm1004_vm2, %v10871_v18  ;;  %s539_s0 = sand.u32 1, %s8225_s25   ;;  %s6789_s21 = sshll.u32 %s8353_s28, 4 }
  0x2e   : > { %3849 = vst.msk [vmem:[#allocation3 + $0x40] sm:$0x1] %vm1004_vm2, %v10871_v18  ;;  %3850 = vst.msk [vmem:[#allocation3 + $0x50] sm:$0x1] %vm1004_vm2, %v10871_v18  ;;  %s540_s22 = scalar_lea.vmem [#allocation5], %s539_s0  ;;  %s10801_s2 = scalar_lea.hbm %s10860_s17, %s6789_s21 }
  0x2f   : > { %3851 = vst.msk [vmem:[#allocation3 + $0x60] sm:$0x1] %vm1004_vm2, %v10871_v18  ;;  %3852 = vst.msk [vmem:[#allocation3 + $0x70] sm:$0x1] %vm1004_vm2, %v10871_v18  ;;  %s6521_s3 = sshll.u32 %s540_s22, 4  ;;  %s8241_s30 = smov [#allocation5]   ;;  %s10803_s3 = int_to_ptr.vmem [resolvable:$true] %s6521_s3 }
  0x30   : > { %3853 = vst.msk [vmem:[#allocation3 + $0x80] sm:$0x1] %vm1004_vm2, %v10871_v18  ;;  %3854 = vst.msk [vmem:[#allocation3 + $0x19] sm:$0x1] %vm1004_vm2, %v10871_v18  ;;  %s8171_s28 = scalar_lea.vmem %s10803_s3, 16  ;;  %s8175_s18 = sshll.u32 %s8241_s30, 4  ;;  %s8176_s18 = int_to_ptr.vmem [resolvable:$false] %s8175_s18 }
  0x31   : > { %3855 = vst.msk [vmem:[#allocation3 + $0x29] sm:$0x1] %vm1004_vm2, %v10871_v18  ;;  %3856 = vst.msk [vmem:[#allocation3 + $0x39] sm:$0x1] %vm1004_vm2, %v10871_v18  ;;  %p8172_p11 = scmp.ne.s32.totalorder %s10803_s3, %s8171_s28  ;;  %s8177_s19 = scalar_lea.vmem %s8176_s18, 32 }
  0x32   : > { %3857 = vst.msk [vmem:[#allocation3 + $0x49] sm:$0x1] %vm1004_vm2, %v10871_v18  ;;  %3858 = vst.msk [vmem:[#allocation3 + $0x59] sm:$0x1] %vm1004_vm2, %v10871_v18  ;;  %p8178_p0 = scmp.lt.s32.totalorder %s10803_s3, %s8176_s18  ;;  %p8179_p1 = scmp.lt.s32.totalorder %s8177_s19, %s8171_s28 }
  0x33   : > { %7181 = vmatmul.mubr.msk.bf16.gmra.mrb[8].mxu0 %vm675_vm0, %v8012_v7  ;;  %3859 = vst.msk [vmem:[#allocation3 + $0x69] sm:$0x1] %vm1004_vm2, %v10871_v18  ;;  %3860 = vst.msk [vmem:[#allocation3 + $0x79] sm:$0x1] %vm1004_vm2, %v10871_v18  ;;  %v8035_v7 = vld [vmem:[%s10847_s4 + $0x68] sm:$0xff]   ;;  %p8173_p12 = pnand %p8172_p11, %p8370_p5 }
  0x34   : > { %7184 = vmatprep.mubr.msk.bf16.mxu0 %vm675_vm0, %v8013_v8  ;;  %3861 = vst.msk [vmem:[#allocation3 + $0x89] sm:$0x1] %vm1004_vm2, %v10871_v18  ;;  %6821 = vmatprep.subr.bf16.mxu1 %v8035_v7  ;;  %p8180_p2 = por %p8179_p1, %p8178_p0 }
  0x35   : > { %4654 = vst.msk [vmem:[#allocation4] sm:$0xff] %vm2196_vm3, %v10871_v18  ;;  %4658 = vst.msk [vmem:[#allocation4 + $0x90] sm:$0xff] %vm2196_vm3, %v10871_v18  ;;  %6822 = vmatpush3.bf16.msra.mxu1 %v8036_v23  ;;  %p8174_p13 = pneg %p8173_p12 }
  0x36   : > { %6823 = vmatprep.subr.bf16.mxu1 %v8037_v27 }
  0x37   : > { %p8181_p3 = pnand %p8180_p2, %p8174_p13 }
  0x3b   : > { %7185 = vmatmul.mubr.msk.bf16.gmra.mrb[12].mxu0 %vm675_vm0, %v8014_v9 }
  0x3c   : > { %7188 = vmatprep.mubr.msk.bf16.mxu0 %vm675_vm0, %v8015_v10 }
  0x43   : > { %7189 = vmatmul.mubr.msk.bf16.gmra.mrb[16].mxu0 %vm675_vm0, %v8016_v11 }
  0x44   : > { %7192 = vmatprep.mubr.msk.bf16.mxu0 %vm675_vm0, %v8017_v12 }
  0x4b   : > { %7193 = vmatmul.mubr.msk.bf16.gmra.mrb[20].mxu0 %vm675_vm0, %v8018_v13 }
  0x4c   : > { %7196 = vmatprep.mubr.msk.bf16.mxu0 %vm675_vm0, %v8019_v14 }
  0x53   : > { %7197 = vmatmul.mubr.msk.bf16.gmra.mrb[24].mxu0 %vm675_vm0, %v8020_v15 }
  0x54   : > { %7200 = vmatprep.mubr.msk.bf16.mxu0 %vm675_vm0, %v8021_v16 }
  0x5b   : > { %7201 = vmatmul.mubr.msk.bf16.gmra.mrb[28].mxu0 %vm675_vm0, %v8022_v17 }
  0xf6   : > { %v7174_v31 = vpop.f32.mrb[0].mxu0 }
  0xf7   : > { %v894_v34 = vmul.f32 %v7174_v31, %v8561_v30  ;;  %v758_v35 = vpop.f32.mrb[1].mxu0  ;;  %v8038_v31 = vld [vmem:[%s10847_s4 + $0x30] sm:$0xff]  }
  0xf8   : > { %v892_v37 = vmul.f32 %v8561_v30, %v758_v35  ;;  %v7175_v38 = vpop.f32.mrb[2].mxu0  ;;  %6824 = vmatpush3.bf16.msra.mxu1 %v8038_v31 }
  0xf9   : > { %v933_v39 = vadd.f32 %v8566_v32, %v894_v34  ;;  %v895_v40 = vmul.f32 %v7175_v38, %v8561_v30  ;;  %v761_v41 = vpop.f32.mrb[3].mxu0 }
  0xfa   : > { %v931_v42 = vadd.f32 %v8566_v32, %v892_v37  ;;  %v893_v43 = vmul.f32 %v8561_v30, %v761_v41  ;;  %v8039_v41 = vld [vmem:[%s10847_s4 + $0x78] sm:$0xff]  }
  0xfb   : > { %v965_v45 = vmax.f32 %v933_v39, 0.0  ;;  %v934_v46 = vadd.f32 %v8566_v32, %v895_v40  ;;  %6825 = vmatprep.subr.bf16.mxu1 %v8039_v41 }
  0xfc   : > { %v963_v47 = vmax.f32 %v931_v42, 0.0  ;;  %v932_v48 = vadd.f32 %v8566_v32, %v893_v43 }
  0xfd   : > { %1039 = vst.msk [vmem:[#allocation2 + $0x31] sm:$0xff] %vm675_vm0, %v965_v45  ;;  %v966_v49 = vmax.f32 %v934_v46, 0.0 }
  0xfe   : > { %1037 = vst.msk [vmem:[#allocation2 + $0x19] sm:$0xff] %vm675_vm0, %v963_v47  ;;  %v964_v51 = vmax.f32 %v932_v48, 0.0  ;;  %v7178_v52 = vpop.f32.mrb[4].mxu0 }
  0xff   : > { %1040 = vst.msk [vmem:[#allocation2 + $0x39] sm:$0xff] %vm675_vm0, %v966_v49  ;;  %v898_v54 = vmul.f32 %v7178_v52, %v8561_v30  ;;  %v774_v55 = vpop.f32.mrb[5].mxu0 }
 0x100   : > { %1038 = vst.msk [vmem:[#allocation2 + $0x21] sm:$0xff] %vm675_vm0, %v964_v51  ;;  %v896_v56 = vmul.f32 %v8561_v30, %v774_v55  ;;  %v7179_v57 = vpop.f32.mrb[6].mxu0 }
 0x101   : > { %v937_v58 = vadd.f32 %v8566_v32, %v898_v54  ;;  %v899_v59 = vmul.f32 %v7179_v57, %v8561_v30  ;;  %v777_v60 = vpop.f32.mrb[7].mxu0  ;;  %v8040_v57 = vld [vmem:[%s10847_s4 + $0x38] sm:$0xff]  }
 0x102   : > { %v935_v62 = vadd.f32 %v8566_v32, %v896_v56  ;;  %v897_v63 = vmul.f32 %v8561_v30, %v777_v60  ;;  %6826 = vmatpush3.bf16.msra.mxu1 %v8040_v57 }
 0x103   : > { %v969_v1 = vmax.f32 %v937_v58, 0.0  ;;  %v938_v2 = vadd.f32 %v8566_v32, %v899_v59 }
 0x104   : > { %v967_v3 = vmax.f32 %v935_v62, 0.0  ;;  %v936_v4 = vadd.f32 %v8566_v32, %v897_v63  ;;  %v8614_v6 = vld [vmem:[#allocation2 + $0x31] sm:$0xff] }
 0x105   : > { %1043 = vst.msk [vmem:[#allocation2 + $0x61] sm:$0xff] %vm675_vm0, %v969_v1  ;;  %v970_v5 = vmax.f32 %v938_v2, 0.0  ;;  %v8625_v15 = vld [vmem:[#allocation2 + $0x30] sm:$0xff] }
 0x106   : > { %1041 = vst.msk [vmem:[#allocation2 + $0x49] sm:$0xff] %vm675_vm0, %v967_v3  ;;  %v968_v8 = vmax.f32 %v936_v4, 0.0  ;;  %v1364_v9 = vld [vmem:[#allocation2 + $0x32] sm:$0xff]  ;;  %v1365_v10 = vld [vmem:[#allocation2 + $0x3a] sm:$0xff]  ;;  %v7182_v12 = vpop.f32.mrb[8].mxu0 }
 0x107   : > { %v8620_v11 = vld [vmem:[#allocation2 + $0x39] sm:$0xff]  ;;  %1044 = vst.msk [vmem:[#allocation2 + $0x69] sm:$0xff] %vm675_vm0, %v970_v5  ;;  %v2360_v13 = vpack.c.bf16 %v1365_v10, %v1364_v9  ;;  %v902_v17 = vmul.f32 %v7182_v12, %v8561_v30  ;;  %v790_v19 = vpop.f32.mrb[9].mxu0  ;;  %v7345_v33 = vpack.i.bf16 %v1365_v10, %v1364_v9  ;;  %v1268_v37 = vld [vmem:[#allocation2 + $0x22] sm:$0xff] }
 0x108   : > { %v7340_v14 = vpack.i.bf16 %v8620_v11, %v8614_v6  ;;  %v8627_v16 = vld [vmem:[#allocation2 + $0x38] sm:$0xff]  ;;  %1042 = vst.msk [vmem:[#allocation2 + $0x51] sm:$0xff] %vm675_vm0, %v968_v8  ;;  %v900_v21 = vmul.f32 %v8561_v30, %v790_v19  ;;  %v7183_v22 = vpop.f32.mrb[10].mxu0  ;;  %v8699_v7 = vld [vmem:[#allocation2 + $0x20] sm:$0xff] }
 0x109   : > { %v7335_v20 = vpack.i.bf16 %v8627_v16, %v8625_v15  ;;  %7208 = vmatprep.mubr.msk.bf16.mxu0 %vm675_vm0, %v2360_v13  ;;  %v941_v24 = vadd.f32 %v8566_v32, %v902_v17  ;;  %v903_v25 = vmul.f32 %v7183_v22, %v8561_v30  ;;  %v793_v26 = vpop.f32.mrb[11].mxu0  ;;  %v1267_v36 = vld [vmem:[#allocation2 + $0x1a] sm:$0xff] }
 0x10a   : > { %7341 = vrot.lane.b32.xlu0 %v7340_v14, %s8238_s20  ;;  %v939_v28 = vadd.f32 %v8566_v32, %v900_v21  ;;  %v901_v29 = vmul.f32 %v8561_v30, %v793_v26  ;;  %v8663_v46 = vpack.i.bf16 %v1268_v37, %v1267_v36  ;;  %v8738_v36 = vld [vmem:[#allocation2 + $0x19] sm:$0xff] }
 0x10b   : > { %7336 = vrot.lane.b32.xlu1 %v7335_v20, %s10888_s29  ;;  %v973_v34 = vmax.f32 %v941_v24, 0.0  ;;  %v942_v35 = vadd.f32 %v8566_v32, %v903_v25 }
 0x10c   : > { %v971_v38 = vmax.f32 %v939_v28, 0.0  ;;  %v940_v39 = vadd.f32 %v8566_v32, %v901_v29  ;;  %v1304_v53 = vld [vmem:[#allocation2 + $0x60] sm:$0xff] }
 0x10d   : > { %1047 = vst.msk [vmem:[#allocation2 + $0x91] sm:$0xff] %vm675_vm0, %v973_v34  ;;  %v974_v40 = vmax.f32 %v942_v35, 0.0  ;;  %v8692_v2 = vld [vmem:[#allocation2 + $0x61] sm:$0xff] }
 0x10e   : > { %7346 = vrot.lane.b32.xlu0 %v7345_v33, %s10889_s24  ;;  %v8658_v42 = vld [vmem:[#allocation2 + $0x62] sm:$0xff]  ;;  %v8660_v43 = vld [vmem:[#allocation2 + $0x6a] sm:$0xff]  ;;  %1045 = vst.msk [vmem:[#allocation2 + $0x79] sm:$0xff] %vm675_vm0, %v971_v38  ;;  %v972_v44 = vmax.f32 %v940_v39, 0.0  ;;  %v7186_v45 = vpop.f32.mrb[12].mxu0 }
 0x10f   : > { %7351 = vrot.lane.b32.xlu1 %v7335_v20, %s8238_s20  ;;  %v8665_v47 = vld [vmem:[#allocation2 + $0x4a] sm:$0xff]  ;;  %v8667_v48 = vld [vmem:[#allocation2 + $0x52] sm:$0xff]  ;;  %v2366_v49 = vpack.c.bf16 %v8660_v43, %v8658_v42  ;;  %1048 = vst.msk [vmem:[#allocation2 + $0x99] sm:$0xff] %vm675_vm0, %v974_v40  ;;  %v906_v50 = vmul.f32 %v7186_v45, %v8561_v30  ;;  %v806_v51 = vpop.f32.mrb[13].mxu0  ;;  %v8730_v28 = vld [vmem:[#allocation2 + $0x21] sm:$0xff]  ;;  %v8742_v37 = vpack.i.bf16 %v8660_v43, %v8658_v42 }
 0x110   : > { %v2363_v52 = vpack.c.bf16 %v8667_v48, %v8665_v47  ;;  %v1305_v54 = vld [vmem:[#allocation2 + $0x68] sm:$0xff]  ;;  %1046 = vst.msk [vmem:[#allocation2 + $0x81] sm:$0xff] %vm675_vm0, %v972_v44  ;;  %v904_v55 = vmul.f32 %v8561_v30, %v806_v51  ;;  %v7187_v56 = vpop.f32.mrb[14].mxu0  ;;  %v7375_v40 = vpack.i.bf16 %v8730_v28, %v8738_v36  ;;  %v1303_v44 = vld [vmem:[#allocation2 + $0x50] sm:$0xff] }
 0x111   : > { %v945_v58 = vadd.f32 %v8566_v32, %v906_v50  ;;  %v907_v59 = vmul.f32 %v7187_v56, %v8561_v30  ;;  %v809_v60 = vpop.f32.mrb[15].mxu0  ;;  %v8689_v63 = vpack.i.bf16 %v1305_v54, %v1304_v53  ;;  %v8694_v3 = vld [vmem:[#allocation2 + $0x69] sm:$0xff] }
 0x112   : > { %7366 = vrot.lane.b32.xlu0 %v8663_v46, %s10889_s24  ;;  %7209 = vmatmul.mubr.msk.bf16.vlgmr.msra.gmra.mrb[32].mxu0 %vm675_vm0, %v2363_v52  ;;  %v943_v61 = vadd.f32 %v8566_v32, %v904_v55  ;;  %v905_v62 = vmul.f32 %v8561_v30, %v809_v60  ;;  %v8712_v17 = vpack.i.bf16 %v8694_v3, %v8692_v2  ;;  %v1302_v41 = vld [vmem:[#allocation2 + $0x48] sm:$0xff]  ;;  %v1335_v60 = vld [vmem:[#allocation2 + $0x51] sm:$0xff] }
 0x113   : > { %7356 = vrot.lane.b32.xlu1 %v7340_v14, %s10889_s24  ;;  %7212 = vmatprep.mubr.msk.bf16.mxu0 %vm675_vm0, %v2366_v49  ;;  %v977_v0 = vmax.f32 %v945_v58, 0.0  ;;  %v946_v1 = vadd.f32 %v8566_v32, %v907_v59  ;;  %v8708_v14 = vld [vmem:[#allocation2 + $0x18] sm:$0xff]  ;;  %v8758_v53 = vpack.i.bf16 %v1303_v44, %v1302_v41  ;;  %v1334_v59 = vld [vmem:[#allocation2 + $0x49] sm:$0xff] }
 0x114   : > { %v975_v4 = vmax.f32 %v943_v61, 0.0  ;;  %v944_v5 = vadd.f32 %v8566_v32, %v905_v62  ;;  %v7370_v24 = vpack.i.bf16 %v8699_v7, %v8708_v14 }
 0x115   : > { %1051 = vst.msk [vmem:[#allocation2 + $0xc1] sm:$0xff] %vm675_vm0, %v977_v0  ;;  %v978_v8 = vmax.f32 %v946_v1, 0.0 }
 0x116   : > { %7386 = vrot.lane.b32.xlu0 %v8689_v63, %s10888_s29  ;;  %v8703_v9 = vld [vmem:[#allocation2 + $0x92] sm:$0xff]  ;;  %v8705_v10 = vld [vmem:[#allocation2 + $0x9a] sm:$0xff]  ;;  %1049 = vst.msk [vmem:[#allocation2 + $0xa9] sm:$0xff] %vm675_vm0, %v975_v4  ;;  %v976_v12 = vmax.f32 %v944_v5, 0.0  ;;  %v7190_v13 = vpop.f32.mrb[16].mxu0 }
 0x117   : > { %7361 = vrot.lane.b32.xlu1 %v7345_v33, %s10888_s29  ;;  %v8714_v19 = vld [vmem:[#allocation2 + $0x7a] sm:$0xff]  ;;  %v8716_v20 = vld [vmem:[#allocation2 + $0x82] sm:$0xff]  ;;  %v2372_v21 = vpack.c.bf16 %v8705_v10, %v8703_v9  ;;  %1052 = vst.msk [vmem:[#allocation2 + $0xc9] sm:$0xff] %vm675_vm0, %v978_v8  ;;  %v910_v22 = vmul.f32 %v7190_v13, %v8561_v30  ;;  %v822_v23 = vpop.f32.mrb[17].mxu0  ;;  %v8781_v13 = vpack.i.bf16 %v1335_v60, %v1334_v59  ;;  %v1340_v59 = vld [vmem:[#allocation2 + $0x91] sm:$0xff] }
 0x118   : > { %v2369_v25 = vpack.c.bf16 %v8716_v20, %v8714_v19  ;;  %1050 = vst.msk [vmem:[#allocation2 + $0xb1] sm:$0xff] %vm675_vm0, %v976_v12  ;;  %v908_v26 = vmul.f32 %v8561_v30, %v822_v23  ;;  %v7191_v27 = vpop.f32.mrb[18].mxu0  ;;  %v1341_v60 = vld [vmem:[#allocation2 + $0x99] sm:$0xff] }
 0x119   : > { %v949_v29 = vadd.f32 %v8566_v32, %v910_v22  ;;  %v911_v31 = vmul.f32 %v7191_v27, %v8561_v30  ;;  %v825_v33 = vpop.f32.mrb[19].mxu0 }
 0x11a   : > { %7391 = vrot.lane.b32.xlu0 %v8712_v17, %s8238_s20  ;;  %7213 = vmatmul.mubr.msk.bf16.gmra.mrb[36].mxu0 %vm675_vm0, %v2369_v25  ;;  %v947_v34 = vadd.f32 %v8566_v32, %v908_v26  ;;  %v909_v35 = vmul.f32 %v8561_v30, %v825_v33 }
 0x11b   : > { %7371 = vrot.lane.b32.xlu1 %v7370_v24, %s8238_s20  ;;  %7216 = vmatprep.mubr.msk.bf16.mxu0 %vm675_vm0, %v2372_v21  ;;  %v981_v38 = vmax.f32 %v949_v29, 0.0  ;;  %v950_v39 = vadd.f32 %v8566_v32, %v911_v31  ;;  %v8798_v31 = vpack.i.bf16 %v8667_v48, %v8665_v47 }
 0x11c   : > { %v979_v45 = vmax.f32 %v947_v34, 0.0  ;;  %v948_v49 = vadd.f32 %v8566_v32, %v909_v35 }
 0x11d   : > { %1055 = vst.msk [vmem:[#allocation2 + $0xf1] sm:$0xff] %vm675_vm0, %v981_v38  ;;  %v982_v42 = vmax.f32 %v950_v39, 0.0  ;;  %v1308_v39 = vld [vmem:[#allocation2 + $0x90] sm:$0xff] }
 0x11e   : > { %7396 = vrot.lane.b32.xlu0 %v8742_v37, %s10889_s24  ;;  %v8753_v43 = vld [vmem:[#allocation2 + $0xc2] sm:$0xff]  ;;  %v8755_v50 = vld [vmem:[#allocation2 + $0xca] sm:$0xff]  ;;  %1053 = vst.msk [vmem:[#allocation2 + $0xd9] sm:$0xff] %vm675_vm0, %v979_v45  ;;  %v980_v51 = vmax.f32 %v948_v49, 0.0  ;;  %v7194_v52 = vpop.f32.mrb[20].mxu0 }
 0x11f   : > { %7376 = vrot.lane.b32.xlu1 %v7375_v40, %s10889_s24  ;;  %v8760_v54 = vld [vmem:[#allocation2 + $0xaa] sm:$0xff]  ;;  %v8762_v55 = vld [vmem:[#allocation2 + $0xb2] sm:$0xff]  ;;  %v2378_v56 = vpack.c.bf16 %v8755_v50, %v8753_v43  ;;  %1056 = vst.msk [vmem:[#allocation2 + $0xf9] sm:$0xff] %vm675_vm0, %v982_v42  ;;  %v914_v57 = vmul.f32 %v7194_v52, %v8561_v30  ;;  %v838_v58 = vpop.f32.mrb[21].mxu0 }
 0x120   : > { %v2375_v61 = vpack.c.bf16 %v8762_v55, %v8760_v54  ;;  %1054 = vst.msk [vmem:[#allocation2 + $0xe1] sm:$0xff] %vm675_vm0, %v980_v51  ;;  %v912_v62 = vmul.f32 %v8561_v30, %v838_v58  ;;  %v7195_v0 = vpop.f32.mrb[22].mxu0  ;;  %v1309_v40 = vld [vmem:[#allocation2 + $0x98] sm:$0xff] }
 0x121   : > { %v953_v1 = vadd.f32 %v8566_v32, %v914_v57  ;;  %v915_v4 = vmul.f32 %v7195_v0, %v8561_v30  ;;  %v841_v5 = vpop.f32.mrb[23].mxu0 }
 0x122   : > { %7416 = vrot.lane.b32.xlu0 %v8758_v53, %s10888_s29  ;;  %7217 = vmatmul.mubr.msk.bf16.gmra.mrb[40].mxu0 %vm675_vm0, %v2375_v61  ;;  %v951_v8 = vadd.f32 %v8566_v32, %v912_v62  ;;  %v913_v12 = vmul.f32 %v8561_v30, %v841_v5 }
 0x123   : > { %7381 = vrot.lane.b32.xlu1 %v8663_v46, %s10888_s29  ;;  %7220 = vmatprep.mubr.msk.bf16.mxu0 %vm675_vm0, %v2378_v56  ;;  %v985_v21 = vmax.f32 %v953_v1, 0.0  ;;  %v954_v22 = vadd.f32 %v8566_v32, %v915_v4  ;;  %v8817_v56 = vpack.i.bf16 %v1309_v40, %v1308_v39  ;;  %v7455_v40 = vpack.i.bf16 %v8705_v10, %v8703_v9 }
 0x124   : > { %v983_v23 = vmax.f32 %v951_v8, 0.0  ;;  %v952_v24 = vadd.f32 %v8566_v32, %v913_v12  ;;  %v8828_v8 = vpack.i.bf16 %v1341_v60, %v1340_v59  ;;  %v1338_v59 = vld [vmem:[#allocation2 + $0x79] sm:$0xff]  ;;  %v1339_v60 = vld [vmem:[#allocation2 + $0x81] sm:$0xff] }
 0x125   : > { %1059 = vst.msk [vmem:[#allocation2 + $0x121] sm:$0xff] %vm675_vm0, %v985_v21  ;;  %v986_v46 = vmax.f32 %v954_v22, 0.0 }
 0x126   : > { %7421 = vrot.lane.b32.xlu0 %v8781_v13, %s8238_s20  ;;  %v8791_v25 = vld [vmem:[#allocation2 + $0xf2] sm:$0xff]  ;;  %v8793_v26 = vld [vmem:[#allocation2 + $0xfa] sm:$0xff]  ;;  %1057 = vst.msk [vmem:[#allocation2 + $0x109] sm:$0xff] %vm675_vm0, %v983_v23  ;;  %v984_v27 = vmax.f32 %v952_v24, 0.0  ;;  %v7198_v29 = vpop.f32.mrb[24].mxu0 }
 0x127   : > { %7401 = vrot.lane.b32.xlu1 %v8689_v63, %s8238_s20  ;;  %v1378_v33 = vld [vmem:[#allocation2 + $0xda] sm:$0xff]  ;;  %v1379_v34 = vld [vmem:[#allocation2 + $0xe2] sm:$0xff]  ;;  %v2384_v35 = vpack.c.bf16 %v8793_v26, %v8791_v25  ;;  %1060 = vst.msk [vmem:[#allocation2 + $0x129] sm:$0xff] %vm675_vm0, %v986_v46  ;;  %v918_v63 = vmul.f32 %v7198_v29, %v8561_v30  ;;  %v854_v38 = vpop.f32.mrb[25].mxu0 }
 0x128   : > { %v2381_v41 = vpack.c.bf16 %v1379_v34, %v1378_v33  ;;  %1058 = vst.msk [vmem:[#allocation2 + $0x111] sm:$0xff] %vm675_vm0, %v984_v27  ;;  %v8805_v44 = vpack.i.bf16 %v1379_v34, %v1378_v33  ;;  %v916_v47 = vmul.f32 %v8561_v30, %v854_v38  ;;  %v7199_v48 = vpop.f32.mrb[26].mxu0 }
 0x129   : > { %v957_v45 = vadd.f32 %v8566_v32, %v918_v63  ;;  %v919_v49 = vmul.f32 %v7199_v48, %v8561_v30  ;;  %v857_v42 = vpop.f32.mrb[27].mxu0  ;;  %v1306_v48 = vld [vmem:[#allocation2 + $0x78] sm:$0xff] }
 0x12a   : > { %7426 = vrot.lane.b32.xlu0 %v8798_v31, %s10889_s24  ;;  %7221 = vmatmul.mubr.msk.bf16.gmra.mrb[44].mxu0 %vm675_vm0, %v2381_v41  ;;  %v955_v51 = vadd.f32 %v8566_v32, %v916_v47  ;;  %v917_v52 = vmul.f32 %v8561_v30, %v857_v42 }
 0x12b   : > { %7406 = vrot.lane.b32.xlu1 %v8712_v17, %s10889_s24  ;;  %7224 = vmatprep.mubr.msk.bf16.mxu0 %vm675_vm0, %v2384_v35  ;;  %v989_v57 = vmax.f32 %v957_v45, 0.0  ;;  %v958_v58 = vadd.f32 %v8566_v32, %v919_v49  ;;  %v1307_v45 = vld [vmem:[#allocation2 + $0x80] sm:$0xff] }
 0x12c   : > { %v987_v61 = vmax.f32 %v955_v51, 0.0  ;;  %v956_v62 = vadd.f32 %v8566_v32, %v917_v52  ;;  %v7475_v51 = vpack.i.bf16 %v1307_v45, %v1306_v48  ;;  %v1315_v45 = vld [vmem:[#allocation2 + $0xe0] sm:$0xff] }
 0x12d   : > { %1063 = vst.msk [vmem:[#allocation2 + $0x151] sm:$0xff] %vm675_vm0, %v989_v57  ;;  %v990_v17 = vmax.f32 %v958_v58, 0.0 }
 0x12e   : > { %7446 = vrot.lane.b32.xlu0 %v8817_v56, %s10888_s29  ;;  %v1384_v0 = vld [vmem:[#allocation2 + $0x122] sm:$0xff]  ;;  %v1385_v1 = vld [vmem:[#allocation2 + $0x12a] sm:$0xff]  ;;  %1061 = vst.msk [vmem:[#allocation2 + $0x139] sm:$0xff] %vm675_vm0, %v987_v61  ;;  %v988_v4 = vmax.f32 %v956_v62, 0.0  ;;  %v7202_v5 = vpop.f32.mrb[28].mxu0 }
 0x12f   : > { %7411 = vrot.lane.b32.xlu1 %v8742_v37, %s10888_s29  ;;  %v1382_v12 = vld [vmem:[#allocation2 + $0x10a] sm:$0xff]  ;;  %v1383_v21 = vld [vmem:[#allocation2 + $0x112] sm:$0xff]  ;;  %v2390_v22 = vpack.c.bf16 %v1385_v1, %v1384_v0  ;;  %1064 = vst.msk [vmem:[#allocation2 + $0x159] sm:$0xff] %vm675_vm0, %v990_v17  ;;  %v8831_v23 = vpack.i.bf16 %v1385_v1, %v1384_v0  ;;  %v922_v24 = vmul.f32 %v7202_v5, %v8561_v30  ;;  %v870_v46 = vpop.f32.mrb[29].mxu0 }
 0x130   : > { %v2387_v27 = vpack.c.bf16 %v1383_v21, %v1382_v12  ;;  %1062 = vst.msk [vmem:[#allocation2 + $0x141] sm:$0xff] %vm675_vm0, %v988_v4  ;;  %v8835_v37 = vpack.i.bf16 %v1383_v21, %v1382_v12  ;;  %v920_v29 = vmul.f32 %v8561_v30, %v870_v46  ;;  %v7203_v33 = vpop.f32.mrb[30].mxu0  ;;  %v7485_v1 = vpack.i.bf16 %v8716_v20, %v8714_v19  ;;  %v1312_v21 = vld [vmem:[#allocation2 + $0xc0] sm:$0xff] }
 0x131   : > { %v961_v34 = vadd.f32 %v8566_v32, %v922_v24  ;;  %v923_v35 = vmul.f32 %v7203_v33, %v8561_v30  ;;  %v873_v63 = vpop.f32.mrb[31].mxu0  ;;  %v1344_v20 = vld [vmem:[#allocation2 + $0xc1] sm:$0xff]  ;;  %v1311_v33 = vld [vmem:[#allocation2 + $0xb0] sm:$0xff] }
 0x132   : > { %7451 = vrot.lane.b32.xlu0 %v8828_v8, %s8238_s20  ;;  %7225 = vmatmul.mubr.msk.bf16.gmra.mrb[48].mxu0 %vm675_vm0, %v2387_v27  ;;  %v959_v38 = vadd.f32 %v8566_v32, %v920_v29  ;;  %v921_v39 = vmul.f32 %v8561_v30, %v873_v63  ;;  %v7515_v29 = vpack.i.bf16 %v8755_v50, %v8753_v43  ;;  %v1343_v63 = vld [vmem:[#allocation2 + $0xb1] sm:$0xff] }
 0x133   : > { %7431 = vrot.lane.b32.xlu1 %v8758_v53, %s8238_s20  ;;  %7228 = vmatprep.mubr.msk.bf16.mxu0 %vm675_vm0, %v2390_v22  ;;  %v993_v41 = vmax.f32 %v961_v34, 0.0  ;;  %v962_v47 = vadd.f32 %v8566_v32, %v923_v35  ;;  %v1313_v22 = vld [vmem:[#allocation2 + $0xc8] sm:$0xff]  ;;  %v7545_v43 = vpack.i.bf16 %v8762_v55, %v8760_v54  ;;  %v1316_v50 = vld [vmem:[#allocation2 + $0xf0] sm:$0xff]  ;;  %v7575_v54 = vpack.i.bf16 %v8793_v26, %v8791_v25  ;;  %v1314_v55 = vld [vmem:[#allocation2 + $0xd8] sm:$0xff] }
 0x134   : > { %v991_v49 = vmax.f32 %v959_v38, 0.0  ;;  %v960_v42 = vadd.f32 %v8566_v32, %v921_v39  ;;  %v7505_v19 = vpack.i.bf16 %v1313_v22, %v1312_v21  ;;  %v1342_v35 = vld [vmem:[#allocation2 + $0xa9] sm:$0xff]  ;;  %v1317_v39 = vld [vmem:[#allocation2 + $0xf8] sm:$0xff] }
 0x135   : > { %1067 = vst.msk [vmem:[#allocation2 + $0x181] sm:$0xff] %vm675_vm0, %v993_v41  ;;  %v994_v53 = vmax.f32 %v962_v47, 0.0  ;;  %v7540_v38 = vpack.i.bf16 %v1343_v63, %v1342_v35  ;;  %v1348_v41 = vld [vmem:[#allocation2 + $0xf1] sm:$0xff]  ;;  %v1349_v47 = vld [vmem:[#allocation2 + $0xf9] sm:$0xff]  ;;  %v1321_v25 = vld [vmem:[#allocation2 + $0x128] sm:$0xff] }
 0x136   : > { %7456 = vrot.lane.b32.xlu0 %v7455_v40, %s10889_s24  ;;  %v1388_v30 = vld [vmem:[#allocation2 + $0x152] sm:$0xff]  ;;  %v1389_v9 = vld [vmem:[#allocation2 + $0x15a] sm:$0xff]  ;;  %1065 = vst.msk [vmem:[#allocation2 + $0x169] sm:$0xff] %vm675_vm0, %v991_v49  ;;  %v992_v10 = vmax.f32 %v960_v42, 0.0  ;;  %v7570_v48 = vpack.i.bf16 %v1349_v47, %v1348_v41  ;;  %v7595_v49 = vpack.i.bf16 %v1315_v45, %v1314_v55  ;;  %v1108_v35 = vld [vmem:[#allocation2 + $0x8] sm:$0xff] }
 0x137   : > { %7436 = vrot.lane.b32.xlu1 %v8781_v13, %s10889_s24  ;;  %v1386_v52 = vld [vmem:[#allocation2 + $0x13a] sm:$0xff]  ;;  %v1387_v57 = vld [vmem:[#allocation2 + $0x142] sm:$0xff]  ;;  %v2396_v58 = vpack.c.bf16 %v1389_v9, %v1388_v30  ;;  %1068 = vst.msk [vmem:[#allocation2 + $0x189] sm:$0xff] %vm675_vm0, %v994_v53  ;;  %v8858_v32 = vpack.i.bf16 %v1389_v9, %v1388_v30  ;;  %v7480_v13 = vpack.i.bf16 %v1339_v60, %v1338_v59  ;;  %v1351_v21 = vld [vmem:[#allocation2 + $0x111] sm:$0xff] }
 0x138   : > { %v2393_v61 = vpack.c.bf16 %v1387_v57, %v1386_v52  ;;  %1066 = vst.msk [vmem:[#allocation2 + $0x171] sm:$0xff] %vm675_vm0, %v992_v10  ;;  %v8861_v62 = vpack.i.bf16 %v1387_v57, %v1386_v52  ;;  %v1346_v42 = vld [vmem:[#allocation2 + $0xd9] sm:$0xff]  ;;  %v1347_v53 = vld [vmem:[#allocation2 + $0xe1] sm:$0xff]  ;;  %v7327_v52 = vpop.permute.xlu0 %7326  ;;  %v8921_v57 = vpop.permute.xlu1 %7331 }
 0x139   : > { %v7600_v30 = vpack.i.bf16 %v1347_v53, %v1346_v42  ;;  %v1320_v9 = vld [vmem:[#allocation2 + $0x120] sm:$0xff]  ;;  %v7329_v63 = vunpack.i.h.bf16 %v7327_v52  ;;  %v7334_v55 = vunpack.i.h.bf16 %v8921_v57  ;;  %v7333_v45 = vunpack.i.l.bf16 %v8921_v57 }
 0x13a   : > { %7476 = vrot.lane.b32.xlu0 %v7475_v51, %s10888_s29  ;;  %7229 = vmatmul.mubr.msk.bf16.gmra.mrb[52].mxu0 %vm675_vm0, %v2393_v61  ;;  %v7625_v26 = vpack.i.bf16 %v1321_v25, %v1320_v9  ;;  %v1352_v10 = vld [vmem:[#allocation2 + $0x121] sm:$0xff]  ;;  %v1356_v25 = vld [vmem:[#allocation2 + $0x151] sm:$0xff] }
 0x13b   : > { %7441 = vrot.lane.b32.xlu1 %v8798_v31, %s10888_s29  ;;  %7232 = vmatprep.mubr.msk.bf16.mxu0 %vm675_vm0, %v2396_v58  ;;  %v1318_v61 = vld [vmem:[#allocation2 + $0x108] sm:$0xff] }
 0x13e   : > { %7481 = vrot.lane.b32.xlu0 %v7480_v13, %s8238_s20  ;;  %v8871_v17 = vld [vmem:[#allocation2 + $0x182] sm:$0xff]  ;;  %v8873_v0 = vld [vmem:[#allocation2 + $0x18a] sm:$0xff] }
 0x13f   : > { %7461 = vrot.lane.b32.xlu1 %v8817_v56, %s8238_s20  ;;  %v1390_v4 = vld [vmem:[#allocation2 + $0x16a] sm:$0xff]  ;;  %v1391_v5 = vld [vmem:[#allocation2 + $0x172] sm:$0xff]  ;;  %v2402_v31 = vpack.c.bf16 %v8873_v0, %v8871_v17  ;;  %v7770_v12 = vpack.i.bf16 %v8873_v0, %v8871_v17 }
 0x140   : > { %v2399_v24 = vpack.c.bf16 %v1391_v5, %v1390_v4  ;;  %v8881_v46 = vpack.i.bf16 %v1391_v5, %v1390_v4  ;;  %v1345_v56 = vld [vmem:[#allocation2 + $0xc9] sm:$0xff] }
 0x141   : > { %v7510_v27 = vpack.i.bf16 %v1345_v56, %v1344_v20 }
 0x142   : > { %7486 = vrot.lane.b32.xlu0 %v7485_v1, %s10889_s24  ;;  %7233 = vmatmul.mubr.msk.bf16.gmra.mrb[56].mxu0 %vm675_vm0, %v2399_v24 }
 0x143   : > { %7466 = vrot.lane.b32.xlu1 %v8828_v8, %s10889_s24  ;;  %7236 = vmatprep.mubr.msk.bf16.mxu0 %vm675_vm0, %v2402_v31  ;;  %v1310_v8 = vld [vmem:[#allocation2 + $0xa8] sm:$0xff] }
 0x144   : > { %v7535_v34 = vpack.i.bf16 %v1311_v33, %v1310_v8  ;;  %v1350_v31 = vld [vmem:[#allocation2 + $0x109] sm:$0xff] }
 0x145   : > { %v8935_v24 = vpack.i.bf16 %v1351_v21, %v1350_v31 }
 0x146   : > { %7506 = vrot.lane.b32.xlu0 %v7505_v19, %s10888_s29 }
 0x147   : > { %7471 = vrot.lane.b32.xlu1 %v7455_v40, %s10888_s29  ;;  %v7565_v40 = vpack.i.bf16 %v1317_v39, %v1316_v50 }
 0x14a   : > { %7511 = vrot.lane.b32.xlu0 %v7510_v27, %s8238_s20 }
 0x14b   : > { %7491 = vrot.lane.b32.xlu1 %v7475_v51, %s8238_s20  ;;  %v1353_v51 = vld [vmem:[#allocation2 + $0x129] sm:$0xff] }
 0x14c   : > { %v7630_v58 = vpack.i.bf16 %v1353_v51, %v1352_v10 }
 0x14e   : > { %7516 = vrot.lane.b32.xlu0 %v7515_v29, %s10889_s24 }
 0x14f   : > { %7496 = vrot.lane.b32.xlu1 %v7480_v13, %s10889_s24  ;;  %v1319_v13 = vld [vmem:[#allocation2 + $0x110] sm:$0xff] }
 0x150   : > { %v7655_v4 = vpack.i.bf16 %v1319_v13, %v1318_v61 }
 0x152   : > { %7536 = vrot.lane.b32.xlu0 %v7535_v34, %s10888_s29 }
 0x153   : > { %7501 = vrot.lane.b32.xlu1 %v7485_v1, %s10888_s29 }
 0x156   : > { %7541 = vrot.lane.b32.xlu0 %v7540_v38, %s8238_s20 }
 0x157   : > { %7521 = vrot.lane.b32.xlu1 %v7505_v19, %s8238_s20 }
 0x15a   : > { %7546 = vrot.lane.b32.xlu0 %v7545_v43, %s10889_s24 }
 0x15b   : > { %7526 = vrot.lane.b32.xlu1 %v7510_v27, %s10889_s24 }
 0x15e   : > { %7566 = vrot.lane.b32.xlu0 %v7565_v40, %s10888_s29 }
 0x15f   : > { %7531 = vrot.lane.b32.xlu1 %v7515_v29, %s10888_s29 }
 0x162   : > { %7571 = vrot.lane.b32.xlu0 %v7570_v48, %s8238_s20 }
 0x163   : > { %7551 = vrot.lane.b32.xlu1 %v7535_v34, %s8238_s20 }
 0x166   : > { %7576 = vrot.lane.b32.xlu0 %v7575_v54, %s10889_s24 }
 0x167   : > { %7556 = vrot.lane.b32.xlu1 %v7540_v38, %s10889_s24  ;;  %v7328_v38 = vunpack.i.l.bf16 %v7327_v52 }
 0x16a   : > { %7596 = vrot.lane.b32.xlu0 %v7595_v49, %s10888_s29 }
 0x16b   : > { %7561 = vrot.lane.b32.xlu1 %v7545_v43, %s10888_s29 }
 0x16e   : > { %7601 = vrot.lane.b32.xlu0 %v7600_v30, %s8238_s20 }
 0x16f   : > { %7581 = vrot.lane.b32.xlu1 %v7565_v40, %s8238_s20  ;;  %v1107_v40 = vld [vmem:[#allocation2] sm:$0xff] }
 0x170   : > { %v2164_v42 = vsel %vm675_vm0, %v1107_v40, %v7328_v38 }
 0x171   : > { %v2197_v52 = vsel %vm2196_vm3, %v2164_v42, %v7333_v45 }
 0x172   : > { %7606 = vrot.lane.b32.xlu0 %v8805_v44, %s10889_s24 }
 0x173   : > { %7586 = vrot.lane.b32.xlu1 %v7570_v48, %s10889_s24 }
 0x176   : > { %7626 = vrot.lane.b32.xlu0 %v7625_v26, %s10888_s29 }
 0x177   : > { %7591 = vrot.lane.b32.xlu1 %v7575_v54, %s10888_s29  ;;  %v1325_v54 = vld [vmem:[#allocation2 + $0x158] sm:$0xff] }
 0x17a   : > { %7631 = vrot.lane.b32.xlu0 %v7630_v58, %s8238_s20 }
 0x17b   : > { %7611 = vrot.lane.b32.xlu1 %v7595_v49, %s8238_s20  ;;  %v2165_v49 = vsel %vm675_vm0, %v1108_v35, %v7329_v63 }
 0x17c   : > { %v7342_v59 = vpop.permute.xlu0 %7341  ;;  %v2198_v57 = vsel %vm2196_vm3, %v2165_v49, %v7334_v55 }
 0x17d   : > { %v7337_v60 = vpop.permute.xlu1 %7336  ;;  %v7344_v8 = vunpack.i.h.bf16 %v7342_v59  ;;  %v7343_v33 = vunpack.i.l.bf16 %v7342_v59 }
 0x17e   : > { %7636 = vrot.lane.b32.xlu0 %v8831_v23, %s10889_s24  ;;  %v7339_v27 = vunpack.i.h.bf16 %v7337_v60  ;;  %v7338_v29 = vunpack.i.l.bf16 %v7337_v60 }
 0x17f   : > { %7616 = vrot.lane.b32.xlu1 %v7600_v30, %s10889_s24 }
 0x180   : > { %v8928_v1 = vpop.permute.xlu0 %7346 }
 0x181   : > { %v8930_v5 = vpop.permute.xlu1 %7351 }
 0x182   : > { %7656 = vrot.lane.b32.xlu0 %v7655_v4, %s10888_s29 }
 0x183   : > { %7621 = vrot.lane.b32.xlu1 %v8805_v44, %s10888_s29 }
 0x184   : > { %v7367_v22 = vpop.permute.xlu0 %7366 }
 0x185   : > { %v8937_v19 = vpop.permute.xlu1 %7356  ;;  %v7369_v20 = vunpack.i.h.bf16 %v7367_v22  ;;  %v7368_v56 = vunpack.i.l.bf16 %v7367_v22 }
 0x186   : > { %7661 = vrot.lane.b32.xlu0 %v8935_v24, %s8238_s20 }
 0x187   : > { %7641 = vrot.lane.b32.xlu1 %v7625_v26, %s8238_s20  ;;  %v2262_v44 = vsel %vm675_vm0, %v8738_v36, %v7368_v56  ;;  %v2263_v34 = vsel %vm675_vm0, %v8730_v28, %v7369_v20  ;;  %v1324_v36 = vld [vmem:[#allocation2 + $0x150] sm:$0xff]  ;;  %v1357_v26 = vld [vmem:[#allocation2 + $0x159] sm:$0xff] }
 0x188   : > { %v8946_v43 = vpop.permute.xlu0 %7386  ;;  %v2294_v50 = vsel %vm2196_vm3, %v2262_v44, %v7338_v29  ;;  %v2295_v39 = vsel %vm2196_vm3, %v2263_v34, %v7339_v27  ;;  %v8963_v30 = vpack.i.bf16 %v1325_v54, %v1324_v36  ;;  %v8975_v61 = vpack.i.bf16 %v1357_v26, %v1356_v25  ;;  %v1322_v20 = vld [vmem:[#allocation2 + $0x138] sm:$0xff]  ;;  %v1323_v56 = vld [vmem:[#allocation2 + $0x140] sm:$0xff] }
 0x189   : > { %v8950_v41 = vpop.permute.xlu1 %7361  ;;  %v2326_v47 = vsel %vm2229_vm4, %v2294_v50, %v7343_v33  ;;  %v2327_v48 = vsel %vm2229_vm4, %v2295_v39, %v7344_v8  ;;  %v7349_v27 = vunpack.i.h.bf16 %v8928_v1  ;;  %v7348_v29 = vunpack.i.l.bf16 %v8928_v1  ;;  %v9002_v54 = vld [vmem:[#allocation2 + $0x139] sm:$0xff] }
 0x18a   : > { %7666 = vrot.lane.b32.xlu0 %v8835_v37, %s10889_s24  ;;  %v2359_v28 = vpack.c.bf16 %v2327_v48, %v2326_v47  ;;  %v8990_v38 = vpack.i.bf16 %v1323_v56, %v1322_v20  ;;  %v7354_v1 = vunpack.i.h.bf16 %v8930_v5  ;;  %v7353_v50 = vunpack.i.l.bf16 %v8930_v5 }
 0x18b   : > { %7646 = vrot.lane.b32.xlu1 %v7630_v58, %s10889_s24 }
 0x18c   : > { %2594 = vmatprep.mubr.bf16.mxu1 %v2359_v28  ;;  %v8961_v53 = vpop.permute.xlu0 %7391  ;;  %v9004_v28 = vld [vmem:[#allocation2 + $0x141] sm:$0xff] }
 0x18d   : > { %v7372_v9 = vpop.permute.xlu1 %7371  ;;  %v7715_v25 = vpack.i.bf16 %v9004_v28, %v9002_v54 }
 0x18e   : > { %v7374_v10 = vunpack.i.h.bf16 %v7372_v9  ;;  %v7373_v51 = vunpack.i.l.bf16 %v7372_v9  ;;  %7686 = vrot.lane.b32.xlu0 %v8963_v30, %s10888_s29 }
 0x18f   : > { %7651 = vrot.lane.b32.xlu1 %v8831_v23, %s10888_s29 }
 0x190   : > { %v8971_v58 = vpop.permute.xlu0 %7396  ;;  %v2230_v59 = vsel %vm2229_vm4, %v2197_v52, %v7373_v51  ;;  %v2231_v60 = vsel %vm2229_vm4, %v2198_v57, %v7374_v10  ;;  %v7389_v57 = vunpack.i.h.bf16 %v8946_v43 }
 0x191   : > { %v7377_v13 = vpop.permute.xlu1 %7376  ;;  %v2358_v31 = vpack.c.bf16 %v2231_v60, %v2230_v59  ;;  %v7388_v59 = vunpack.i.l.bf16 %v8946_v43  ;;  %v1239_v60 = vld [vmem:[#allocation2 + $0x49] sm:$0xff] }
 0x192   : > { %7691 = vrot.lane.b32.xlu0 %v8975_v61, %s8238_s20  ;;  %v7379_v21 = vunpack.i.h.bf16 %v7377_v13  ;;  %v7378_v22 = vunpack.i.l.bf16 %v7377_v13  ;;  %v7394_v13 = vunpack.i.h.bf16 %v8961_v53 }
 0x193   : > { %2595 = vmatmul.mubr.bf16.vlgmr.msra.gmra.mrb[0].mxu1 %v2358_v31  ;;  %7671 = vrot.lane.b32.xlu1 %v7655_v4, %s8238_s20  ;;  %v7393_v31 = vunpack.i.l.bf16 %v8961_v53 }
 0x194   : > { %v7417_v23 = vpop.permute.xlu0 %7416  ;;  %v2166_v63 = vsel %vm675_vm0, %v8708_v14, %v7378_v22  ;;  %v2167_v4 = vsel %vm675_vm0, %v8699_v7, %v7379_v21  ;;  %v2264_v14 = vsel %vm675_vm0, %v8614_v6, %v7348_v29  ;;  %v2265_v7 = vsel %vm675_vm0, %v8620_v11, %v7349_v27  ;;  %v1328_v29 = vld [vmem:[#allocation2 + $0x180] sm:$0xff] }
 0x195   : > { %v7382_v8 = vpop.permute.xlu1 %7381  ;;  %v7419_v34 = vunpack.i.h.bf16 %v7417_v23  ;;  %v7418_v35 = vunpack.i.l.bf16 %v7417_v23 }
 0x196   : > { %v7384_v33 = vunpack.i.h.bf16 %v7382_v8  ;;  %v7383_v44 = vunpack.i.l.bf16 %v7382_v8  ;;  %7696 = vrot.lane.b32.xlu0 %v8858_v32, %s10889_s24  ;;  %v1329_v8 = vld [vmem:[#allocation2 + $0x188] sm:$0xff] }
 0x197   : > { %7676 = vrot.lane.b32.xlu1 %v8935_v24, %s10889_s24  ;;  %v2296_v5 = vsel %vm2196_vm3, %v2264_v14, %v7418_v35  ;;  %v2297_v55 = vsel %vm2196_vm3, %v2265_v7, %v7419_v34  ;;  %v7364_v34 = vunpack.i.h.bf16 %v8950_v41  ;;  %v7363_v35 = vunpack.i.l.bf16 %v8950_v41 }
 0x198   : > { %v7422_v39 = vpop.permute.xlu0 %7421  ;;  %v2199_v40 = vsel %vm2196_vm3, %v2166_v63, %v7383_v44  ;;  %v2200_v47 = vsel %vm2196_vm3, %v2167_v4, %v7384_v33  ;;  %v7359_v33 = vunpack.i.h.bf16 %v8937_v19  ;;  %v7358_v44 = vunpack.i.l.bf16 %v8937_v19 }
 0x199   : > { %v9000_v48 = vpop.permute.xlu1 %7401  ;;  %v7424_v24 = vunpack.i.h.bf16 %v7422_v39  ;;  %v7423_v36 = vunpack.i.l.bf16 %v7422_v39  ;;  %v2232_v6 = vsel %vm2229_vm4, %v2199_v40, %v7353_v50  ;;  %v2233_v45 = vsel %vm2229_vm4, %v2200_v47, %v7354_v1  ;;  %v1360_v50 = vld [vmem:[#allocation2 + $0x181] sm:$0xff]  ;;  %v1361_v39 = vld [vmem:[#allocation2 + $0x189] sm:$0xff] }
 0x19a   : > { %7711 = vrot.lane.b32.xlu0 %v8990_v38, %s10888_s29  ;;  %v2361_v52 = vpack.c.bf16 %v2233_v45, %v2232_v6  ;;  %v9047_v4 = vpack.i.bf16 %v1329_v8, %v1328_v29  ;;  %v2168_v19 = vsel %vm675_vm0, %v8625_v15, %v7358_v44  ;;  %v2169_v40 = vsel %vm675_vm0, %v8627_v16, %v7359_v33  ;;  %v1327_v6 = vld [vmem:[#allocation2 + $0x170] sm:$0xff] }
 0x19b   : > { %7681 = vrot.lane.b32.xlu1 %v8835_v37, %s10888_s29  ;;  %v2328_v11 = vsel %vm2229_vm4, %v2296_v5, %v7423_v36  ;;  %v2329_v49 = vsel %vm2229_vm4, %v2297_v55, %v7424_v24  ;;  %v1240_v37 = vld [vmem:[#allocation2 + $0x51] sm:$0xff]  ;;  %v2201_v41 = vsel %vm2196_vm3, %v2168_v19, %v7363_v35  ;;  %v7750_v36 = vpack.i.bf16 %v1361_v39, %v1360_v50  ;;  %v1326_v55 = vld [vmem:[#allocation2 + $0x168] sm:$0xff]  ;;  %v1394_v39 = vld [vmem:[#allocation2 + $0x19a] sm:$0xff] }
 0x19c   : > { %v7427_v42 = vpop.permute.xlu0 %7426  ;;  %v2362_v9 = vpack.c.bf16 %v2329_v49, %v2328_v11  ;;  %v7755_v49 = vpack.i.bf16 %v1327_v6, %v1326_v55  ;;  %v1395_v19 = vld [vmem:[#allocation2 + $0x1a2] sm:$0xff] }
 0x19d   : > { %v9018_v26 = vpop.permute.xlu1 %7406  ;;  %v7429_v10 = vunpack.i.h.bf16 %v7427_v42  ;;  %v7428_v51 = vunpack.i.l.bf16 %v7427_v42  ;;  %v9065_v42 = vld [vmem:[#allocation2 + $0x169] sm:$0xff] }
 0x19e   : > { %2602 = vmatprep.mubr.bf16.mxu1 %v2362_v9  ;;  %7716 = vrot.lane.b32.xlu0 %v7715_v25, %s8238_s20  ;;  %v9067_v9 = vld [vmem:[#allocation2 + $0x171] sm:$0xff] }
 0x19f   : > { %v2266_v21 = vsel %vm675_vm0, %v1239_v60, %v7428_v51  ;;  %v2267_v22 = vsel %vm675_vm0, %v1240_v37, %v7429_v10  ;;  %7701 = vrot.lane.b32.xlu1 %v8963_v30, %s8238_s20  ;;  %2603 = vmatmul.mubr.bf16.gmra.mrb[4].mxu1 %v2361_v52  ;;  %v7399_v10 = vunpack.i.h.bf16 %v8971_v58  ;;  %v7398_v51 = vunpack.i.l.bf16 %v8971_v58 }
 0x1a0   : > { %v9029_v23 = vpop.permute.xlu0 %7446  ;;  %v2298_v43 = vsel %vm2196_vm3, %v2266_v21, %v7388_v59  ;;  %v2299_v20 = vsel %vm2196_vm3, %v2267_v22, %v7389_v57  ;;  %v1113_v57 = vld [vmem:[#allocation2 + $0x48] sm:$0xff]  ;;  %v1114_v59 = vld [vmem:[#allocation2 + $0x50] sm:$0xff]  ;;  %v7760_v22 = vpack.i.bf16 %v9067_v9, %v9065_v42  ;;  %v7404_v58 = vunpack.i.h.bf16 %v9000_v48 }
 0x1a1   : > { %v9033_v56 = vpop.permute.xlu1 %7411  ;;  %v2330_v27 = vsel %vm2229_vm4, %v2298_v43, %v7393_v31  ;;  %v2331_v53 = vsel %vm2229_vm4, %v2299_v20, %v7394_v13  ;;  %v7403_v43 = vunpack.i.l.bf16 %v9000_v48  ;;  %v2268_v29 = vsel %vm675_vm0, %v8692_v2, %v7398_v51 }
 0x1a2   : > { %7721 = vrot.lane.b32.xlu0 %v8861_v62, %s10889_s24  ;;  %v2365_v30 = vpack.c.bf16 %v2331_v53, %v2330_v27  ;;  %v2269_v8 = vsel %vm675_vm0, %v8694_v3, %v7399_v10 }
 0x1a3   : > { %7706 = vrot.lane.b32.xlu1 %v8975_v61, %s10889_s24  ;;  %v2202_v61 = vsel %vm2196_vm3, %v2169_v40, %v7364_v34 }
 0x1a4   : > { %2610 = vmatprep.mubr.bf16.mxu1 %v2365_v30  ;;  %v9045_v63 = vpop.permute.xlu0 %7451 }
 0x1a5   : > { %v7432_v1 = vpop.permute.xlu1 %7431 }
 0x1a6   : > { %v7434_v47 = vunpack.i.h.bf16 %v7432_v1  ;;  %v7433_v14 = vunpack.i.l.bf16 %v7432_v1  ;;  %7746 = vrot.lane.b32.xlu0 %v9047_v4, %s10888_s29 }
 0x1a7   : > { %7726 = vrot.lane.b32.xlu1 %v8990_v38, %s8238_s20 }
 0x1a8   : > { %v9059_v7 = vpop.permute.xlu0 %7456  ;;  %v2234_v24 = vsel %vm2229_vm4, %v2201_v41, %v7433_v14  ;;  %v2235_v15 = vsel %vm2229_vm4, %v2202_v61, %v7434_v47  ;;  %v2405_v61 = vpack.c.bf16 %v1395_v19, %v1394_v39 }
 0x1a9   : > { %v7437_v16 = vpop.permute.xlu1 %7436  ;;  %v2364_v5 = vpack.c.bf16 %v2235_v15, %v2234_v24  ;;  %v7449_v24 = vunpack.i.h.bf16 %v9029_v23  ;;  %v7448_v15 = vunpack.i.l.bf16 %v9029_v23 }
 0x1aa   : > { %7751 = vrot.lane.b32.xlu0 %v7750_v36, %s8238_s20  ;;  %v7439_v45 = vunpack.i.h.bf16 %v7437_v16  ;;  %v7438_v11 = vunpack.i.l.bf16 %v7437_v16  ;;  %v1243_v36 = vld [vmem:[#allocation2 + $0x79] sm:$0xff]  ;;  %v7454_v16 = vunpack.i.h.bf16 %v9045_v63  ;;  %7237 = vmatmul.mubr.msk.bf16.gmra.mrb[60].mxu0 %vm675_vm0, %v2405_v61  ;;  %v1245_v61 = vld [vmem:[#allocation2 + $0x91] sm:$0xff] }
 0x1ab   : > { %2611 = vmatmul.mubr.bf16.gmra.mrb[8].mxu1 %v2364_v5  ;;  %7731 = vrot.lane.b32.xlu1 %v7715_v25, %s10889_s24  ;;  %v7453_v5 = vunpack.i.l.bf16 %v9045_v63 }
 0x1ac   : > { %v7477_v38 = vpop.permute.xlu0 %7476  ;;  %v2170_v25 = vsel %vm675_vm0, %v1113_v57, %v7438_v11  ;;  %v2171_v21 = vsel %vm675_vm0, %v1114_v59, %v7439_v45  ;;  %v1330_v45 = vld [vmem:[#allocation2 + $0x198] sm:$0xff]  ;;  %v1331_v11 = vld [vmem:[#allocation2 + $0x1a0] sm:$0xff]  ;;  %v7409_v57 = vunpack.i.h.bf16 %v9018_v26 }
 0x1ad   : > { %v7442_v52 = vpop.permute.xlu1 %7441  ;;  %v7479_v13 = vunpack.i.h.bf16 %v7477_v38  ;;  %v7478_v31 = vunpack.i.l.bf16 %v7477_v38 }
 0x1ae   : > { %v7444_v60 = vunpack.i.h.bf16 %v7442_v52  ;;  %v7443_v37 = vunpack.i.l.bf16 %v7442_v52  ;;  %7756 = vrot.lane.b32.xlu0 %v7755_v49, %s10888_s29 }
 0x1af   : > { %7736 = vrot.lane.b32.xlu1 %v8861_v62, %s10888_s29  ;;  %v2300_v30 = vsel %vm2196_vm3, %v2268_v29, %v7478_v31  ;;  %v2301_v48 = vsel %vm2196_vm3, %v2269_v8, %v7479_v13  ;;  %v1363_v13 = vld [vmem:[#allocation2 + $0x1a1] sm:$0xff]  ;;  %v7414_v31 = vunpack.i.h.bf16 %v9033_v56 }
 0x1b0   : > { %v7482_v20 = vpop.permute.xlu0 %7481  ;;  %v2203_v27 = vsel %vm2196_vm3, %v2170_v25, %v7443_v37  ;;  %v2204_v53 = vsel %vm2196_vm3, %v2171_v21, %v7444_v60  ;;  %v7775_v60 = vpack.i.bf16 %v1331_v11, %v1330_v45  ;;  %v1362_v37 = vld [vmem:[#allocation2 + $0x199] sm:$0xff]  ;;  %v7413_v25 = vunpack.i.l.bf16 %v9033_v56 }
 0x1b1   : > { %v9086_v33 = vpop.permute.xlu1 %7461  ;;  %v7484_v62 = vunpack.i.h.bf16 %v7482_v20  ;;  %v7483_v44 = vunpack.i.l.bf16 %v7482_v20  ;;  %v2236_v34 = vsel %vm2229_vm4, %v2203_v27, %v7403_v43  ;;  %v2237_v35 = vsel %vm2229_vm4, %v2204_v53, %v7404_v58  ;;  %v1115_v58 = vld [vmem:[#allocation2 + $0x60] sm:$0xff] }
 0x1b2   : > { %7761 = vrot.lane.b32.xlu0 %v7760_v22, %s8238_s20  ;;  %v2367_v41 = vpack.c.bf16 %v2237_v35, %v2236_v34  ;;  %v7780_v20 = vpack.i.bf16 %v1363_v13, %v1362_v37  ;;  %v7459_v34 = vunpack.i.h.bf16 %v9059_v7  ;;  %v7458_v35 = vunpack.i.l.bf16 %v9059_v7 }
 0x1b3   : > { %7741 = vrot.lane.b32.xlu1 %v8858_v32, %s10888_s29  ;;  %v2332_v2 = vsel %vm2229_vm4, %v2300_v30, %v7483_v44  ;;  %v2333_v3 = vsel %vm2229_vm4, %v2301_v48, %v7484_v62  ;;  %v1244_v32 = vld [vmem:[#allocation2 + $0x81] sm:$0xff] }
 0x1b4   : > { %v7487_v1 = vpop.permute.xlu0 %7486  ;;  %v2368_v50 = vpack.c.bf16 %v2333_v3, %v2332_v2  ;;  %v1117_v3 = vld [vmem:[#allocation2 + $0x78] sm:$0xff] }
 0x1b5   : > { %v9097_v40 = vpop.permute.xlu1 %7466  ;;  %v7489_v47 = vunpack.i.h.bf16 %v7487_v1  ;;  %v7488_v14 = vunpack.i.l.bf16 %v7487_v1  ;;  %v1118_v1 = vld [vmem:[#allocation2 + $0x80] sm:$0xff] }
 0x1b6   : > { %2618 = vmatprep.mubr.bf16.mxu1 %v2368_v50  ;;  %7766 = vrot.lane.b32.xlu0 %v8881_v46, %s10889_s24 }
 0x1b7   : > { %v2270_v55 = vsel %vm675_vm0, %v1243_v36, %v7488_v14  ;;  %v2271_v6 = vsel %vm675_vm0, %v1244_v32, %v7489_v47  ;;  %7786 = vrot.lane.b32.xlu1 %v7755_v49, %s8238_s20  ;;  %2619 = vmatmul.mubr.bf16.gmra.mrb[12].mxu1 %v2367_v41  ;;  %v7408_v49 = vunpack.i.l.bf16 %v9018_v26  ;;  %v1116_v26 = vld [vmem:[#allocation2 + $0x68] sm:$0xff] }
 0x1b8   : > { %v9108_v23 = vpop.permute.xlu0 %7506  ;;  %v2302_v38 = vsel %vm2196_vm3, %v2270_v55, %v7448_v15  ;;  %v2303_v10 = vsel %vm2196_vm3, %v2271_v6, %v7449_v24  ;;  %v2173_v0 = vsel %vm675_vm0, %v1116_v26, %v7409_v57  ;;  %v1246_v24 = vld [vmem:[#allocation2 + $0x99] sm:$0xff]  ;;  %v7463_v15 = vunpack.i.l.bf16 %v9086_v33  ;;  %v1248_v26 = vld [vmem:[#allocation2 + $0xb1] sm:$0xff] }
 0x1b9   : > { %v9113_v51 = vpop.permute.xlu1 %7471  ;;  %v2334_v63 = vsel %vm2229_vm4, %v2302_v38, %v7453_v5  ;;  %v2335_v52 = vsel %vm2229_vm4, %v2303_v10, %v7454_v16  ;;  %v2172_v17 = vsel %vm675_vm0, %v1115_v58, %v7408_v49  ;;  %v2272_v16 = vsel %vm675_vm0, %v1245_v61, %v7458_v35  ;;  %v1247_v58 = vld [vmem:[#allocation2 + $0xa9] sm:$0xff] }
 0x1ba   : > { %7771 = vrot.lane.b32.xlu0 %v7770_v12, %s10889_s24  ;;  %v2371_v59 = vpack.c.bf16 %v2335_v52, %v2334_v63  ;;  %v2205_v56 = vsel %vm2196_vm3, %v2172_v17, %v7413_v25  ;;  %v2273_v5 = vsel %vm675_vm0, %v1246_v24, %v7459_v34  ;;  %v7508_v25 = vunpack.i.l.bf16 %v9108_v23  ;;  %v1120_v34 = vld [vmem:[#allocation2 + $0x98] sm:$0xff] }
 0x1bb   : > { %7791 = vrot.lane.b32.xlu1 %v7760_v22, %s10889_s24  ;;  %v2206_v22 = vsel %vm2196_vm3, %v2173_v0, %v7414_v31  ;;  %v7509_v31 = vunpack.i.h.bf16 %v9108_v23 }
 0x1bc   : > { %2626 = vmatprep.mubr.bf16.mxu1 %v2371_v59  ;;  %v9126_v21 = vpop.permute.xlu0 %7511 }
 0x1bd   : > { %v7492_v43 = vpop.permute.xlu1 %7491 }
 0x1be   : > { %v7494_v12 = vunpack.i.h.bf16 %v7492_v43  ;;  %v7493_v27 = vunpack.i.l.bf16 %v7492_v43  ;;  %7776 = vrot.lane.b32.xlu0 %v7775_v60, %s10888_s29  ;;  %v7514_v43 = vunpack.i.h.bf16 %v9126_v21 }
 0x1bf   : > { %7796 = vrot.lane.b32.xlu1 %v8881_v46, %s10888_s29 }
 0x1c0   : > { %v9135_v53 = vpop.permute.xlu0 %7516  ;;  %v2238_v29 = vsel %vm2229_vm4, %v2205_v56, %v7493_v27  ;;  %v2239_v8 = vsel %vm2229_vm4, %v2206_v22, %v7494_v12 }
 0x1c1   : > { %v7497_v62 = vpop.permute.xlu1 %7496  ;;  %v2370_v44 = vpack.c.bf16 %v2239_v8, %v2238_v29  ;;  %v7469_v8 = vunpack.i.h.bf16 %v9097_v40 }
 0x1c2   : > { %7781 = vrot.lane.b32.xlu0 %v7780_v20, %s8238_s20  ;;  %v7499_v30 = vunpack.i.h.bf16 %v7497_v62  ;;  %v7498_v48 = vunpack.i.l.bf16 %v7497_v62  ;;  %v7513_v20 = vunpack.i.l.bf16 %v9126_v21  ;;  %v7468_v21 = vunpack.i.l.bf16 %v9097_v40 }
 0x1c3   : > { %2627 = vmatmul.mubr.bf16.gmra.mrb[16].mxu1 %v2370_v44  ;;  %7801 = vrot.lane.b32.xlu1 %v9047_v4, %s8238_s20  ;;  %v7464_v4 = vunpack.i.h.bf16 %v9086_v33  ;;  %v7474_v44 = vunpack.i.h.bf16 %v9113_v51 }
 0x1c4   : > { %v7537_v46 = vpop.permute.xlu0 %7536  ;;  %v2174_v14 = vsel %vm675_vm0, %v1117_v3, %v7498_v48  ;;  %v2175_v41 = vsel %vm675_vm0, %v1118_v1, %v7499_v30  ;;  %v7473_v30 = vunpack.i.l.bf16 %v9113_v51  ;;  %v2177_v3 = vsel %vm675_vm0, %v1120_v34, %v7469_v8 }
 0x1c5   : > { %v7502_v2 = vpop.permute.xlu1 %7501  ;;  %v7539_v19 = vunpack.i.h.bf16 %v7537_v46  ;;  %v7538_v47 = vunpack.i.l.bf16 %v7537_v46  ;;  %v1119_v46 = vld [vmem:[#allocation2 + $0x90] sm:$0xff]  ;;  %v2210_v40 = vsel %vm2196_vm3, %v2177_v3, %v7474_v44 }
 0x1c6   : > { %v7504_v50 = vunpack.i.h.bf16 %v7502_v2  ;;  %v7503_v39 = vunpack.i.l.bf16 %v7502_v2  ;;  %v2176_v2 = vsel %vm675_vm0, %v1119_v46, %v7468_v21  ;;  %v1252_v46 = vld [vmem:[#allocation2 + $0xe1] sm:$0xff] }
 0x1c7   : > { %v2304_v11 = vsel %vm2196_vm3, %v2272_v16, %v7538_v47  ;;  %v2305_v38 = vsel %vm2196_vm3, %v2273_v5, %v7539_v19  ;;  %v1122_v16 = vld [vmem:[#allocation2 + $0xb0] sm:$0xff] }
 0x1c8   : > { %v7542_v36 = vpop.permute.xlu0 %7541  ;;  %v2207_v7 = vsel %vm2196_vm3, %v2174_v14, %v7503_v39  ;;  %v2208_v32 = vsel %vm2196_vm3, %v2175_v41, %v7504_v50  ;;  %v2209_v39 = vsel %vm2196_vm3, %v2176_v2, %v7473_v30  ;;  %v1251_v30 = vld [vmem:[#allocation2 + $0xd9] sm:$0xff] }
 0x1c9   : > { %v9152_v55 = vpop.permute.xlu1 %7521  ;;  %v7544_v6 = vunpack.i.h.bf16 %v7542_v36  ;;  %v7543_v45 = vunpack.i.l.bf16 %v7542_v36  ;;  %v2240_v10 = vsel %vm2229_vm4, %v2207_v7, %v7463_v15  ;;  %v2241_v33 = vsel %vm2229_vm4, %v2208_v32, %v7464_v4  ;;  %v1121_v32 = vld [vmem:[#allocation2 + $0xa8] sm:$0xff] }
 0x1ca   : > { %v2373_v13 = vpack.c.bf16 %v2241_v33, %v2240_v10  ;;  %v7519_v15 = vunpack.i.h.bf16 %v9135_v53  ;;  %v7518_v36 = vunpack.i.l.bf16 %v9135_v53  ;;  %v1249_v33 = vld [vmem:[#allocation2 + $0xc1] sm:$0xff] }
 0x1cb   : > { %v2336_v63 = vsel %vm2229_vm4, %v2304_v11, %v7543_v45  ;;  %v2337_v52 = vsel %vm2229_vm4, %v2305_v38, %v7544_v6 }
 0x1cc   : > { %v7547_v57 = vpop.permute.xlu0 %7546  ;;  %v2374_v49 = vpack.c.bf16 %v2337_v52, %v2336_v63  ;;  %v1250_v63 = vld [vmem:[#allocation2 + $0xc9] sm:$0xff]  ;;  %v7524_v52 = vunpack.i.h.bf16 %v9152_v55 }
 0x1cd   : > { %v9160_v59 = vpop.permute.xlu1 %7526  ;;  %v7549_v60 = vunpack.i.h.bf16 %v7547_v57  ;;  %v7548_v37 = vunpack.i.l.bf16 %v7547_v57  ;;  %v7523_v57 = vunpack.i.l.bf16 %v9152_v55 }
 0x1ce   : > { %2634 = vmatprep.mubr.bf16.mxu1 %v2374_v49 }
 0x1cf   : > { %v2274_v17 = vsel %vm675_vm0, %v1247_v58, %v7548_v37  ;;  %v2275_v0 = vsel %vm675_vm0, %v1248_v26, %v7549_v60  ;;  %2635 = vmatmul.mubr.bf16.gmra.mrb[20].mxu1 %v2373_v13  ;;  %v2276_v37 = vsel %vm675_vm0, %v1249_v33, %v7518_v36  ;;  %v2277_v13 = vsel %vm675_vm0, %v1250_v63, %v7519_v15 }
 0x1d0   : > { %v9168_v12 = vpop.permute.xlu0 %7566  ;;  %v2306_v27 = vsel %vm2196_vm3, %v2274_v17, %v7508_v25  ;;  %v2307_v56 = vsel %vm2196_vm3, %v2275_v0, %v7509_v31 }
 0x1d1   : > { %v9172_v22 = vpop.permute.xlu1 %7531  ;;  %v2338_v23 = vsel %vm2229_vm4, %v2306_v27, %v7513_v20  ;;  %v2339_v29 = vsel %vm2229_vm4, %v2307_v56, %v7514_v43  ;;  %v7568_v44 = vunpack.i.l.bf16 %v9168_v12 }
 0x1d2   : > { %v2377_v62 = vpack.c.bf16 %v2339_v29, %v2338_v23  ;;  %v7534_v15 = vunpack.i.h.bf16 %v9172_v22  ;;  %v7533_v36 = vunpack.i.l.bf16 %v9172_v22 }
 0x1d4   : > { %2642 = vmatprep.mubr.bf16.mxu1 %v2377_v62  ;;  %v9180_v48 = vpop.permute.xlu0 %7571  ;;  %v7569_v62 = vunpack.i.h.bf16 %v9168_v12 }
 0x1d5   : > { %v7552_v35 = vpop.permute.xlu1 %7551  ;;  %v7573_v2 = vunpack.i.l.bf16 %v9180_v48 }
 0x1d6   : > { %v7554_v1 = vunpack.i.h.bf16 %v7552_v35  ;;  %v7553_v50 = vunpack.i.l.bf16 %v7552_v35  ;;  %v7574_v35 = vunpack.i.h.bf16 %v9180_v48 }
 0x1d8   : > { %v9186_v19 = vpop.permute.xlu0 %7576  ;;  %v2242_v51 = vsel %vm2229_vm4, %v2209_v39, %v7553_v50  ;;  %v2243_v47 = vsel %vm2229_vm4, %v2210_v40, %v7554_v1 }
 0x1d9   : > { %v7557_v14 = vpop.permute.xlu1 %7556  ;;  %v2376_v41 = vpack.c.bf16 %v2243_v47, %v2242_v51 }
 0x1da   : > { %v7559_v61 = vunpack.i.h.bf16 %v7557_v14  ;;  %v7558_v24 = vunpack.i.l.bf16 %v7557_v14 }
 0x1db   : > { %2643 = vmatmul.mubr.bf16.gmra.mrb[24].mxu1 %v2376_v41 }
 0x1dc   : > { %v7597_v4 = vpop.permute.xlu0 %7596  ;;  %v2178_v38 = vsel %vm675_vm0, %v1121_v32, %v7558_v24  ;;  %v2179_v10 = vsel %vm675_vm0, %v1122_v16, %v7559_v61  ;;  %v7529_v61 = vunpack.i.h.bf16 %v9160_v59  ;;  %v7528_v24 = vunpack.i.l.bf16 %v9160_v59  ;;  %v1123_v32 = vld [vmem:[#allocation2 + $0xc0] sm:$0xff]  ;;  %v1124_v16 = vld [vmem:[#allocation2 + $0xc8] sm:$0xff] }
 0x1dd   : > { %v7562_v7 = vpop.permute.xlu1 %7561  ;;  %v7599_v45 = vunpack.i.h.bf16 %v7597_v4  ;;  %v7598_v11 = vunpack.i.l.bf16 %v7597_v4 }
 0x1de   : > { %v7564_v5 = vunpack.i.h.bf16 %v7562_v7  ;;  %v7563_v6 = vunpack.i.l.bf16 %v7562_v7 }
 0x1df   : > { %v2309_v26 = vsel %vm2196_vm3, %v2277_v13, %v7599_v45  ;;  %v2308_v43 = vsel %vm2196_vm3, %v2276_v37, %v7598_v11  ;;  %v2181_v45 = vsel %vm675_vm0, %v1124_v16, %v7529_v61 }
 0x1e0   : > { %v2211_v49 = vsel %vm2196_vm3, %v2178_v38, %v7563_v6  ;;  %v2212_v53 = vsel %vm2196_vm3, %v2179_v10, %v7564_v5  ;;  %v7602_v60 = vpop.permute.xlu0 %7601  ;;  %v2180_v6 = vsel %vm675_vm0, %v1123_v32, %v7528_v24  ;;  %v2214_v33 = vsel %vm2196_vm3, %v2181_v45, %v7534_v15 }
 0x1e1   : > { %v9200_v31 = vpop.permute.xlu1 %7581  ;;  %v7604_v25 = vunpack.i.h.bf16 %v7602_v60  ;;  %v7603_v58 = vunpack.i.l.bf16 %v7602_v60  ;;  %v2244_v20 = vsel %vm2229_vm4, %v2211_v49, %v7523_v57  ;;  %v2245_v55 = vsel %vm2229_vm4, %v2212_v53, %v7524_v52 }
 0x1e2   : > { %v2379_v21 = vpack.c.bf16 %v2245_v55, %v2244_v20  ;;  %v2213_v59 = vsel %vm2196_vm3, %v2180_v6, %v7533_v36  ;;  %v1125_v55 = vld [vmem:[#allocation2 + $0xd8] sm:$0xff] }
 0x1e3   : > { %v2340_v17 = vsel %vm2229_vm4, %v2308_v43, %v7603_v58  ;;  %v2341_v0 = vsel %vm2229_vm4, %v2309_v26, %v7604_v25  ;;  %v7579_v26 = vunpack.i.h.bf16 %v9186_v19  ;;  %v7578_v43 = vunpack.i.l.bf16 %v9186_v19 }
 0x1e4   : > { %v7607_v27 = vpop.permute.xlu0 %7606  ;;  %v2380_v56 = vpack.c.bf16 %v2341_v0, %v2340_v17  ;;  %v1126_v17 = vld [vmem:[#allocation2 + $0xe0] sm:$0xff]  ;;  %v7583_v19 = vunpack.i.l.bf16 %v9200_v31 }
 0x1e5   : > { %v9208_v23 = vpop.permute.xlu1 %7586  ;;  %v7609_v29 = vunpack.i.h.bf16 %v7607_v27  ;;  %v7608_v8 = vunpack.i.l.bf16 %v7607_v27  ;;  %v9212_v34 = vpop.f32.mrb[32].mxu0 }
 0x1e6   : > { %2650 = vmatprep.mubr.bf16.mxu1 %v2380_v56  ;;  %v9218_v50 = vpop.f32.mrb[33].mxu0 }
 0x1e7   : > { %v2278_v3 = vsel %vm675_vm0, %v1251_v30, %v7608_v8  ;;  %v2279_v1 = vsel %vm675_vm0, %v1252_v46, %v7609_v29  ;;  %2651 = vmatmul.mubr.bf16.gmra.mrb[28].mxu1 %v2379_v21  ;;  %v9222_v40 = vpop.f32.mrb[34].mxu0  ;;  %v1253_v30 = vld [vmem:[#allocation2 + $0xf1] sm:$0xff]  ;;  %v1254_v46 = vld [vmem:[#allocation2 + $0xf9] sm:$0xff] }
 0x1e8   : > { %v9220_v39 = vpop.permute.xlu0 %7626  ;;  %v2310_v12 = vsel %vm2196_vm3, %v2278_v3, %v7568_v44  ;;  %v2311_v51 = vsel %vm2196_vm3, %v2279_v1, %v7569_v62  ;;  %v9228_v14 = vpop.f32.mrb[35].mxu0 }
 0x1e9   : > { %v9226_v47 = vpop.permute.xlu1 %7591  ;;  %v2342_v48 = vsel %vm2229_vm4, %v2310_v12, %v7573_v2  ;;  %v2343_v41 = vsel %vm2229_vm4, %v2311_v51, %v7574_v35  ;;  %v7584_v35 = vunpack.i.h.bf16 %v9200_v31  ;;  %v2280_v51 = vsel %vm675_vm0, %v1253_v30, %v7578_v43 }
 0x1ea   : > { %v2383_v4 = vpack.c.bf16 %v2343_v41, %v2342_v48  ;;  %v2281_v48 = vsel %vm675_vm0, %v1254_v46, %v7579_v26  ;;  %v7594_v46 = vunpack.i.h.bf16 %v9226_v47 }
 0x1ec   : > { %2658 = vmatprep.mubr.bf16.mxu1 %v2383_v4  ;;  %v9236_v7 = vpop.permute.xlu0 %7631 }
 0x1ed   : > { %v7612_v5 = vpop.permute.xlu1 %7611  ;;  %v9240_v10 = vpop.f32.mrb[36].mxu0 }
 0x1ee   : > { %v7614_v11 = vunpack.i.h.bf16 %v7612_v5  ;;  %v7613_v38 = vunpack.i.l.bf16 %v7612_v5  ;;  %v9244_v63 = vpop.f32.mrb[37].mxu0 }
 0x1ef   : > { %v9250_v49 = vpop.f32.mrb[38].mxu0 }
 0x1f0   : > { %v9246_v22 = vpop.permute.xlu0 %7636  ;;  %v2246_v52 = vsel %vm2229_vm4, %v2213_v59, %v7613_v38  ;;  %v2247_v57 = vsel %vm2229_vm4, %v2214_v33, %v7614_v11  ;;  %v9252_v37 = vpop.f32.mrb[39].mxu0 }
 0x1f1   : > { %v7617_v53 = vpop.permute.xlu1 %7616  ;;  %v2382_v60 = vpack.c.bf16 %v2247_v57, %v2246_v52  ;;  %v7629_v52 = vunpack.i.h.bf16 %v9220_v39  ;;  %v7628_v57 = vunpack.i.l.bf16 %v9220_v39 }
 0x1f2   : > { %v7619_v13 = vunpack.i.h.bf16 %v7617_v53  ;;  %v7618_v25 = vunpack.i.l.bf16 %v7617_v53  ;;  %v1255_v53 = vld [vmem:[#allocation2 + $0x109] sm:$0xff] }
 0x1f3   : > { %2659 = vmatmul.mubr.bf16.gmra.mrb[32].mxu1 %v2382_v60  ;;  %v1256_v60 = vld [vmem:[#allocation2 + $0x111] sm:$0xff] }
 0x1f4   : > { %v7657_v58 = vpop.permute.xlu0 %7656  ;;  %v2182_v21 = vsel %vm675_vm0, %v1125_v55, %v7618_v25  ;;  %v2183_v62 = vsel %vm675_vm0, %v1126_v17, %v7619_v13  ;;  %v7634_v25 = vunpack.i.h.bf16 %v9236_v7 }
 0x1f5   : > { %v7622_v20 = vpop.permute.xlu1 %7621  ;;  %v7659_v56 = vunpack.i.h.bf16 %v7657_v58  ;;  %v7658_v29 = vunpack.i.l.bf16 %v7657_v58  ;;  %v9256_v8 = vpop.f32.mrb[40].mxu0  ;;  %v7633_v58 = vunpack.i.l.bf16 %v9236_v7 }
 0x1f6   : > { %v7624_v0 = vunpack.i.h.bf16 %v7622_v20  ;;  %v7623_v27 = vunpack.i.l.bf16 %v7622_v20  ;;  %v9260_v44 = vpop.f32.mrb[41].mxu0 }
 0x1f7   : > { %v9266_v12 = vpop.f32.mrb[42].mxu0  ;;  %v2313_v15 = vsel %vm2196_vm3, %v2281_v48, %v7659_v56  ;;  %v2312_v31 = vsel %vm2196_vm3, %v2280_v51, %v7658_v29 }
 0x1f8   : > { %v2215_v2 = vsel %vm2196_vm3, %v2182_v21, %v7623_v27  ;;  %v2216_v3 = vsel %vm2196_vm3, %v2183_v62, %v7624_v0  ;;  %v7662_v1 = vpop.permute.xlu0 %7661  ;;  %v9272_v4 = vpop.f32.mrb[43].mxu0  ;;  %v7589_v21 = vunpack.i.h.bf16 %v9208_v23  ;;  %v7588_v62 = vunpack.i.l.bf16 %v9208_v23 }
 0x1f9   : > { %v9270_v41 = vpop.permute.xlu1 %7641  ;;  %v7664_v61 = vunpack.i.h.bf16 %v7662_v1  ;;  %v7663_v24 = vunpack.i.l.bf16 %v7662_v1  ;;  %v2248_v36 = vsel %vm2229_vm4, %v2215_v2, %v7583_v19  ;;  %v2249_v32 = vsel %vm2229_vm4, %v2216_v3, %v7584_v35  ;;  %v1127_v2 = vld [vmem:[#allocation2 + $0xf0] sm:$0xff]  ;;  %v1128_v3 = vld [vmem:[#allocation2 + $0xf8] sm:$0xff] }
 0x1fa   : > { %v2385_v33 = vpack.c.bf16 %v2249_v32, %v2248_v36  ;;  %v7593_v35 = vunpack.i.l.bf16 %v9226_v47  ;;  %v2184_v51 = vsel %vm675_vm0, %v1127_v2, %v7588_v62  ;;  %v2185_v48 = vsel %vm675_vm0, %v1128_v3, %v7589_v21 }
 0x1fb   : > { %v2344_v16 = vsel %vm2229_vm4, %v2312_v31, %v7663_v24  ;;  %v2345_v5 = vsel %vm2229_vm4, %v2313_v15, %v7664_v61  ;;  %v2218_v31 = vsel %vm2196_vm3, %v2185_v48, %v7594_v46  ;;  %v1258_v46 = vld [vmem:[#allocation2 + $0x129] sm:$0xff] }
 0x1fc   : > { %v7667_v6 = vpop.permute.xlu0 %7666  ;;  %v2386_v45 = vpack.c.bf16 %v2345_v5, %v2344_v16  ;;  %v2217_v23 = vsel %vm2196_vm3, %v2184_v51, %v7593_v35  ;;  %v7644_v35 = vunpack.i.h.bf16 %v9270_v41 }
 0x1fd   : > { %v9280_v11 = vpop.permute.xlu1 %7646  ;;  %v7669_v38 = vunpack.i.h.bf16 %v7667_v6  ;;  %v7668_v59 = vunpack.i.l.bf16 %v7667_v6  ;;  %v9284_v13 = vpop.f32.mrb[44].mxu0 }
 0x1fe   : > { %2666 = vmatprep.mubr.bf16.mxu1 %v2386_v45  ;;  %v9290_v20 = vpop.f32.mrb[45].mxu0 }
 0x1ff   : > { %v2282_v26 = vsel %vm675_vm0, %v1255_v53, %v7668_v59  ;;  %v2283_v43 = vsel %vm675_vm0, %v1256_v60, %v7669_v38  ;;  %2667 = vmatmul.mubr.bf16.gmra.mrb[36].mxu1 %v2385_v33  ;;  %v9296_v0 = vpop.f32.mrb[46].mxu0  ;;  %v7638_v53 = vunpack.i.l.bf16 %v9246_v22 }
 0x200   : > { %v9292_v55 = vpop.permute.xlu0 %7686  ;;  %v2314_v39 = vsel %vm2196_vm3, %v2282_v26, %v7628_v57  ;;  %v2315_v17 = vsel %vm2196_vm3, %v2283_v43, %v7629_v52  ;;  %v9302_v29 = vpop.f32.mrb[47].mxu0  ;;  %v7639_v57 = vunpack.i.h.bf16 %v9246_v22  ;;  %v7643_v22 = vunpack.i.l.bf16 %v9270_v41 }
 0x201   : > { %v9298_v27 = vpop.permute.xlu1 %7651  ;;  %v2346_v56 = vsel %vm2229_vm4, %v2314_v39, %v7633_v58  ;;  %v2347_v7 = vsel %vm2229_vm4, %v2315_v17, %v7634_v25  ;;  %v1129_v25 = vld [vmem:[#allocation2 + $0x108] sm:$0xff]  ;;  %v1130_v58 = vld [vmem:[#allocation2 + $0x110] sm:$0xff] }
 0x202   : > { %v2389_v30 = vpack.c.bf16 %v2347_v7, %v2346_v56 }
 0x204   : > { %2674 = vmatprep.mubr.bf16.mxu1 %v2389_v30  ;;  %v9308_v19 = vpop.permute.xlu0 %7691  ;;  %v1257_v30 = vld [vmem:[#allocation2 + $0x121] sm:$0xff] }
 0x205   : > { %v7672_v1 = vpop.permute.xlu1 %7671  ;;  %v9312_v15 = vpop.f32.mrb[48].mxu0  ;;  %v2284_v48 = vsel %vm675_vm0, %v1257_v30, %v7638_v53 }
 0x206   : > { %v7674_v61 = vunpack.i.h.bf16 %v7672_v1  ;;  %v7673_v24 = vunpack.i.l.bf16 %v7672_v1  ;;  %v9316_v36 = vpop.f32.mrb[49].mxu0 }
 0x207   : > { %v9322_v5 = vpop.f32.mrb[50].mxu0 }
 0x208   : > { %v9318_v47 = vpop.permute.xlu0 %7696  ;;  %v2250_v32 = vsel %vm2229_vm4, %v2217_v23, %v7673_v24  ;;  %v2251_v16 = vsel %vm2229_vm4, %v2218_v31, %v7674_v61  ;;  %v9324_v38 = vpop.f32.mrb[51].mxu0  ;;  %v2285_v61 = vsel %vm675_vm0, %v1258_v46, %v7639_v57  ;;  %v7694_v46 = vunpack.i.h.bf16 %v9308_v19 }
 0x209   : > { %v7677_v6 = vpop.permute.xlu1 %7676  ;;  %v2388_v45 = vpack.c.bf16 %v2251_v16, %v2250_v32 }
 0x20a   : > { %v7679_v59 = vunpack.i.h.bf16 %v7677_v6  ;;  %v7678_v33 = vunpack.i.l.bf16 %v7677_v6 }
 0x20b   : > { %2675 = vmatmul.mubr.bf16.gmra.mrb[40].mxu1 %v2388_v45 }
 0x20c   : > { %v7712_v52 = vpop.permute.xlu0 %7711  ;;  %v2186_v7 = vsel %vm675_vm0, %v1129_v25, %v7678_v33  ;;  %v2187_v21 = vsel %vm675_vm0, %v1130_v58, %v7679_v59 }
 0x20d   : > { %v7682_v60 = vpop.permute.xlu1 %7681  ;;  %v7714_v39 = vunpack.i.h.bf16 %v7712_v52  ;;  %v7713_v17 = vunpack.i.l.bf16 %v7712_v52  ;;  %v9328_v56 = vpop.f32.mrb[52].mxu0  ;;  %v7649_v52 = vunpack.i.h.bf16 %v9280_v11 }
 0x20e   : > { %v7684_v26 = vunpack.i.h.bf16 %v7682_v60  ;;  %v7683_v43 = vunpack.i.l.bf16 %v7682_v60  ;;  %v9332_v62 = vpop.f32.mrb[53].mxu0  ;;  %v7648_v60 = vunpack.i.l.bf16 %v9280_v11  ;;  %v7693_v11 = vunpack.i.l.bf16 %v9308_v19 }
 0x20f   : > { %v9338_v51 = vpop.f32.mrb[54].mxu0  ;;  %v2317_v16 = vsel %vm2196_vm3, %v2285_v61, %v7714_v39  ;;  %v2316_v41 = vsel %vm2196_vm3, %v2284_v48, %v7713_v17  ;;  %v7654_v39 = vunpack.i.h.bf16 %v9298_v27  ;;  %v7653_v17 = vunpack.i.l.bf16 %v9298_v27  ;;  %v1131_v27 = vld [vmem:[#allocation2 + $0x120] sm:$0xff]  ;;  %v1132_v61 = vld [vmem:[#allocation2 + $0x128] sm:$0xff] }
 0x210   : > { %v2219_v2 = vsel %vm2196_vm3, %v2186_v7, %v7683_v43  ;;  %v2220_v3 = vsel %vm2196_vm3, %v2187_v21, %v7684_v26  ;;  %v7717_v1 = vpop.permute.xlu0 %7716  ;;  %v9344_v32 = vpop.f32.mrb[55].mxu0  ;;  %v7689_v7 = vunpack.i.h.bf16 %v9292_v55  ;;  %v7688_v21 = vunpack.i.l.bf16 %v9292_v55 }
 0x211   : > { %v9342_v24 = vpop.permute.xlu1 %7701  ;;  %v7719_v23 = vunpack.i.h.bf16 %v7717_v1  ;;  %v7718_v31 = vunpack.i.l.bf16 %v7717_v1  ;;  %v2252_v6 = vsel %vm2229_vm4, %v2219_v2, %v7643_v22  ;;  %v2253_v45 = vsel %vm2229_vm4, %v2220_v3, %v7644_v35 }
 0x212   : > { %v2391_v43 = vpack.c.bf16 %v2253_v45, %v2252_v6  ;;  %v2188_v19 = vsel %vm675_vm0, %v1131_v27, %v7648_v60 }
 0x213   : > { %v2348_v59 = vsel %vm2229_vm4, %v2316_v41, %v7718_v31  ;;  %v2349_v33 = vsel %vm2229_vm4, %v2317_v16, %v7719_v23  ;;  %v2189_v16 = vsel %vm675_vm0, %v1132_v61, %v7649_v52 }
 0x214   : > { %v7722_v57 = vpop.permute.xlu0 %7721  ;;  %v2392_v53 = vpack.c.bf16 %v2349_v33, %v2348_v59  ;;  %v2221_v59 = vsel %vm2196_vm3, %v2188_v19, %v7653_v17  ;;  %v2222_v33 = vsel %vm2196_vm3, %v2189_v16, %v7654_v39  ;;  %v1134_v39 = vld [vmem:[#allocation2 + $0x140] sm:$0xff]  ;;  %v7704_v19 = vunpack.i.h.bf16 %v9342_v24  ;;  %v8163_v16 = vld [vmem:[#allocation2 + $0x151] sm:$0xff] }
 0x215   : > { %v9354_v25 = vpop.permute.xlu1 %7706  ;;  %v7724_v58 = vunpack.i.h.bf16 %v7722_v57  ;;  %v7723_v26 = vunpack.i.l.bf16 %v7722_v57  ;;  %v9360_v30 = vpop.f32.mrb[56].mxu0 }
 0x216   : > { %2682 = vmatprep.mubr.bf16.mxu1 %v2392_v53  ;;  %v9368_v2 = vpop.f32.mrb[57].mxu0 }
 0x217   : > { %v2286_v35 = vsel %vm675_vm0, %v9002_v54, %v7723_v26  ;;  %v2287_v22 = vsel %vm675_vm0, %v9004_v28, %v7724_v58  ;;  %2683 = vmatmul.mubr.bf16.gmra.mrb[44].mxu1 %v2391_v43  ;;  %v9374_v48 = vpop.f32.mrb[58].mxu0 }
 0x218   : > { %v9370_v3 = vpop.permute.xlu0 %7746  ;;  %v2318_v55 = vsel %vm2196_vm3, %v2286_v35, %v7688_v21  ;;  %v2319_v1 = vsel %vm2196_vm3, %v2287_v22, %v7689_v7  ;;  %v9379_v31 = vpop.f32.mrb[59].mxu0  ;;  %v7699_v21 = vunpack.i.h.bf16 %v9318_v47 }
 0x219   : > { %v7727_v23 = vpop.permute.xlu1 %7726  ;;  %v2350_v54 = vsel %vm2229_vm4, %v2318_v55, %v7693_v11  ;;  %v2351_v28 = vsel %vm2229_vm4, %v2319_v1, %v7694_v46  ;;  %v7698_v46 = vunpack.i.l.bf16 %v9318_v47  ;;  %v1133_v11 = vld [vmem:[#allocation2 + $0x138] sm:$0xff] }
 0x21a   : > { %v7729_v41 = vunpack.i.h.bf16 %v7727_v23  ;;  %v7728_v6 = vunpack.i.l.bf16 %v7727_v23  ;;  %v2395_v45 = vpack.c.bf16 %v2351_v28, %v2350_v54  ;;  %v7703_v23 = vunpack.i.l.bf16 %v9342_v24 }
 0x21c   : > { %2690 = vmatprep.mubr.bf16.mxu1 %v2395_v45  ;;  %v9384_v57 = vpop.permute.xlu0 %7751  ;;  %v2254_v53 = vsel %vm2229_vm4, %v2221_v59, %v7728_v6  ;;  %v2255_v60 = vsel %vm2229_vm4, %v2222_v33, %v7729_v41  ;;  %v2288_v41 = vsel %vm675_vm0, %v8163_v16, %v7698_v46  ;;  %v8164_v6 = vld [vmem:[#allocation2 + $0x159] sm:$0xff]  ;;  %v7708_v46 = vunpack.i.l.bf16 %v9354_v25 }
 0x21d   : > { %v7732_v58 = vpop.permute.xlu1 %7731  ;;  %v2394_v26 = vpack.c.bf16 %v2255_v60, %v2254_v53  ;;  %v2289_v45 = vsel %vm675_vm0, %v8164_v6, %v7699_v21 }
 0x21e   : > { %v7734_v43 = vunpack.i.h.bf16 %v7732_v58  ;;  %v7733_v7 = vunpack.i.l.bf16 %v7732_v58 }
 0x21f   : > { %2691 = vmatmul.mubr.bf16.gmra.mrb[48].mxu1 %v2394_v26 }
 0x220   : > { %v7757_v52 = vpop.permute.xlu0 %7756  ;;  %v2190_v1 = vsel %vm675_vm0, %v1133_v11, %v7733_v7  ;;  %v2191_v61 = vsel %vm675_vm0, %v1134_v39, %v7734_v43 }
 0x221   : > { %v7737_v17 = vpop.permute.xlu1 %7736  ;;  %v7759_v27 = vunpack.i.h.bf16 %v7757_v52  ;;  %v7758_v55 = vunpack.i.l.bf16 %v7757_v52  ;;  %v7709_v52 = vunpack.i.h.bf16 %v9354_v25  ;;  %v7753_v25 = vunpack.i.l.bf16 %v9384_v57 }
 0x222   : > { %v7739_v35 = vunpack.i.h.bf16 %v7737_v17  ;;  %v7738_v22 = vunpack.i.l.bf16 %v7737_v17 }
 0x223   : > { %v2321_v60 = vsel %vm2196_vm3, %v2289_v45, %v7759_v27  ;;  %v2320_v58 = vsel %vm2196_vm3, %v2288_v41, %v7758_v55 }
 0x224   : > { %v2223_v54 = vsel %vm2196_vm3, %v2190_v1, %v7738_v22  ;;  %v2224_v28 = vsel %vm2196_vm3, %v2191_v61, %v7739_v35  ;;  %v7762_v47 = vpop.permute.xlu0 %7761  ;;  %v7749_v1 = vunpack.i.h.bf16 %v9370_v3  ;;  %v7748_v61 = vunpack.i.l.bf16 %v9370_v3 }
 0x225   : > { %v7742_v59 = vpop.permute.xlu1 %7741  ;;  %v7764_v33 = vunpack.i.h.bf16 %v7762_v47  ;;  %v7763_v53 = vunpack.i.l.bf16 %v7762_v47  ;;  %v2256_v24 = vsel %vm2229_vm4, %v2223_v54, %v7703_v23  ;;  %v2257_v26 = vsel %vm2229_vm4, %v2224_v28, %v7704_v19  ;;  %v1135_v54 = vld [vmem:[#allocation2 + $0x150] sm:$0xff]  ;;  %v1136_v28 = vld [vmem:[#allocation2 + $0x158] sm:$0xff] }
 0x226   : > { %v7744_v21 = vunpack.i.h.bf16 %v7742_v59  ;;  %v7743_v39 = vunpack.i.l.bf16 %v7742_v59  ;;  %v2397_v55 = vpack.c.bf16 %v2257_v26, %v2256_v24  ;;  %v7754_v47 = vunpack.i.h.bf16 %v9384_v57 }
 0x227   : > { %v2352_v43 = vsel %vm2229_vm4, %v2320_v58, %v7763_v53  ;;  %v2353_v7 = vsel %vm2229_vm4, %v2321_v60, %v7764_v33  ;;  %v2192_v6 = vsel %vm675_vm0, %v1135_v54, %v7708_v46  ;;  %v2193_v3 = vsel %vm675_vm0, %v1136_v28, %v7709_v52  ;;  %v8167_v54 = vld [vmem:[#allocation2 + $0x168] sm:$0xff] }
 0x228   : > { %v7767_v17 = vpop.permute.xlu0 %7766  ;;  %v2398_v11 = vpack.c.bf16 %v2353_v7, %v2352_v43  ;;  %v2226_v53 = vsel %vm2196_vm3, %v2193_v3, %v7744_v21  ;;  %v2225_v57 = vsel %vm2196_vm3, %v2192_v6, %v7743_v39 }
 0x229   : > { %v7769_v35 = vunpack.i.h.bf16 %v7767_v17  ;;  %v7768_v22 = vunpack.i.l.bf16 %v7767_v17  ;;  %v7787_v27 = vpop.permute.xlu1 %7786 }
 0x22a   : > { %v7789_v19 = vunpack.i.h.bf16 %v7787_v27  ;;  %v7788_v23 = vunpack.i.l.bf16 %v7787_v27  ;;  %2698 = vmatprep.mubr.bf16.mxu1 %v2398_v11 }
 0x22b   : > { %v2290_v16 = vsel %vm675_vm0, %v9065_v42, %v7768_v22  ;;  %v2291_v41 = vsel %vm675_vm0, %v9067_v9, %v7769_v35  ;;  %2699 = vmatmul.mubr.bf16.gmra.mrb[52].mxu1 %v2397_v55  ;;  %v8165_v55 = vld [vmem:[#allocation2 + $0x189] sm:$0xff] }
 0x22c   : > { %v7772_v45 = vpop.permute.xlu0 %7771  ;;  %v2322_v59 = vsel %vm2196_vm3, %v2290_v16, %v7748_v61  ;;  %v2323_v33 = vsel %vm2196_vm3, %v2291_v41, %v7749_v1  ;;  %v2258_v24 = vsel %vm2229_vm4, %v2225_v57, %v7788_v23  ;;  %v2259_v26 = vsel %vm2229_vm4, %v2226_v53, %v7789_v19  ;;  %v8166_v61 = vld [vmem:[#allocation2 + $0x181] sm:$0xff] }
 0x22d   : > { %v7792_v60 = vpop.permute.xlu1 %7791  ;;  %v2354_v42 = vsel %vm2229_vm4, %v2322_v59, %v7753_v25  ;;  %v2355_v58 = vsel %vm2229_vm4, %v2323_v33, %v7754_v47  ;;  %v7774_v43 = vunpack.i.h.bf16 %v7772_v45  ;;  %v7773_v7 = vunpack.i.l.bf16 %v7772_v45  ;;  %v8168_v47 = vld [vmem:[#allocation2 + $0x170] sm:$0xff] }
 0x22e   : > { %v2401_v9 = vpack.c.bf16 %v2355_v58, %v2354_v42  ;;  %v7794_v46 = vunpack.i.h.bf16 %v7792_v60  ;;  %v7793_v17 = vunpack.i.l.bf16 %v7792_v60  ;;  %v2400_v21 = vpack.c.bf16 %v2259_v26, %v2258_v24 }
 0x22f   : > { %v2293_v1 = vsel %vm675_vm0, %v8165_v55, %v7774_v43  ;;  %v2292_v23 = vsel %vm675_vm0, %v8166_v61, %v7773_v7  ;;  %v9447_v55 = vld [vmem:[%s10849_s6] ss:$0 sm:$0xff] }
 0x230   : > { %v7777_v52 = vpop.permute.xlu0 %7776  ;;  %2706 = vmatprep.mubr.bf16.mxu1 %v2401_v9  ;;  %v2194_v28 = vsel %vm675_vm0, %v8167_v54, %v7793_v17  ;;  %v2195_v25 = vsel %vm675_vm0, %v8168_v47, %v7794_v46  ;;  %v3060_v54 = vlaneseq }
 0x231   : > { %v7797_v11 = vpop.permute.xlu1 %7796  ;;  %v7779_v35 = vunpack.i.h.bf16 %v7777_v52  ;;  %v7778_v39 = vunpack.i.l.bf16 %v7777_v52 }
 0x232   : > { %v7799_v22 = vunpack.i.h.bf16 %v7797_v11  ;;  %v7798_v27 = vunpack.i.l.bf16 %v7797_v11 }
 0x233   : > { %2707 = vmatmul.mubr.bf16.gmra.mrb[56].mxu1 %v2400_v21  ;;  %v2324_v3 = vsel %vm2196_vm3, %v2292_v23, %v7778_v39  ;;  %v2325_v45 = vsel %vm2196_vm3, %v2293_v1, %v7779_v35  ;;  %v9441_v39 = vld [vmem:[%s10848_s5] ss:$0 sm:$0xff] }
 0x234   : > { %v7782_v19 = vpop.permute.xlu0 %7781  ;;  %v2227_v53 = vsel %vm2196_vm3, %v2194_v28, %v7798_v27  ;;  %v2228_v57 = vsel %vm2196_vm3, %v2195_v25, %v7799_v22 }
 0x235   : > { %v7784_v16 = vunpack.i.h.bf16 %v7782_v19  ;;  %v7783_v41 = vunpack.i.l.bf16 %v7782_v19  ;;  %v7802_v6 = vpop.permute.xlu1 %7801  ;;  %v8239_v19 = vmov 1983009808  }
 0x236   : > { %v7804_v59 = vunpack.i.h.bf16 %v7802_v6  ;;  %v7803_v33 = vunpack.i.l.bf16 %v7802_v6 }
 0x237   : > { %v2356_v60 = vsel %vm2229_vm4, %v2324_v3, %v7783_v41  ;;  %v2357_v42 = vsel %vm2229_vm4, %v2325_v45, %v7784_v16 }
 0x238   : > { %v2404_v58 = vpack.c.bf16 %v2357_v42, %v2356_v60  ;;  %v2260_v9 = vsel %vm2229_vm4, %v2227_v53, %v7803_v33  ;;  %v2261_v24 = vsel %vm2229_vm4, %v2228_v57, %v7804_v59  ;;  %v3061_v59 = vshrl.u32 %v3060_v54, 7 }
 0x239   : > { %v2403_v26 = vpack.c.bf16 %v2261_v24, %v2260_v9 }
 0x23a   : > { %2714 = vmatprep.mubr.bf16.mxu1 %v2404_v58 }
 0x23b   : > { %2715 = vmatmul.mubr.bf16.gmra.mrb[60].mxu1 %v2403_v26 }
 0x266   : > { %v6827_v43 = vpop.f32.mrb[0].mxu1 }
 0x267   : > { %v6828_v7 = vpop.f32.mrb[1].mxu1 }
 0x268   : > { %v6829_v52 = vadd.f32 %v6828_v7, %v6827_v43  ;;  %v6830_v46 = vpop.f32.mrb[2].mxu1 }
 0x269   : > { %v6831_v17 = vpop.f32.mrb[3].mxu1 }
 0x26a   : > { %v2758_v11 = vadd.f32 %v6829_v52, %v9218_v50  ;;  %v6832_v21 = vadd.f32 %v6831_v17, %v6830_v46 }
 0x26c   : > { %v2761_v35 = vadd.f32 %v6832_v21, %v9228_v14  ;;  %v2890_v22 = vmul.f32 %v9441_v39, %v2758_v11  ;;  %v3058_v14 = vunpack.c.l.s4 %v8239_v19 }
 0x26e   : > { %v2891_v61 = vmul.f32 %v9441_v39, %v2761_v35  ;;  %v2928_v47 = vadd.f32 %v9447_v55, %v2890_v22  ;;  %v3059_v45 = vunpack.c.0.s8 %v3058_v14 }
 0x270   : > { %v2929_v41 = vadd.f32 %v9447_v55, %v2891_v61  ;;  %v2960_v33 = vmax.f32 %v2928_v47, 0.0  ;;  %v9458_v9 = vsub.s32 %v3059_v45, %v3061_v59 }
 0x272   : > { %v6833_v27 = vpop.f32.mrb[4].mxu1  ;;  %v2961_v60 = vmax.f32 %v2929_v41, 0.0 }
 0x273   : > { %v6834_v1 = vpop.f32.mrb[5].mxu1 }
 0x274   : > { %v6835_v50 = vadd.f32 %v6834_v1, %v6833_v27  ;;  %v6836_v23 = vpop.f32.mrb[6].mxu1  ;;  %v2995_v52 = vsel %vm675_vm0, %v2961_v60, -inf }
 0x275   : > { %v6837_v28 = vpop.f32.mrb[7].mxu1 }
 0x276   : > { %v2766_v25 = vadd.f32 %v9212_v34, %v6835_v50  ;;  %v6838_v16 = vadd.f32 %v6837_v28, %v6836_v23  ;;  %v2992_v34 = vsel %vm675_vm0, %v2960_v33, -inf }
 0x278   : > { %v2892_v6 = vmul.f32 %v9441_v39, %v2766_v25  ;;  %v2769_v3 = vadd.f32 %v9222_v40, %v6838_v16 }
 0x27a   : > { %v2930_v53 = vadd.f32 %v9447_v55, %v2892_v6  ;;  %v2893_v57 = vmul.f32 %v9441_v39, %v2769_v3 }
 0x27c   : > { %v2962_v42 = vmax.f32 %v2930_v53, 0.0  ;;  %v2931_v58 = vadd.f32 %v9447_v55, %v2893_v57 }
 0x27e   : > { %v2993_v24 = vsel %vm675_vm0, %v2962_v42, -inf  ;;  %v2963_v26 = vmax.f32 %v2931_v58, 0.0  ;;  %v6839_v43 = vpop.f32.mrb[8].mxu1 }
 0x27f   : > { %v2994_v40 = vmax.f32 %v2992_v34, %v2993_v24  ;;  %v6840_v7 = vpop.f32.mrb[9].mxu1 }
 0x280   : > { %v2996_v46 = vsel %vm675_vm0, %v2963_v26, -inf  ;;  %v6841_v17 = vadd.f32 %v6840_v7, %v6839_v43  ;;  %v6842_v11 = vpop.f32.mrb[10].mxu1 }
 0x281   : > { %v3056_v21 = vcombine.high %v2994_v40, %v2994_v40  ;;  %v3063_v35 = vrot.slane %v2994_v40, %v9458_v9  ;;  %v2997_v22 = vmax.f32 %v2995_v52, %v2996_v46  ;;  %v6843_v27 = vpop.f32.mrb[11].mxu1 }
 0x282   : > { %v9466_v1 = vadd.f32 %v6841_v17, %v9244_v63  ;;  %v6844_v61 = vadd.f32 %v6843_v27, %v6842_v11 }
 0x283   : > { %v3070_v50 = vrot.slane %v3056_v21, %v9458_v9  ;;  %v3071_v23 = vcombine.high %v3063_v35, %v3063_v35  ;;  %v3392_v19 = vsel %vm997_vm1, %v3063_v35, -inf  ;;  %v3073_v14 = vcombine.high %v2997_v22, %v2997_v22 }
 0x284   : > { %v3393_v54 = vrot.slane %v3392_v19, 4  ;;  %v3080_v28 = vrot.slane %v2997_v22, %v9458_v9  ;;  %v9472_v47 = vadd.f32 %v6844_v61, %v9252_v37 }
 0x285   : > { %v3072_v25 = vcombine.high %v3070_v50, %v3070_v50  ;;  %v3399_v16 = vsel %vm997_vm1, %v3071_v23, -inf  ;;  %v3406_v41 = vsel %vm997_vm1, %v3070_v50, -inf  ;;  %v3087_v63 = vrot.slane %v3073_v14, %v9458_v9 }
 0x286   : > { %v3394_v6 = vmax.f32 %v3392_v19, %v3393_v54  ;;  %v3400_v3 = vrot.slane %v3399_v16, 4  ;;  %v3407_v45 = vrot.slane %v3406_v41, 4  ;;  %v3088_v59 = vcombine.high %v3080_v28, %v3080_v28 }
 0x287   : > { %v3413_v33 = vsel %vm997_vm1, %v3072_v25, -inf  ;;  %v3089_v53 = vcombine.high %v3087_v63, %v3087_v63  ;;  %v3420_v57 = vsel %vm997_vm1, %v3080_v28, -inf  ;;  %v3434_v37 = vsel %vm997_vm1, %v3087_v63, -inf }
 0x288   : > { %v3395_v60 = vrot.slane %v3394_v6, 2  ;;  %v3401_v42 = vmax.f32 %v3399_v16, %v3400_v3  ;;  %v3408_v58 = vmax.f32 %v3406_v41, %v3407_v45  ;;  %v3414_v34 = vrot.slane %v3413_v33, 4 }
 0x289   : > { %v3421_v24 = vrot.slane %v3420_v57, 4  ;;  %v3427_v26 = vsel %vm997_vm1, %v3088_v59, -inf  ;;  %v3435_v43 = vrot.slane %v3434_v37, 4  ;;  %v3441_v40 = vsel %vm997_vm1, %v3089_v53, -inf }
 0x28a   : > { %v3396_v7 = vmax.f32 %v3394_v6, %v3395_v60  ;;  %v3402_v52 = vrot.slane %v3401_v42, 2  ;;  %v3409_v46 = vrot.slane %v3408_v58, 2  ;;  %v3415_v17 = vmax.f32 %v3413_v33, %v3414_v34  ;;  %v6845_v11 = vpop.f32.mrb[12].mxu1 }
 0x28b   : > { %v3422_v21 = vmax.f32 %v3420_v57, %v3421_v24  ;;  %v3428_v35 = vrot.slane %v3427_v26, 4  ;;  %v3436_v22 = vmax.f32 %v3434_v37, %v3435_v43  ;;  %v3442_v27 = vrot.slane %v3441_v40, 4  ;;  %v6846_v61 = vpop.f32.mrb[13].mxu1 }
 0x28c   : > { %v3397_v50 = vrot.slane %v3396_v7, 1  ;;  %v3403_v23 = vmax.f32 %v3401_v42, %v3402_v52  ;;  %v3410_v19 = vmax.f32 %v3408_v58, %v3409_v46  ;;  %v3416_v14 = vrot.slane %v3415_v17, 2  ;;  %v6848_v54 = vpop.f32.mrb[14].mxu1 }
 0x28d   : > { %v3423_v28 = vrot.slane %v3422_v21, 2  ;;  %v3429_v25 = vmax.f32 %v3427_v26, %v3428_v35  ;;  %v3437_v16 = vrot.slane %v3436_v22, 2  ;;  %v3443_v41 = vmax.f32 %v3441_v40, %v3442_v27  ;;  %v6849_v63 = vpop.f32.mrb[15].mxu1 }
 0x28e   : > { %v3404_v6 = vrot.slane %v3403_v23, 1  ;;  %v3411_v3 = vrot.slane %v3410_v19, 1  ;;  %v3417_v45 = vmax.f32 %v3415_v17, %v3416_v14  ;;  %v3398_v37 = vmax.f32 %v3396_v7, %v3397_v50 }
 0x28f   : > { %v3424_v59 = vmax.f32 %v3422_v21, %v3423_v28  ;;  %v3430_v33 = vrot.slane %v3429_v25, 2  ;;  %v3438_v53 = vmax.f32 %v3436_v22, %v3437_v16  ;;  %v3444_v57 = vrot.slane %v3443_v41, 2 }
 0x290   : > { %v3405_v60 = vmax.f32 %v3403_v23, %v3404_v6  ;;  %v3412_v34 = vmax.f32 %v3410_v19, %v3411_v3  ;;  %v3418_v42 = vrot.slane %v3417_v45, 1  ;;  %v2894_v26 = vmul.f32 %v9441_v39, %v9466_v1 }
 0x291   : > { %v3425_v58 = vrot.slane %v3424_v59, 1  ;;  %v3431_v24 = vmax.f32 %v3429_v25, %v3430_v33  ;;  %v3445_v43 = vmax.f32 %v3443_v41, %v3444_v57  ;;  %v3439_v46 = vrot.slane %v3438_v53, 1 }
 0x292   : > { %v3419_v40 = vmax.f32 %v3417_v45, %v3418_v42  ;;  %v3927_v52 = vsel %vm3926_vm5, %v3405_v60, %v3398_v37  ;;  %v2895_v17 = vmul.f32 %v9441_v39, %v9472_v47  ;;  %v6847_v1 = vadd.f32 %v6846_v61, %v6845_v11 }
 0x293   : > { %v3929_v21 = vsel %vm3928_vm6, %v3412_v34, %v3927_v52  ;;  %v3426_v35 = vmax.f32 %v3424_v59, %v3425_v58  ;;  %v3432_v7 = vrot.slane %v3431_v24, 1  ;;  %v3446_v22 = vrot.slane %v3445_v43, 1  ;;  %v8041_v58 = vld [vmem:[%s10850_s7 + $0x80] sm:$0xff]  }
 0x294   : > { %v3931_v27 = vsel %vm3930_vm7, %v3419_v40, %v3929_v21  ;;  %v6850_v19 = vadd.f32 %v6849_v63, %v6848_v54  ;;  %v3440_v14 = vmax.f32 %v3438_v53, %v3439_v46  ;;  %v2932_v28 = vadd.f32 %v9447_v55, %v2894_v26  ;;  %7240 = vmatprep.subr.bf16.mxu1 %v8041_v58  ;;  %v4051_v21 = vld [vmem:[#allocation3 + $0x1] sm:$0xff] }
 0x295   : > { %v3433_v50 = vmax.f32 %v3431_v24, %v3432_v7  ;;  %v3933_v23 = vsel %vm3932_vm8, %v3426_v35, %v3931_v27  ;;  %v2933_v47 = vadd.f32 %v9447_v55, %v2895_v17  ;;  %v3447_v16 = vmax.f32 %v3445_v43, %v3446_v22  ;;  %7241 = vmatpush3.bf16.msra.mxu1 %v8041_v58  ;;  %v8042_v35 = vld [vmem:[%s10850_s7 + $0x88] sm:$0xff]  }
 0x296   : > { %v6851_v25 = vpop.f32.mrb[16].mxu1  ;;  %v2782_v6 = vadd.f32 %v9240_v10, %v6847_v1  ;;  %v2785_v3 = vadd.f32 %v9250_v49, %v6850_v19  ;;  %v2964_v57 = vmax.f32 %v2932_v28, 0.0  ;;  %v4059_v19 = vld [vmem:[#allocation3 + $0x2] sm:$0xff]  ;;  %7242 = vmatprep.subr.bf16.mxu1 %v8042_v35 }
 0x297   : > { %v3935_v41 = vsel %vm3934_vm9, %v3433_v50, %v3933_v23  ;;  %v6852_v45 = vpop.f32.mrb[17].mxu1  ;;  %v2965_v60 = vmax.f32 %v2933_v47, 0.0 }
 0x298   : > { %v3937_v59 = vsel %vm3936_vm10, %v3440_v14, %v3935_v41  ;;  %v6853_v33 = vadd.f32 %v6852_v45, %v6851_v25  ;;  %v6854_v11 = vpop.f32.mrb[18].mxu1  ;;  %v2896_v54 = vmul.f32 %v9441_v39, %v2782_v6  ;;  %v2897_v63 = vmul.f32 %v9441_v39, %v2785_v3 }
 0x299   : > { %v3939_v61 = vsel %vm3938_vm11, %v3447_v16, %v3937_v59  ;;  %v6855_v53 = vpop.f32.mrb[19].mxu1  ;;  %v2998_v26 = vsel %vm675_vm0, %v2964_v57, -inf  ;;  %v3001_v40 = vsel %vm675_vm0, %v2965_v60, -inf  ;;  %7243 = vmatpush3.bf16.msra.mxu1 %v8042_v35 }
 0x29a   : > { %3997 = vst.msk [vmem:[#allocation3 + $0x11] sm:$0xff] %vm675_vm0, %v3939_v61  ;;  %v2790_v37 = vadd.f32 %v6853_v33, %v9260_v44  ;;  %v6856_v10 = vadd.f32 %v6855_v53, %v6854_v11  ;;  %v2934_v49 = vadd.f32 %v9447_v55, %v2896_v54  ;;  %v2935_v34 = vadd.f32 %v9447_v55, %v2897_v63 }
 0x29c   : > { %v2793_v42 = vadd.f32 %v6856_v10, %v9272_v4  ;;  %v2966_v24 = vmax.f32 %v2934_v49, 0.0  ;;  %v2967_v43 = vmax.f32 %v2935_v34, 0.0  ;;  %v2898_v46 = vmul.f32 %v9441_v39, %v2790_v37 }
 0x29e   : > { %v2999_v44 = vsel %vm675_vm0, %v2966_v24, -inf  ;;  %v3002_v52 = vsel %vm675_vm0, %v2967_v43, -inf  ;;  %v9522_v28 = vadd.f32 %v9447_v55, %v2898_v46  ;;  %v9525_v47 = vmul.f32 %v9441_v39, %v2793_v42 }
 0x29f   : > { %v3000_v17 = vmax.f32 %v2998_v26, %v2999_v44  ;;  %v3003_v4 = vmax.f32 %v3001_v40, %v3002_v52 }
 0x2a1   : > { %v4052_v7 = vld [vmem:[#allocation3 + $0x11] sm:$0xff]  ;;  %v3090_v22 = vcombine.high %v3000_v17, %v3000_v17  ;;  %v3097_v27 = vrot.slane %v3000_v17, %v9458_v9  ;;  %v3107_v50 = vcombine.high %v3003_v4, %v3003_v4  ;;  %v3114_v23 = vrot.slane %v3003_v4, %v9458_v9 }
 0x2a2   : > { %v9517_v1 = vpop.f32.mrb[20].mxu1  ;;  %v9519_v14 = vld [vmem:[#allocation3 + $0x12] sm:$0xff]  ;;  %v7805_v16 = vpack.i.bf16 %v4052_v7, %v4051_v21 }
 0x2a3   : > { %v9527_v25 = vpop.f32.mrb[21].mxu1  ;;  %v3104_v41 = vrot.slane %v3090_v22, %v9458_v9  ;;  %v3105_v6 = vcombine.high %v3097_v27, %v3097_v27  ;;  %v3448_v3 = vsel %vm997_vm1, %v3097_v27, -inf  ;;  %v3121_v45 = vrot.slane %v3107_v50, %v9458_v9 }
 0x2a4   : > { %v9532_v59 = vpop.f32.mrb[22].mxu1  ;;  %v3449_v33 = vrot.slane %v3448_v3, 4  ;;  %v3122_v11 = vcombine.high %v3114_v23, %v3114_v23  ;;  %v3476_v61 = vsel %vm997_vm1, %v3114_v23, -inf  ;;  %7806 = vrot.lane.b32.xlu1 %v7805_v16, %s10889_s24  ;;  %v7810_v63 = vpack.i.bf16 %v9519_v14, %v4059_v19  ;;  %v9546_v23 = vpop.f32.mrb[60].mxu0 }
 0x2a5   : > { %v9536_v54 = vpop.f32.mrb[23].mxu1  ;;  %v3106_v53 = vcombine.high %v3104_v41, %v3104_v41  ;;  %v3455_v57 = vsel %vm997_vm1, %v3105_v6, -inf  ;;  %v3462_v37 = vsel %vm997_vm1, %v3104_v41, -inf  ;;  %v3123_v10 = vcombine.high %v3121_v45, %v3121_v45 }
 0x2a6   : > { %v3450_v60 = vmax.f32 %v3448_v3, %v3449_v33  ;;  %v3456_v49 = vrot.slane %v3455_v57, 4  ;;  %v3463_v34 = vrot.slane %v3462_v37, 4  ;;  %v3477_v42 = vrot.slane %v3476_v61, 4  ;;  %v9548_v3 = vpop.f32.mrb[61].mxu0 }
 0x2a7   : > { %v3469_v58 = vsel %vm997_vm1, %v3106_v53, -inf  ;;  %v3483_v24 = vsel %vm997_vm1, %v3122_v11, -inf  ;;  %v3490_v43 = vsel %vm997_vm1, %v3121_v45, -inf  ;;  %v3497_v26 = vsel %vm997_vm1, %v3123_v10, -inf }
 0x2a8   : > { %v3451_v40 = vrot.slane %v3450_v60, 2  ;;  %v3457_v44 = vmax.f32 %v3455_v57, %v3456_v49  ;;  %v3464_v52 = vmax.f32 %v3462_v37, %v3463_v34  ;;  %v3470_v46 = vrot.slane %v3469_v58, 4  ;;  %7811 = vrot.lane.b32.xlu1 %v7810_v63, %s10888_s29 }
 0x2a9   : > { %v3478_v17 = vmax.f32 %v3476_v61, %v3477_v42  ;;  %v3484_v4 = vrot.slane %v3483_v24, 4  ;;  %v3491_v21 = vrot.slane %v3490_v43, 4  ;;  %v3498_v35 = vrot.slane %v3497_v26, 4  ;;  %v9550_v61 = vpop.f32.mrb[62].mxu0 }
 0x2aa   : > { %v3452_v7 = vmax.f32 %v3450_v60, %v3451_v40  ;;  %v3458_v22 = vrot.slane %v3457_v44, 2  ;;  %v3465_v27 = vrot.slane %v3464_v52, 2  ;;  %v3471_v50 = vmax.f32 %v3469_v58, %v3470_v46  ;;  %v9552_v49 = vpop.f32.mrb[63].mxu0 }
 0x2ab   : > { %v3479_v19 = vrot.slane %v3478_v17, 2  ;;  %v3485_v16 = vmax.f32 %v3483_v24, %v3484_v4  ;;  %v3492_v41 = vmax.f32 %v3490_v43, %v3491_v21  ;;  %v3499_v6 = vmax.f32 %v3497_v26, %v3498_v35 }
 0x2ac   : > { %v3453_v45 = vrot.slane %v3452_v7, 1  ;;  %v3459_v33 = vmax.f32 %v3457_v44, %v3458_v22  ;;  %v3466_v11 = vmax.f32 %v3464_v52, %v3465_v27  ;;  %v3472_v63 = vrot.slane %v3471_v50, 2 }
 0x2ad   : > { %v3480_v53 = vmax.f32 %v3478_v17, %v3479_v19  ;;  %v3486_v57 = vrot.slane %v3485_v16, 2  ;;  %v3493_v37 = vrot.slane %v3492_v41, 2  ;;  %v3500_v10 = vrot.slane %v3499_v6, 2 }
 0x2ae   : > { %v6863_v60 = vpop.f32.mrb[24].mxu1  ;;  %v3454_v34 = vmax.f32 %v3452_v7, %v3453_v45  ;;  %v3460_v42 = vrot.slane %v3459_v33, 1  ;;  %v3467_v58 = vrot.slane %v3466_v11, 1  ;;  %v3473_v24 = vmax.f32 %v3471_v50, %v3472_v63 }
 0x2af   : > { %v6864_v43 = vpop.f32.mrb[25].mxu1  ;;  %v3481_v26 = vrot.slane %v3480_v53, 1  ;;  %v3487_v40 = vmax.f32 %v3485_v16, %v3486_v57  ;;  %v3494_v46 = vmax.f32 %v3492_v41, %v3493_v37  ;;  %v3501_v44 = vmax.f32 %v3499_v6, %v3500_v10 }
 0x2b0   : > { %v6866_v52 = vpop.f32.mrb[26].mxu1  ;;  %v3461_v4 = vmax.f32 %v3459_v33, %v3460_v42  ;;  %v3468_v21 = vmax.f32 %v3466_v11, %v3467_v58  ;;  %v3474_v35 = vrot.slane %v3473_v24, 1  ;;  %v6859_v17 = vadd.f32 %v9527_v25, %v9517_v1 }
 0x2b1   : > { %v6867_v22 = vpop.f32.mrb[27].mxu1  ;;  %v3488_v27 = vrot.slane %v3487_v40, 1  ;;  %v3495_v19 = vrot.slane %v3494_v46, 1  ;;  %v3502_v18 = vrot.slane %v3501_v44, 1  ;;  %v2968_v7 = vmax.f32 %v9522_v28, 0.0 }
 0x2b2   : > { %v3475_v45 = vmax.f32 %v3473_v24, %v3474_v35  ;;  %v3940_v50 = vsel %vm3926_vm5, %v3461_v4, %v3454_v34  ;;  %v2798_v16 = vadd.f32 %v9256_v8, %v6859_v17  ;;  %v6862_v41 = vadd.f32 %v9536_v54, %v9532_v59 }
 0x2b3   : > { %v3941_v6 = vsel %vm3928_vm6, %v3468_v21, %v3940_v50  ;;  %v3482_v33 = vmax.f32 %v3480_v53, %v3481_v26  ;;  %v3489_v11 = vmax.f32 %v3487_v40, %v3488_v27  ;;  %v2937_v1 = vadd.f32 %v9447_v55, %v9525_v47 }
 0x2b4   : > { %v3942_v25 = vsel %vm3930_vm7, %v3475_v45, %v3941_v6  ;;  %v2900_v63 = vmul.f32 %v9441_v39, %v2798_v16  ;;  %v2801_v28 = vadd.f32 %v9266_v12, %v6862_v41  ;;  %v6865_v57 = vadd.f32 %v6864_v43, %v6863_v60 }
 0x2b5   : > { %v3496_v37 = vmax.f32 %v3494_v46, %v3495_v19  ;;  %v3503_v10 = vmax.f32 %v3501_v44, %v3502_v18  ;;  %v3943_v8 = vsel %vm3932_vm8, %v3482_v33, %v3942_v25  ;;  %v6868_v34 = vadd.f32 %v6867_v22, %v6866_v52 }
 0x2b6   : > { %v3944_v59 = vsel %vm3934_vm9, %v3489_v11, %v3943_v8  ;;  %v2938_v54 = vadd.f32 %v9447_v55, %v2900_v63  ;;  %v2901_v53 = vmul.f32 %v9441_v39, %v2801_v28  ;;  %v2806_v47 = vadd.f32 %v6865_v57, %v9290_v20 }
 0x2b7   : > { %v3945_v42 = vsel %vm3936_vm10, %v3496_v37, %v3944_v59  ;;  %v2969_v58 = vmax.f32 %v2937_v1, 0.0  ;;  %v2809_v24 = vadd.f32 %v6868_v34, %v9302_v29  ;;  %v3004_v46 = vsel %vm675_vm0, %v2968_v7, -inf }
 0x2b8   : > { %v3946_v12 = vsel %vm3938_vm11, %v3503_v10, %v3945_v42  ;;  %v2970_v60 = vmax.f32 %v2938_v54, 0.0  ;;  %v2939_v18 = vadd.f32 %v9447_v55, %v2901_v53  ;;  %v2902_v43 = vmul.f32 %v9441_v39, %v2806_v47 }
 0x2b9   : > { %3998 = vst.msk [vmem:[#allocation3 + $0x21] sm:$0xff] %vm675_vm0, %v3946_v12  ;;  %v2903_v26 = vmul.f32 %v9441_v39, %v2809_v24  ;;  %v3007_v17 = vsel %vm675_vm0, %v2969_v58, -inf }
 0x2ba   : > { %v6869_v40 = vpop.f32.mrb[28].mxu1  ;;  %v3005_v20 = vsel %vm675_vm0, %v2970_v60, -inf  ;;  %v2971_v44 = vmax.f32 %v2939_v18, 0.0  ;;  %v9582_v52 = vadd.f32 %v9447_v55, %v2902_v43 }
 0x2bb   : > { %v6870_v29 = vpop.f32.mrb[29].mxu1  ;;  %v3006_v4 = vmax.f32 %v3004_v46, %v3005_v20  ;;  %v9587_v27 = vadd.f32 %v9447_v55, %v2903_v26 }
 0x2bc   : > { %v6871_v21 = vadd.f32 %v6870_v29, %v6869_v40  ;;  %v6872_v35 = vpop.f32.mrb[30].mxu1  ;;  %v3008_v22 = vsel %vm675_vm0, %v2971_v44, -inf  ;;  %v2972_v16 = vmax.f32 %v9582_v52, 0.0 }
 0x2bd   : > { %v6873_v19 = vpop.f32.mrb[31].mxu1  ;;  %v3124_v45 = vcombine.high %v3006_v4, %v3006_v4  ;;  %v3131_v7 = vrot.slane %v3006_v4, %v9458_v9  ;;  %v3009_v50 = vmax.f32 %v3007_v17, %v3008_v22  ;;  %v2973_v57 = vmax.f32 %v9587_v27, 0.0  ;;  %v8049_v27 = vld [vmem:[%s10850_s7 + $0x58] sm:$0xff]  }
 0x2be   : > { %v2814_v41 = vadd.f32 %v9284_v13, %v6871_v21  ;;  %v9592_v6 = vadd.f32 %v6873_v19, %v6872_v35 }
 0x2bf   : > { %v3138_v33 = vrot.slane %v3124_v45, %v9458_v9  ;;  %v3139_v11 = vcombine.high %v3131_v7, %v3131_v7  ;;  %v3504_v1 = vsel %vm997_vm1, %v3131_v7, -inf  ;;  %v3141_v25 = vcombine.high %v3009_v50, %v3009_v50 }
 0x2c0   : > { %v3505_v63 = vrot.slane %v3504_v1, 4  ;;  %v3148_v28 = vrot.slane %v3009_v50, %v9458_v9  ;;  %v2904_v37 = vmul.f32 %v9441_v39, %v2814_v41 }
 0x2c1   : > { %v3140_v10 = vcombine.high %v3138_v33, %v3138_v33  ;;  %v3511_v8 = vsel %vm997_vm1, %v3139_v11, -inf  ;;  %v3518_v13 = vsel %vm997_vm1, %v3138_v33, -inf  ;;  %v3155_v34 = vrot.slane %v3141_v25, %v9458_v9 }
 0x2c2   : > { %v3506_v59 = vmax.f32 %v3504_v1, %v3505_v63  ;;  %v3512_v54 = vrot.slane %v3511_v8, 4  ;;  %v3519_v53 = vrot.slane %v3518_v13, 4  ;;  %v3156_v47 = vcombine.high %v3148_v28, %v3148_v28 }
 0x2c3   : > { %v3525_v42 = vsel %vm997_vm1, %v3140_v10, -inf  ;;  %v3157_v58 = vcombine.high %v3155_v34, %v3155_v34  ;;  %v3532_v24 = vsel %vm997_vm1, %v3148_v28, -inf  ;;  %v3546_v12 = vsel %vm997_vm1, %v3155_v34, -inf }
 0x2c4   : > { %v3507_v60 = vrot.slane %v3506_v59, 2  ;;  %v3513_v18 = vmax.f32 %v3511_v8, %v3512_v54  ;;  %v3520_v43 = vmax.f32 %v3518_v13, %v3519_v53  ;;  %v3526_v26 = vrot.slane %v3525_v42, 4 }
 0x2c5   : > { %v3533_v40 = vrot.slane %v3532_v24, 4  ;;  %v3539_v46 = vsel %vm997_vm1, %v3156_v47, -inf  ;;  %v3547_v20 = vrot.slane %v3546_v12, 4  ;;  %v3553_v44 = vsel %vm997_vm1, %v3157_v58, -inf }
 0x2c6   : > { %v6875_v29 = vpop.f32.mrb[32].mxu1  ;;  %v3508_v4 = vmax.f32 %v3506_v59, %v3507_v60  ;;  %v3514_v21 = vrot.slane %v3513_v18, 2  ;;  %v3521_v35 = vrot.slane %v3520_v43, 2  ;;  %v3527_v17 = vmax.f32 %v3525_v42, %v3526_v26 }
 0x2c7   : > { %v6876_v22 = vpop.f32.mrb[33].mxu1  ;;  %v3534_v19 = vmax.f32 %v3532_v24, %v3533_v40  ;;  %v3540_v45 = vrot.slane %v3539_v46, 4  ;;  %v3548_v7 = vmax.f32 %v3546_v12, %v3547_v20  ;;  %v3554_v50 = vrot.slane %v3553_v44, 4  ;;  %v9607_v12 = vld [vmem:[#allocation3 + $0x22] sm:$0xff] }
 0x2c8   : > { %v6878_v41 = vpop.f32.mrb[34].mxu1  ;;  %v3509_v33 = vrot.slane %v3508_v4, 1  ;;  %v3515_v11 = vmax.f32 %v3513_v18, %v3514_v21  ;;  %v3522_v1 = vmax.f32 %v3520_v43, %v3521_v35  ;;  %v3528_v25 = vrot.slane %v3527_v17, 2 }
 0x2c9   : > { %v6879_v63 = vpop.f32.mrb[35].mxu1  ;;  %v3535_v28 = vrot.slane %v3534_v19, 2  ;;  %v3541_v10 = vmax.f32 %v3539_v46, %v3540_v45  ;;  %v3549_v8 = vrot.slane %v3548_v7, 2  ;;  %v3555_v13 = vmax.f32 %v3553_v44, %v3554_v50  ;;  %v9610_v44 = vld [vmem:[#allocation3 + $0x20] sm:$0xff] }
 0x2ca   : > { %v3510_v34 = vmax.f32 %v3508_v4, %v3509_v33  ;;  %v3516_v59 = vrot.slane %v3515_v11, 1  ;;  %v3523_v54 = vrot.slane %v3522_v1, 1  ;;  %v3529_v53 = vmax.f32 %v3527_v17, %v3528_v25  ;;  %v4067_v33 = vld [vmem:[#allocation3 + $0x10] sm:$0xff] }
 0x2cb   : > { %v3536_v47 = vmax.f32 %v3534_v19, %v3535_v28  ;;  %v3542_v42 = vrot.slane %v3541_v10, 2  ;;  %v3550_v58 = vmax.f32 %v3548_v7, %v3549_v8  ;;  %v3556_v24 = vrot.slane %v3555_v13, 2 }
 0x2cc   : > { %v3517_v60 = vmax.f32 %v3515_v11, %v3516_v59  ;;  %v3524_v26 = vmax.f32 %v3522_v1, %v3523_v54  ;;  %v3530_v18 = vrot.slane %v3529_v53, 1  ;;  %v2942_v43 = vadd.f32 %v9447_v55, %v2904_v37 }
 0x2cd   : > { %v3537_v40 = vrot.slane %v3536_v47, 1  ;;  %v3543_v20 = vmax.f32 %v3541_v10, %v3542_v42  ;;  %v3551_v46 = vrot.slane %v3550_v58, 1  ;;  %v3557_v21 = vmax.f32 %v3555_v13, %v3556_v24 }
 0x2ce   : > { %v3531_v4 = vmax.f32 %v3529_v53, %v3530_v18  ;;  %v3947_v35 = vsel %vm3926_vm5, %v3517_v60, %v3510_v34  ;;  %v2974_v17 = vmax.f32 %v2942_v43, 0.0  ;;  %v7815_v19 = vpack.i.bf16 %v9607_v12, %v9519_v14 }
 0x2cf   : > { %v3948_v45 = vsel %vm3928_vm6, %v3524_v26, %v3947_v35  ;;  %v3538_v7 = vmax.f32 %v3536_v47, %v3537_v40  ;;  %v3544_v50 = vrot.slane %v3543_v20, 1  ;;  %v3010_v37 = vsel %vm675_vm0, %v2972_v16, -inf }
 0x2d0   : > { %v3558_v11 = vrot.slane %v3557_v21, 1  ;;  %v3949_v1 = vsel %vm3930_vm7, %v3531_v4, %v3948_v45  ;;  %v3011_v25 = vsel %vm675_vm0, %v2974_v17, -inf  ;;  %7816 = vrot.lane.b32.xlu0 %v7815_v19, %s10889_s24  ;;  %v7820_v28 = vpack.i.bf16 %v9610_v44, %v4067_v33  ;;  %v8045_v33 = vld [vmem:[%s10850_s7 + $0x48] sm:$0xff]  }
 0x2d1   : > { %v3545_v10 = vmax.f32 %v3543_v20, %v3544_v50  ;;  %v3950_v14 = vsel %vm3932_vm8, %v3538_v7, %v3949_v1  ;;  %v3012_v8 = vmax.f32 %v3010_v37, %v3011_v25  ;;  %v2817_v13 = vadd.f32 %v9296_v0, %v9592_v6  ;;  %v8047_v1 = vld [vmem:[%s10850_s7 + $0x50] sm:$0xff]  }
 0x2d2   : > { %v6881_v52 = vpop.f32.mrb[36].mxu1  ;;  %v3552_v34 = vmax.f32 %v3550_v58, %v3551_v46  ;;  %v3559_v16 = vmax.f32 %v3557_v21, %v3558_v11  ;;  %7821 = vrot.lane.b32.xlu1 %v7820_v28, %s8238_s20  ;;  %v6877_v59 = vadd.f32 %v6876_v22, %v6875_v29  ;;  %v6880_v54 = vadd.f32 %v6879_v63, %v6878_v41  ;;  %v8043_v29 = vld [vmem:[%s10850_s7 + $0x40] sm:$0xff]   ;;  %v8046_v11 = vld [vmem:[%s10850_s7 + $0x8] sm:$0xff]  }
 0x2d3   : > { %v6882_v53 = vpop.f32.mrb[37].mxu1  ;;  %v3951_v47 = vsel %vm3934_vm9, %v3545_v10, %v3950_v14  ;;  %v3158_v42 = vcombine.high %v3012_v8, %v3012_v8  ;;  %v3165_v24 = vrot.slane %v3012_v8, %v9458_v9  ;;  %v2905_v60 = vmul.f32 %v9441_v39, %v2817_v13  ;;  %6941 = vmatprep.subr.bf16.mxu0 %v8043_v29 }
 0x2d4   : > { %v9630_v26 = vpop.f32.mrb[38].mxu1  ;;  %v3952_v18 = vsel %vm3936_vm10, %v3552_v34, %v3951_v47  ;;  %v2822_v0 = vadd.f32 %v6877_v59, %v9316_v36  ;;  %v2825_v6 = vadd.f32 %v6880_v54, %v9324_v38  ;;  %v6883_v58 = vadd.f32 %v6882_v53, %v6881_v52  ;;  %v8044_v36 = vld [vmem:[%s10850_s7] sm:$0xff]   ;;  %v8048_v53 = vld [vmem:[%s10850_s7 + $0x10] sm:$0xff]  }
 0x2d5   : > { %v9635_v43 = vpop.f32.mrb[39].mxu1  ;;  %v3953_v22 = vsel %vm3938_vm11, %v3559_v16, %v3952_v18  ;;  %v3172_v41 = vrot.slane %v3158_v42, %v9458_v9  ;;  %v3173_v63 = vcombine.high %v3165_v24, %v3165_v24  ;;  %v3560_v40 = vsel %vm997_vm1, %v3165_v24, -inf  ;;  %6942 = vmatpush3.bf16.msra.mxu0 %v8044_v36 }
 0x2d6   : > { %3999 = vst.msk [vmem:[#allocation3 + $0x31] sm:$0xff] %vm675_vm0, %v3953_v22  ;;  %v3561_v38 = vrot.slane %v3560_v40, 4  ;;  %v2943_v20 = vadd.f32 %v9447_v55, %v2905_v60  ;;  %v2906_v46 = vmul.f32 %v9441_v39, %v2822_v0  ;;  %v2907_v21 = vmul.f32 %v9441_v39, %v2825_v6  ;;  %6943 = vmatprep.subr.bf16.mxu0 %v8045_v33 }
 0x2d7   : > { %v3174_v4 = vcombine.high %v3172_v41, %v3172_v41  ;;  %v3567_v35 = vsel %vm997_vm1, %v3173_v63, -inf  ;;  %v3574_v17 = vsel %vm997_vm1, %v3172_v41, -inf  ;;  %v2830_v19 = vadd.f32 %v9312_v15, %v6883_v58 }
 0x2d8   : > { %v3562_v45 = vmax.f32 %v3560_v40, %v3561_v38  ;;  %v3568_v7 = vrot.slane %v3567_v35, 4  ;;  %v3575_v50 = vrot.slane %v3574_v17, 4  ;;  %v2975_v37 = vmax.f32 %v2943_v20, 0.0 }
 0x2d9   : > { %v3581_v25 = vsel %vm997_vm1, %v3174_v4, -inf  ;;  %v2944_v15 = vadd.f32 %v9447_v55, %v2906_v46  ;;  %v9665_v28 = vadd.f32 %v9447_v55, %v2907_v21  ;;  %v2908_v10 = vmul.f32 %v9441_v39, %v2830_v19  ;;  %6944 = vmatpush3.bf16.msra.mxu0 %v8046_v11  ;;  %v8050_v46 = vld [vmem:[%s10850_s7 + $0x18] sm:$0xff]  }
 0x2da   : > { %v3563_v14 = vrot.slane %v3562_v45, 2  ;;  %v3569_v8 = vmax.f32 %v3567_v35, %v3568_v7  ;;  %v3576_v13 = vmax.f32 %v3574_v17, %v3575_v50  ;;  %v3582_v52 = vrot.slane %v3581_v25, 4  ;;  %6945 = vmatprep.subr.bf16.mxu0 %v8047_v1 }
 0x2db   : > { %v3013_v34 = vsel %vm675_vm0, %v2973_v57, -inf  ;;  %v3014_v16 = vsel %vm675_vm0, %v2975_v37, -inf  ;;  %v2976_v59 = vmax.f32 %v2944_v15, 0.0  ;;  %v2946_v54 = vadd.f32 %v9447_v55, %v2908_v10 }
 0x2dc   : > { %v3564_v39 = vmax.f32 %v3562_v45, %v3563_v14  ;;  %v3570_v47 = vrot.slane %v3569_v8, 2  ;;  %v3577_v42 = vrot.slane %v3576_v13, 2  ;;  %v3583_v24 = vmax.f32 %v3581_v25, %v3582_v52  ;;  %v8052_v52 = vld [vmem:[%s10850_s7 + $0x20] sm:$0xff]  }
 0x2dd   : > { %v3015_v57 = vmax.f32 %v3013_v34, %v3014_v16  ;;  %v3016_v60 = vsel %vm675_vm0, %v2976_v59, -inf  ;;  %v2977_v18 = vmax.f32 %v9665_v28, 0.0  ;;  %v2978_v55 = vmax.f32 %v2946_v54, 0.0  ;;  %v9681_v0 = vld [vmem:[#allocation3 + $0x30] sm:$0xff]  ;;  %6946 = vmatpush3.bf16.msra.mxu0 %v8048_v53 }
 0x2de   : > { %v3565_v6 = vrot.slane %v3564_v39, 1  ;;  %v3571_v58 = vmax.f32 %v3569_v8, %v3570_v47  ;;  %v3578_v29 = vmax.f32 %v3576_v13, %v3577_v42  ;;  %v3584_v22 = vrot.slane %v3583_v24, 2  ;;  %v9683_v41 = vpop.f32.mrb[40].mxu1  ;;  %6947 = vmatprep.subr.bf16.mxu0 %v8049_v27  ;;  %v8051_v13 = vld [vmem:[%s10850_s7 + $0x60] sm:$0xff]  }
 0x2df   : > { %v3175_v63 = vcombine.high %v3015_v57, %v3015_v57  ;;  %v3182_v40 = vrot.slane %v3015_v57, %v9458_v9  ;;  %v3017_v36 = vsel %vm675_vm0, %v2978_v55, -inf  ;;  %v7825_v38 = vpack.i.bf16 %v9681_v0, %v9610_v44  ;;  %v9689_v20 = vpop.f32.mrb[41].mxu1  ;;  %v8053_v55 = vld [vmem:[%s10850_s7 + $0x68] sm:$0xff]  }
 0x2e0   : > { %v3566_v21 = vmax.f32 %v3564_v39, %v3565_v6  ;;  %v3572_v4 = vrot.slane %v3571_v58, 1  ;;  %v3579_v35 = vrot.slane %v3578_v29, 1  ;;  %v3585_v17 = vmax.f32 %v3583_v24, %v3584_v22  ;;  %v9694_v19 = vpop.f32.mrb[42].mxu1 }
 0x2e1   : > { %v3189_v45 = vrot.slane %v3175_v63, %v9458_v9  ;;  %v3190_v7 = vcombine.high %v3182_v40, %v3182_v40  ;;  %v3588_v50 = vsel %vm997_vm1, %v3182_v40, -inf  ;;  %v3018_v44 = vmax.f32 %v3016_v60, %v3017_v36  ;;  %7826 = vrot.lane.b32.xlu0 %v7825_v38, %s10888_s29  ;;  %v9699_v37 = vpop.f32.mrb[43].mxu1  ;;  %6948 = vmatpush3.bf16.msra.mxu0 %v8050_v46  ;;  %v8054_v63 = vld [vmem:[%s10850_s7 + $0x28] sm:$0xff]  }
 0x2e2   : > { %v3573_v33 = vmax.f32 %v3571_v58, %v3572_v4  ;;  %v3580_v11 = vmax.f32 %v3578_v29, %v3579_v35  ;;  %v3586_v1 = vrot.slane %v3585_v17, 1  ;;  %v3589_v25 = vrot.slane %v3588_v50, 4  ;;  %6949 = vmatprep.subr.bf16.mxu0 %v8051_v13  ;;  %v8056_v13 = vld [vmem:[%s10850_s7 + $0x30] sm:$0xff]  }
 0x2e3   : > { %v3191_v15 = vcombine.high %v3189_v45, %v3189_v45  ;;  %v3595_v10 = vsel %vm997_vm1, %v3190_v7, -inf  ;;  %v3602_v14 = vsel %vm997_vm1, %v3189_v45, -inf  ;;  %v3192_v8 = vcombine.high %v3018_v44, %v3018_v44 }
 0x2e4   : > { %v3587_v34 = vmax.f32 %v3585_v17, %v3586_v1  ;;  %v3954_v16 = vsel %vm3926_vm5, %v3573_v33, %v3566_v21  ;;  %v3590_v59 = vmax.f32 %v3588_v50, %v3589_v25  ;;  %v3596_v54 = vrot.slane %v3595_v10, 4  ;;  %v8055_v1 = vld [vmem:[%s10850_s7 + $0x70] sm:$0xff]  }
 0x2e5   : > { %v3955_v53 = vsel %vm3928_vm6, %v3580_v11, %v3954_v16  ;;  %v3603_v39 = vrot.slane %v3602_v14, 4  ;;  %v3609_v47 = vsel %vm997_vm1, %v3191_v15, -inf  ;;  %v3199_v42 = vrot.slane %v3018_v44, %v9458_v9  ;;  %6950 = vmatpush3.bf16.msra.mxu0 %v8052_v52 }
 0x2e6   : > { %v3591_v24 = vrot.slane %v3590_v59, 2  ;;  %v3597_v27 = vmax.f32 %v3595_v10, %v3596_v54  ;;  %v3610_v57 = vrot.slane %v3609_v47, 4  ;;  %v3956_v60 = vsel %vm3930_vm7, %v3587_v34, %v3955_v53  ;;  %6951 = vmatprep.subr.bf16.mxu0 %v8053_v55  ;;  %v8057_v53 = vld [vmem:[%s10850_s7 + $0x78] sm:$0xff]  }
 0x2e7   : > { %v3604_v6 = vmax.f32 %v3602_v14, %v3603_v39  ;;  %v3206_v58 = vrot.slane %v3192_v8, %v9458_v9  ;;  %v3207_v29 = vcombine.high %v3199_v42, %v3199_v42  ;;  %v3616_v22 = vsel %vm997_vm1, %v3199_v42, -inf }
 0x2e8   : > { %v3592_v40 = vmax.f32 %v3590_v59, %v3591_v24  ;;  %v3598_v36 = vrot.slane %v3597_v27, 2  ;;  %v3611_v38 = vmax.f32 %v3609_v47, %v3610_v57  ;;  %v3617_v46 = vrot.slane %v3616_v22, 4 }
 0x2e9   : > { %v3605_v21 = vrot.slane %v3604_v6, 2  ;;  %v3208_v4 = vcombine.high %v3206_v58, %v3206_v58  ;;  %v3623_v35 = vsel %vm997_vm1, %v3207_v29, -inf  ;;  %v3630_v17 = vsel %vm997_vm1, %v3206_v58, -inf  ;;  %6952 = vmatpush3.bf16.msra.mxu0 %v8054_v63 }
 0x2ea   : > { %v9724_v45 = vpop.f32.mrb[44].mxu1  ;;  %v3593_v7 = vrot.slane %v3592_v40, 1  ;;  %v3599_v50 = vmax.f32 %v3597_v27, %v3598_v36  ;;  %v3612_v44 = vrot.slane %v3611_v38, 2  ;;  %v3618_v33 = vmax.f32 %v3616_v22, %v3617_v46  ;;  %6953 = vmatprep.subr.bf16.mxu0 %v8055_v1  ;;  %v4054_v27 = vld [vmem:[#allocation3 + $0x31] sm:$0xff]  ;;  %v9737_v36 = vld [vmem:[#allocation3 + $0x21] sm:$0xff] }
 0x2eb   : > { %v6894_v11 = vpop.f32.mrb[45].mxu1  ;;  %v3606_v25 = vmax.f32 %v3604_v6, %v3605_v21  ;;  %v3624_v15 = vrot.slane %v3623_v35, 4  ;;  %v3631_v10 = vrot.slane %v3630_v17, 4  ;;  %v3637_v14 = vsel %vm997_vm1, %v3208_v4, -inf  ;;  %v8058_v46 = vld [vmem:[%s10850_s7 + $0x38] sm:$0xff]  }
 0x2ec   : > { %v6896_v8 = vpop.f32.mrb[46].mxu1  ;;  %v3594_v52 = vmax.f32 %v3592_v40, %v3593_v7  ;;  %v3600_v34 = vrot.slane %v3599_v50, 1  ;;  %v3613_v16 = vmax.f32 %v3611_v38, %v3612_v44  ;;  %v3619_v59 = vrot.slane %v3618_v33, 2  ;;  %v9739_v38 = vld [vmem:[#allocation3 + $0x32] sm:$0xff] }
 0x2ed   : > { %v6897_v54 = vpop.f32.mrb[47].mxu1  ;;  %v3607_v39 = vrot.slane %v3606_v25, 1  ;;  %v3625_v47 = vmax.f32 %v3623_v35, %v3624_v15  ;;  %v3632_v42 = vmax.f32 %v3630_v17, %v3631_v10  ;;  %v3638_v24 = vrot.slane %v3637_v14, 4  ;;  %6954 = vmatpush3.bf16.msra.mxu0 %v8056_v13 }
 0x2ee   : > { %v3601_v57 = vmax.f32 %v3599_v50, %v3600_v34  ;;  %v3614_v55 = vrot.slane %v3613_v16, 1  ;;  %v3957_v6 = vsel %vm3932_vm8, %v3594_v52, %v3956_v60  ;;  %v3620_v58 = vmax.f32 %v3618_v33, %v3619_v59  ;;  %6955 = vmatprep.subr.bf16.mxu0 %v8057_v53 }
 0x2ef   : > { %v3608_v29 = vmax.f32 %v3606_v25, %v3607_v39  ;;  %v3626_v22 = vrot.slane %v3625_v47, 2  ;;  %v3633_v63 = vrot.slane %v3632_v42, 2  ;;  %v3639_v40 = vmax.f32 %v3637_v14, %v3638_v24 }
 0x2f0   : > { %v3615_v21 = vmax.f32 %v3613_v16, %v3614_v55  ;;  %v3958_v4 = vsel %vm3934_vm9, %v3601_v57, %v3957_v6  ;;  %v3621_v35 = vrot.slane %v3620_v58, 1  ;;  %v7835_v60 = vpack.i.bf16 %v4054_v27, %v9737_v36  ;;  %v9782_v55 = vld [vmem:[%s10849_s6] ss:$0 sm:$0xff] }
 0x2f1   : > { %v3959_v17 = vsel %vm3936_vm10, %v3608_v29, %v3958_v4  ;;  %v3627_v7 = vmax.f32 %v3625_v47, %v3626_v22  ;;  %v3634_v50 = vmax.f32 %v3632_v42, %v3633_v63  ;;  %v3640_v44 = vrot.slane %v3639_v40, 2  ;;  %6956 = vmatpush3.bf16.msra.mxu0 %v8058_v46 }
 0x2f2   : > { %v6899_v33 = vpop.f32.mrb[48].mxu1  ;;  %v3960_v1 = vsel %vm3938_vm11, %v3615_v21, %v3959_v17  ;;  %v3622_v25 = vmax.f32 %v3620_v58, %v3621_v35  ;;  %7836 = vrot.lane.b32.xlu1 %v7835_v60, %s10889_s24  ;;  %v4358_v15 = vpack.c.bf16 %v9739_v38, %v9607_v12  ;;  %v6886_v10 = vadd.f32 %v9635_v43, %v9630_v26 }
 0x2f3   : > { %v6900_v14 = vpop.f32.mrb[49].mxu1  ;;  %4000 = vst.msk [vmem:[#allocation3 + $0x41] sm:$0xff] %vm675_vm0, %v3960_v1  ;;  %v3628_v13 = vrot.slane %v3627_v7, 1  ;;  %v3635_v52 = vrot.slane %v3634_v50, 1  ;;  %v3641_v34 = vmax.f32 %v3639_v40, %v3640_v44  ;;  %7831 = vrot.lane.b32.xlu0 %v7835_v60, %s8238_s20  ;;  %v7840_v16 = vpack.i.bf16 %v9739_v38, %v9607_v12  ;;  %v9767_v12 = vld [vmem:[%s10848_s5] ss:$0 sm:$0xff] }
 0x2f4   : > { %v6902_v59 = vpop.f32.mrb[50].mxu1  ;;  %7244 = vmatprep.mubr.msk.bf16.mxu1 %vm675_vm0, %v4358_v15  ;;  %v2833_v53 = vadd.f32 %v9322_v5, %v6886_v10  ;;  %v6889_v26 = vadd.f32 %v9689_v20, %v9683_v41  ;;  %v6892_v43 = vadd.f32 %v9699_v37, %v9694_v19  ;;  %v6895_v39 = vadd.f32 %v6894_v11, %v9724_v45 }
 0x2f5   : > { %v6903_v47 = vpop.f32.mrb[51].mxu1  ;;  %v3629_v42 = vmax.f32 %v3627_v7, %v3628_v13  ;;  %v3636_v24 = vmax.f32 %v3634_v50, %v3635_v52  ;;  %v3642_v27 = vrot.slane %v3641_v34, 1  ;;  %v6898_v57 = vadd.f32 %v6897_v54, %v6896_v8 }
 0x2f6   : > { %v2909_v5 = vmul.f32 %v9767_v12, %v2833_v53  ;;  %7841 = vrot.lane.b32.xlu1 %v7840_v16, %s10888_s29  ;;  %v2838_v41 = vadd.f32 %v6889_v26, %v9332_v62  ;;  %v2841_v20 = vadd.f32 %v6892_v43, %v9344_v32  ;;  %v2846_v19 = vadd.f32 %v9328_v56, %v6895_v39 }
 0x2f7   : > { %v3019_v37 = vsel %vm675_vm0, %v2977_v18, -inf  ;;  %v3961_v45 = vsel %vm3926_vm5, %v3629_v42, %v3622_v25  ;;  %v2849_v11 = vadd.f32 %v9338_v51, %v6898_v57  ;;  %v6901_v8 = vadd.f32 %v6900_v14, %v6899_v33 }
 0x2f8   : > { %v3643_v54 = vmax.f32 %v3641_v34, %v3642_v27  ;;  %v2947_v62 = vadd.f32 %v9782_v55, %v2909_v5  ;;  %v2910_v32 = vmul.f32 %v9767_v12, %v2838_v41  ;;  %v2911_v56 = vmul.f32 %v9767_v12, %v2841_v20 }
 0x2f9   : > { %v3962_v28 = vsel %vm3928_vm6, %v3636_v24, %v3961_v45  ;;  %v2912_v18 = vmul.f32 %v9767_v12, %v2846_v19  ;;  %v2913_v6 = vmul.f32 %v9767_v12, %v2849_v11  ;;  %v2854_v51 = vadd.f32 %v6901_v8, %v9368_v2 }
 0x2fa   : > { %v2979_v58 = vmax.f32 %v2947_v62, 0.0  ;;  %v2948_v29 = vadd.f32 %v9782_v55, %v2910_v32  ;;  %v2949_v22 = vadd.f32 %v9782_v55, %v2911_v56  ;;  %v9793_v63 = vld [vmem:[#allocation3 + $0x42] sm:$0xff]  ;;  %v6904_v46 = vadd.f32 %v6903_v47, %v6902_v59 }
 0x2fb   : > { %v9795_v40 = vld [vmem:[#allocation3 + $0x40] sm:$0xff]  ;;  %v2950_v21 = vadd.f32 %v9782_v55, %v2912_v18  ;;  %v7845_v4 = vpack.i.bf16 %v9793_v63, %v9739_v38  ;;  %v2951_v2 = vadd.f32 %v9782_v55, %v2913_v6  ;;  %v2914_v50 = vmul.f32 %v9767_v12, %v2854_v51 }
 0x2fc   : > { %v7850_v35 = vpack.i.bf16 %v9795_v40, %v9681_v0  ;;  %v3020_v60 = vsel %vm675_vm0, %v2979_v58, -inf  ;;  %v2980_v17 = vmax.f32 %v2948_v29, 0.0  ;;  %v2981_v7 = vmax.f32 %v2949_v22, 0.0 }
 0x2fd   : > { %v3021_v44 = vmax.f32 %v3019_v37, %v3020_v60  ;;  %v2982_v33 = vmax.f32 %v2950_v21, 0.0  ;;  %7846 = vrot.lane.b32.xlu0 %v7845_v4, %s10889_s24  ;;  %v2983_v1 = vmax.f32 %v2951_v2, 0.0  ;;  %v2857_v38 = vadd.f32 %v6904_v46, %v9379_v31 }
 0x2fe   : > { %7851 = vrot.lane.b32.xlu1 %v7850_v35, %s8238_s20  ;;  %v6905_v25 = vpop.f32.mrb[52].mxu1  ;;  %v9809_v0 = vsel %vm3930_vm7, %v3643_v54, %v3962_v28  ;;  %v3022_v15 = vsel %vm675_vm0, %v2980_v17, -inf  ;;  %v3025_v10 = vsel %vm675_vm0, %v2981_v7, -inf  ;;  %v9814_v14 = vadd.f32 %v9782_v55, %v2914_v50 }
 0x2ff   : > { %v6906_v13 = vpop.f32.mrb[53].mxu1  ;;  %v3209_v52 = vcombine.high %v3021_v44, %v3021_v44  ;;  %v3216_v34 = vrot.slane %v3021_v44, %v9458_v9  ;;  %v3023_v16 = vsel %vm675_vm0, %v2982_v33, -inf  ;;  %v3026_v59 = vsel %vm675_vm0, %v2983_v1, -inf }
 0x300   : > { %v9819_v31 = vpop.f32.mrb[54].mxu1  ;;  %v3024_v53 = vmax.f32 %v3022_v15, %v3023_v16  ;;  %v3027_v26 = vmax.f32 %v3025_v10, %v3026_v59  ;;  %v2984_v43 = vmax.f32 %v9814_v14, 0.0  ;;  %v9823_v39 = vmul.f32 %v9767_v12, %v2857_v38 }
 0x301   : > { %v9825_v47 = vpop.f32.mrb[55].mxu1  ;;  %v3223_v42 = vrot.slane %v3209_v52, %v9458_v9  ;;  %v3224_v24 = vcombine.high %v3216_v34, %v3216_v34  ;;  %v3644_v27 = vsel %vm997_vm1, %v3216_v34, -inf  ;;  %v9829_v57 = vadd.f32 %v6906_v13, %v6905_v25 }
 0x302   : > { %v3645_v5 = vrot.slane %v3644_v27, 4  ;;  %v3226_v41 = vcombine.high %v3024_v53, %v3024_v53  ;;  %v3233_v20 = vrot.slane %v3024_v53, %v9458_v9  ;;  %v3243_v19 = vcombine.high %v3027_v26, %v3027_v26 }
 0x303   : > { %v3225_v37 = vcombine.high %v3223_v42, %v3223_v42  ;;  %v3651_v45 = vsel %vm997_vm1, %v3224_v24, -inf  ;;  %v3658_v11 = vsel %vm997_vm1, %v3223_v42, -inf  ;;  %v9835_v8 = vrot.slane %v3027_v26, %v9458_v9 }
 0x304   : > { %v3646_v54 = vmax.f32 %v3644_v27, %v3645_v5  ;;  %v3652_v62 = vrot.slane %v3651_v45, 4  ;;  %v3659_v32 = vrot.slane %v3658_v11, 4  ;;  %v3240_v56 = vrot.slane %v3226_v41, %v9458_v9 }
 0x305   : > { %v3665_v28 = vsel %vm997_vm1, %v3225_v37, -inf  ;;  %v3241_v18 = vcombine.high %v3233_v20, %v3233_v20  ;;  %v3672_v6 = vsel %vm997_vm1, %v3233_v20, -inf  ;;  %v9841_v51 = vrot.slane %v3243_v19, %v9458_v9 }
 0x306   : > { %v9843_v58 = vpop.f32.mrb[56].mxu1  ;;  %v3647_v29 = vrot.slane %v3646_v54, 2  ;;  %v3653_v22 = vmax.f32 %v3651_v45, %v3652_v62  ;;  %v3660_v46 = vmax.f32 %v3658_v11, %v3659_v32  ;;  %v3666_v21 = vrot.slane %v3665_v28, 4 }
 0x307   : > { %v9845_v4 = vpop.f32.mrb[57].mxu1  ;;  %v3242_v35 = vcombine.high %v3240_v56, %v3240_v56  ;;  %v3673_v2 = vrot.slane %v3672_v6, 4  ;;  %v3679_v60 = vsel %vm997_vm1, %v3241_v18, -inf  ;;  %v3686_v17 = vsel %vm997_vm1, %v3240_v56, -inf }
 0x308   : > { %v9849_v7 = vpop.f32.mrb[58].mxu1  ;;  %v3648_v50 = vmax.f32 %v3646_v54, %v3647_v29  ;;  %v3654_v44 = vrot.slane %v3653_v22, 2  ;;  %v3661_v33 = vrot.slane %v3660_v46, 2  ;;  %v3667_v1 = vmax.f32 %v3665_v28, %v3666_v21 }
 0x309   : > { %v9851_v38 = vpop.f32.mrb[59].mxu1  ;;  %v3674_v25 = vmax.f32 %v3672_v6, %v3673_v2  ;;  %v3680_v15 = vrot.slane %v3679_v60, 4  ;;  %v3687_v10 = vrot.slane %v3686_v17, 4  ;;  %v3693_v13 = vsel %vm997_vm1, %v3242_v35, -inf }
 0x30a   : > { %v3649_v52 = vrot.slane %v3648_v50, 1  ;;  %v3655_v34 = vmax.f32 %v3653_v22, %v3654_v44  ;;  %v3662_v16 = vmax.f32 %v3660_v46, %v3661_v33  ;;  %v3668_v59 = vrot.slane %v3667_v1, 2 }
 0x30b   : > { %v3675_v53 = vrot.slane %v3674_v25, 2  ;;  %v3681_v26 = vmax.f32 %v3679_v60, %v3680_v15  ;;  %v3688_v42 = vmax.f32 %v3686_v17, %v3687_v10  ;;  %v3694_v24 = vrot.slane %v3693_v13, 4 }
 0x30c   : > { %v3650_v27 = vmax.f32 %v3648_v50, %v3649_v52  ;;  %v3656_v5 = vrot.slane %v3655_v34, 1  ;;  %v3663_v41 = vrot.slane %v3662_v16, 1  ;;  %v3669_v20 = vmax.f32 %v3667_v1, %v3668_v59 }
 0x30d   : > { %v3676_v19 = vmax.f32 %v3674_v25, %v3675_v53  ;;  %v3682_v37 = vrot.slane %v3681_v26, 2  ;;  %v3689_v45 = vrot.slane %v3688_v42, 2  ;;  %v3695_v11 = vmax.f32 %v3693_v13, %v3694_v24 }
 0x30e   : > { %v9854_v54 = vpop.f32.mrb[60].mxu1  ;;  %v3657_v62 = vmax.f32 %v3655_v34, %v3656_v5  ;;  %v3664_v32 = vmax.f32 %v3662_v16, %v3663_v41  ;;  %v3670_v56 = vrot.slane %v3669_v20, 1  ;;  %v3964_v28 = vsel %vm3932_vm8, %v3650_v27, %v9809_v0 }
 0x30f   : > { %v9858_v18 = vpop.f32.mrb[61].mxu1  ;;  %v3677_v6 = vrot.slane %v3676_v19, 1  ;;  %v3683_v29 = vmax.f32 %v3681_v26, %v3682_v37  ;;  %v3690_v22 = vmax.f32 %v3688_v42, %v3689_v45  ;;  %v3696_v46 = vrot.slane %v3695_v11, 2 }
 0x310   : > { %v9860_v21 = vpop.f32.mrb[62].mxu1  ;;  %v3671_v35 = vmax.f32 %v3669_v20, %v3670_v56  ;;  %v3965_v2 = vsel %vm3934_vm9, %v3657_v62, %v3964_v28  ;;  %v3258_v60 = vcombine.high %v9835_v8, %v9835_v8  ;;  %v3259_v17 = vcombine.high %v9841_v51, %v9841_v51 }
 0x311   : > { %v9867_v50 = vpop.f32.mrb[63].mxu1  ;;  %v3966_v0 = vsel %vm3936_vm10, %v3664_v32, %v3965_v2  ;;  %v3678_v44 = vmax.f32 %v3676_v19, %v3677_v6  ;;  %v3684_v33 = vrot.slane %v3683_v29, 1  ;;  %v3691_v1 = vrot.slane %v3690_v22, 1 }
 0x312   : > { %v3967_v25 = vsel %vm3938_vm11, %v3671_v35, %v3966_v0  ;;  %v3697_v15 = vmax.f32 %v3695_v11, %v3696_v46  ;;  %v3700_v10 = vsel %vm997_vm1, %v9835_v8, -inf  ;;  %v3707_v13 = vsel %vm997_vm1, %v3258_v60, -inf }
 0x313   : > { %4001 = vst.msk [vmem:[#allocation3 + $0x51] sm:$0xff] %vm675_vm0, %v3967_v25  ;;  %v3685_v52 = vmax.f32 %v3683_v29, %v3684_v33  ;;  %v3692_v34 = vmax.f32 %v3690_v22, %v3691_v1  ;;  %v3701_v16 = vrot.slane %v3700_v10, 4  ;;  %v3708_v59 = vrot.slane %v3707_v13, 4 }
 0x314   : > { %v3698_v53 = vrot.slane %v3697_v15, 1  ;;  %v3714_v26 = vsel %vm997_vm1, %v9841_v51, -inf  ;;  %v3721_v42 = vsel %vm997_vm1, %v3259_v17, -inf  ;;  %v3028_v24 = vsel %vm675_vm0, %v2984_v43, -inf }
 0x315   : > { %v3968_v8 = vsel %vm3926_vm5, %v3685_v52, %v3678_v44  ;;  %v3702_v27 = vmax.f32 %v3700_v10, %v3701_v16  ;;  %v3709_v5 = vmax.f32 %v3707_v13, %v3708_v59  ;;  %v3715_v41 = vrot.slane %v3714_v26, 4  ;;  %v9900_v44 = vld [vmem:[#allocation3 + $0x41] sm:$0xff] }
 0x316   : > { %v3699_v20 = vmax.f32 %v3697_v15, %v3698_v53  ;;  %v3969_v19 = vsel %vm3928_vm6, %v3692_v34, %v3968_v8  ;;  %v3722_v37 = vrot.slane %v3721_v42, 4  ;;  %v2953_v45 = vadd.f32 %v9782_v55, %v9823_v39 }
 0x317   : > { %v3703_v11 = vrot.slane %v3702_v27, 2  ;;  %v3710_v51 = vrot.slane %v3709_v5, 2  ;;  %v3716_v62 = vmax.f32 %v3714_v26, %v3715_v41  ;;  %v2862_v14 = vadd.f32 %v9360_v30, %v9829_v57 }
 0x318   : > { %v3723_v32 = vmax.f32 %v3721_v42, %v3722_v37  ;;  %v3970_v43 = vsel %vm3930_vm7, %v3699_v20, %v3969_v19  ;;  %v2985_v56 = vmax.f32 %v2953_v45, 0.0  ;;  %v6910_v28 = vadd.f32 %v9825_v47, %v9819_v31 }
 0x319   : > { %v3704_v6 = vmax.f32 %v3702_v27, %v3703_v11  ;;  %v3711_v29 = vmax.f32 %v3709_v5, %v3710_v51  ;;  %v3717_v22 = vrot.slane %v3716_v62, 2  ;;  %v2916_v46 = vmul.f32 %v9767_v12, %v2862_v14 }
 0x31a   : > { %v3724_v35 = vrot.slane %v3723_v32, 2  ;;  %v3031_v39 = vsel %vm675_vm0, %v2985_v56, -inf  ;;  %v2865_v2 = vadd.f32 %v9374_v48, %v6910_v28  ;;  %v9893_v60 = vld [vmem:[#allocation3 + $0x50] sm:$0xff]  ;;  %v6913_v57 = vadd.f32 %v9845_v4, %v9843_v58 }
 0x31b   : > { %v9895_v30 = vld [vmem:[#allocation3 + $0x51] sm:$0xff]  ;;  %v3705_v17 = vrot.slane %v3704_v6, 1  ;;  %v3712_v0 = vrot.slane %v3711_v29, 1  ;;  %v3718_v31 = vmax.f32 %v3716_v62, %v3717_v22  ;;  %v2954_v47 = vadd.f32 %v9782_v55, %v2916_v46 }
 0x31c   : > { %v9902_v33 = vld [vmem:[#allocation3 + $0x52] sm:$0xff]  ;;  %v3725_v1 = vmax.f32 %v3723_v32, %v3724_v35  ;;  %v2917_v25 = vmul.f32 %v9767_v12, %v2865_v2  ;;  %v7855_v48 = vpack.i.bf16 %v9893_v60, %v9795_v40  ;;  %v7865_v15 = vpack.i.bf16 %v9895_v30, %v9900_v44 }
 0x31d   : > { %v3706_v10 = vmax.f32 %v3704_v6, %v3705_v17  ;;  %v3713_v58 = vmax.f32 %v3711_v29, %v3712_v0  ;;  %v3719_v4 = vrot.slane %v3718_v31, 1  ;;  %v2986_v13 = vmax.f32 %v2954_v47, 0.0 }
 0x31e   : > { %v3726_v52 = vrot.slane %v3725_v1, 1  ;;  %v2955_v34 = vadd.f32 %v9782_v55, %v2917_v25  ;;  %7856 = vrot.lane.b32.xlu0 %v7855_v48, %s10888_s29  ;;  %7866 = vrot.lane.b32.xlu1 %v7865_v15, %s10889_s24  ;;  %v4361_v16 = vpack.c.bf16 %v9902_v33, %v9793_v63  ;;  %v7870_v59 = vpack.i.bf16 %v9902_v33, %v9793_v63 }
 0x31f   : > { %v3720_v53 = vmax.f32 %v3718_v31, %v3719_v4  ;;  %v3971_v26 = vsel %vm3932_vm8, %v3706_v10, %v3970_v43  ;;  %v3029_v42 = vsel %vm675_vm0, %v2986_v13, -inf  ;;  %v6916_v8 = vadd.f32 %v9851_v38, %v9849_v7 }
 0x320   : > { %v3727_v27 = vmax.f32 %v3725_v1, %v3726_v52  ;;  %v3972_v5 = vsel %vm3934_vm9, %v3713_v58, %v3971_v26  ;;  %v3030_v41 = vmax.f32 %v3028_v24, %v3029_v42  ;;  %v2987_v20 = vmax.f32 %v2955_v34, 0.0  ;;  %7245 = vmatmul.mubr.msk.bf16.vlgmr.msra.gmra.mrb[64].mxu1 %vm675_vm0, %v4361_v16 }
 0x321   : > { %v3973_v19 = vsel %vm3936_vm10, %v3720_v53, %v3972_v5  ;;  %v2870_v37 = vadd.f32 %v6913_v57, %v9548_v3  ;;  %v2873_v63 = vadd.f32 %v6916_v8, %v9552_v49  ;;  %v6919_v45 = vadd.f32 %v9858_v18, %v9854_v54 }
 0x322   : > { %v3974_v11 = vsel %vm3938_vm11, %v3727_v27, %v3973_v19  ;;  %v3260_v51 = vcombine.high %v3030_v41, %v3030_v41  ;;  %v3267_v7 = vrot.slane %v3030_v41, %v9458_v9  ;;  %v3032_v38 = vsel %vm675_vm0, %v2987_v20, -inf  ;;  %7861 = vrot.lane.b32.xlu0 %v7865_v15, %s8238_s20  ;;  %7871 = vrot.lane.b32.xlu1 %v7870_v59, %s10888_s29 }
 0x323   : > { %4002 = vst.msk [vmem:[#allocation3 + $0x61] sm:$0xff] %vm675_vm0, %v3974_v11  ;;  %v3033_v24 = vmax.f32 %v3031_v39, %v3032_v38  ;;  %v9934_v3 = vadd.f32 %v9546_v23, %v6919_v45  ;;  %v9940_v62 = vadd.f32 %v9867_v50, %v9860_v21  ;;  %v2918_v23 = vmul.f32 %v9767_v12, %v2870_v37 }
 0x324   : > { %v3274_v49 = vrot.slane %v3260_v51, %v9458_v9  ;;  %v3275_v54 = vcombine.high %v3267_v7, %v3267_v7  ;;  %v3728_v18 = vsel %vm997_vm1, %v3267_v7, -inf  ;;  %v2919_v2 = vmul.f32 %v9767_v12, %v2873_v63 }
 0x325   : > { %v3729_v14 = vrot.slane %v3728_v18, 4  ;;  %v3277_v32 = vcombine.high %v3033_v24, %v3033_v24  ;;  %v3284_v43 = vrot.slane %v3033_v24, %v9458_v9  ;;  %v2956_v63 = vadd.f32 %v9782_v55, %v2918_v23 }
 0x326   : > { %v3276_v56 = vcombine.high %v3274_v49, %v3274_v49  ;;  %v3735_v28 = vsel %vm997_vm1, %v3275_v54, -inf  ;;  %v3742_v6 = vsel %vm997_vm1, %v3274_v49, -inf }
 0x327   : > { %v3730_v29 = vmax.f32 %v3728_v18, %v3729_v14  ;;  %v3736_v22 = vrot.slane %v3735_v28, 4  ;;  %v3743_v46 = vrot.slane %v3742_v6, 4  ;;  %v3291_v35 = vrot.slane %v3277_v32, %v9458_v9 }
 0x328   : > { %v3749_v39 = vsel %vm997_vm1, %v3276_v56, -inf  ;;  %v3292_v21 = vcombine.high %v3284_v43, %v3284_v43  ;;  %v3756_v50 = vsel %vm997_vm1, %v3284_v43, -inf }
 0x329   : > { %v3731_v57 = vrot.slane %v3730_v29, 2  ;;  %v3737_v17 = vmax.f32 %v3735_v28, %v3736_v22  ;;  %v3744_v0 = vmax.f32 %v3742_v6, %v3743_v46  ;;  %v3750_v31 = vrot.slane %v3749_v39, 4 }
 0x32a   : > { %v3293_v47 = vcombine.high %v3291_v35, %v3291_v35  ;;  %v3757_v1 = vrot.slane %v3756_v50, 4  ;;  %v3763_v25 = vsel %vm997_vm1, %v3292_v21, -inf  ;;  %v3770_v48 = vsel %vm997_vm1, %v3291_v35, -inf }
 0x32b   : > { %v3732_v15 = vmax.f32 %v3730_v29, %v3731_v57  ;;  %v3738_v10 = vrot.slane %v3737_v17, 2  ;;  %v3745_v58 = vrot.slane %v3744_v0, 2  ;;  %v3751_v4 = vmax.f32 %v3749_v39, %v3750_v31 }
 0x32c   : > { %v3758_v13 = vmax.f32 %v3756_v50, %v3757_v1  ;;  %v3764_v52 = vrot.slane %v3763_v25, 4  ;;  %v3771_v34 = vrot.slane %v3770_v48, 4  ;;  %v3777_v16 = vsel %vm997_vm1, %v3293_v47, -inf }
 0x32d   : > { %v3733_v59 = vrot.slane %v3732_v15, 1  ;;  %v3739_v53 = vmax.f32 %v3737_v17, %v3738_v10  ;;  %v3746_v26 = vmax.f32 %v3744_v0, %v3745_v58  ;;  %v3752_v42 = vrot.slane %v3751_v4, 2  ;;  %v9967_v10 = vld [vmem:[#allocation3 + $0x62] sm:$0xff] }
 0x32e   : > { %v3759_v8 = vrot.slane %v3758_v13, 2  ;;  %v3765_v27 = vmax.f32 %v3763_v25, %v3764_v52  ;;  %v3772_v5 = vmax.f32 %v3770_v48, %v3771_v34  ;;  %v3778_v41 = vrot.slane %v3777_v16, 4 }
 0x32f   : > { %v3740_v20 = vrot.slane %v3739_v53, 1  ;;  %v3747_v19 = vrot.slane %v3746_v26, 1  ;;  %v3753_v37 = vmax.f32 %v3751_v4, %v3752_v42  ;;  %v3734_v38 = vmax.f32 %v3732_v15, %v3733_v59 }
 0x330   : > { %v3760_v45 = vmax.f32 %v3758_v13, %v3759_v8  ;;  %v3766_v11 = vrot.slane %v3765_v27, 2  ;;  %v3773_v51 = vrot.slane %v3772_v5, 2  ;;  %v3779_v7 = vmax.f32 %v3777_v16, %v3778_v41 }
 0x331   : > { %v3741_v24 = vmax.f32 %v3739_v53, %v3740_v20  ;;  %v3748_v49 = vmax.f32 %v3746_v26, %v3747_v19  ;;  %v3754_v54 = vrot.slane %v3753_v37, 1  ;;  %v2988_v6 = vmax.f32 %v2956_v63, 0.0 }
 0x332   : > { %v3761_v18 = vrot.slane %v3760_v45, 1  ;;  %v3767_v14 = vmax.f32 %v3765_v27, %v3766_v11  ;;  %v3774_v32 = vmax.f32 %v3772_v5, %v3773_v51  ;;  %v3780_v43 = vrot.slane %v3779_v7, 2 }
 0x333   : > { %v3755_v56 = vmax.f32 %v3753_v37, %v3754_v54  ;;  %v3975_v28 = vsel %vm3926_vm5, %v3741_v24, %v3734_v38  ;;  %v2920_v29 = vmul.f32 %v9767_v12, %v9934_v3  ;;  %v2957_v50 = vadd.f32 %v9782_v55, %v2919_v2  ;;  %v9969_v2 = vld [vmem:[#allocation3 + $0x60] sm:$0xff] }
 0x334   : > { %v3976_v23 = vsel %vm3928_vm6, %v3748_v49, %v3975_v28  ;;  %v3762_v22 = vmax.f32 %v3760_v45, %v3761_v18  ;;  %v3768_v46 = vrot.slane %v3767_v14, 1  ;;  %v3775_v35 = vrot.slane %v3774_v32, 1 }
 0x335   : > { %v3781_v39 = vmax.f32 %v3779_v7, %v3780_v43  ;;  %v3977_v21 = vsel %vm3930_vm7, %v3755_v56, %v3976_v23  ;;  %v2958_v57 = vadd.f32 %v9782_v55, %v2920_v29  ;;  %v2881_v31 = vadd.f32 %v9550_v61, %v9940_v62 }
 0x336   : > { %v3769_v17 = vmax.f32 %v3767_v14, %v3768_v46  ;;  %v3978_v0 = vsel %vm3932_vm8, %v3762_v22, %v3977_v21  ;;  %v3776_v47 = vmax.f32 %v3774_v32, %v3775_v35  ;;  %v3034_v48 = vsel %vm675_vm0, %v2988_v6, -inf }
 0x337   : > { %v3782_v3 = vrot.slane %v3781_v39, 1  ;;  %v2990_v1 = vmax.f32 %v2958_v57, 0.0  ;;  %v2921_v15 = vmul.f32 %v9767_v12, %v2881_v31  ;;  %v2989_v13 = vmax.f32 %v2957_v50, 0.0 }
 0x338   : > { %v3979_v25 = vsel %vm3934_vm9, %v3769_v17, %v3978_v0  ;;  %v7875_v16 = vpack.i.bf16 %v9967_v10, %v9902_v33  ;;  %v7880_v12 = vpack.i.bf16 %v9969_v2, %v9893_v60 }
 0x339   : > { %v3783_v58 = vmax.f32 %v3781_v39, %v3782_v3  ;;  %v3980_v4 = vsel %vm3936_vm10, %v3776_v47, %v3979_v25  ;;  %v3035_v52 = vsel %vm675_vm0, %v2990_v1, -inf  ;;  %v2959_v62 = vadd.f32 %v9782_v55, %v2921_v15 }
 0x33a   : > { %v3036_v61 = vmax.f32 %v3034_v48, %v3035_v52  ;;  %v3037_v42 = vsel %vm675_vm0, %v2989_v13, -inf  ;;  %7876 = vrot.lane.b32.xlu0 %v7875_v16, %s10889_s24  ;;  %7881 = vrot.lane.b32.xlu1 %v7880_v12, %s8238_s20 }
 0x33b   : > { %v3981_v34 = vsel %vm3938_vm11, %v3783_v58, %v3980_v4  ;;  %v2991_v26 = vmax.f32 %v2959_v62, 0.0 }
 0x33c   : > { %4003 = vst.msk [vmem:[#allocation3 + $0x71] sm:$0xff] %vm675_vm0, %v3981_v34  ;;  %v3294_v59 = vcombine.high %v3036_v61, %v3036_v61  ;;  %v3301_v53 = vrot.slane %v3036_v61, %v9458_v9 }
 0x33d   : > { %v3038_v27 = vsel %vm675_vm0, %v2991_v26, -inf }
 0x33e   : > { %v3308_v55 = vrot.slane %v3294_v59, %v9458_v9  ;;  %v3309_v8 = vcombine.high %v3301_v53, %v3301_v53  ;;  %v3784_v33 = vsel %vm997_vm1, %v3301_v53, -inf  ;;  %v3039_v41 = vmax.f32 %v3037_v42, %v3038_v27 }
 0x33f   : > { %v3785_v5 = vrot.slane %v3784_v33, 4 }
 0x340   : > { %v3310_v20 = vcombine.high %v3308_v55, %v3308_v55  ;;  %v3791_v19 = vsel %vm997_vm1, %v3309_v8, -inf  ;;  %v3798_v37 = vsel %vm997_vm1, %v3308_v55, -inf  ;;  %v3311_v51 = vcombine.high %v3039_v41, %v3039_v41 }
 0x341   : > { %v3786_v63 = vmax.f32 %v3784_v33, %v3785_v5  ;;  %v3792_v45 = vrot.slane %v3791_v19, 4  ;;  %v3799_v11 = vrot.slane %v3798_v37, 4  ;;  %v3318_v38 = vrot.slane %v3039_v41, %v9458_v9 }
 0x342   : > { %v3805_v7 = vsel %vm997_vm1, %v3310_v20, -inf  ;;  %v3325_v14 = vrot.slane %v3311_v51, %v9458_v9 }
 0x343   : > { %v3787_v24 = vrot.slane %v3786_v63, 2  ;;  %v3793_v49 = vmax.f32 %v3791_v19, %v3792_v45  ;;  %v3800_v54 = vmax.f32 %v3798_v37, %v3799_v11  ;;  %v3806_v18 = vrot.slane %v3805_v7, 4  ;;  %v9998_v27 = vld [vmem:[#allocation3 + $0x70] sm:$0xff]  ;;  %v10003_v45 = vld [vmem:[#allocation3 + $0x61] sm:$0xff] }
 0x344   : > { %v3326_v32 = vcombine.high %v3318_v38, %v3318_v38  ;;  %v3812_v43 = vsel %vm997_vm1, %v3318_v38, -inf  ;;  %v3327_v23 = vcombine.high %v3325_v14, %v3325_v14  ;;  %v3826_v35 = vsel %vm997_vm1, %v3325_v14, -inf  ;;  %v10000_v5 = vld [vmem:[#allocation3 + $0x71] sm:$0xff] }
 0x345   : > { %v3788_v56 = vmax.f32 %v3786_v63, %v3787_v24  ;;  %v3794_v28 = vrot.slane %v3793_v49, 2  ;;  %v3801_v6 = vrot.slane %v3800_v54, 2  ;;  %v3807_v29 = vmax.f32 %v3805_v7, %v3806_v18  ;;  %v4113_v11 = vld [vmem:[#allocation3 + $0x72] sm:$0xff] }
 0x346   : > { %v3813_v22 = vrot.slane %v3812_v43, 4  ;;  %v3819_v46 = vsel %vm997_vm1, %v3326_v32, -inf  ;;  %v3827_v31 = vrot.slane %v3826_v35, 4  ;;  %v3833_v47 = vsel %vm997_vm1, %v3327_v23, -inf  ;;  %v7817_v23 = vpop.permute.xlu0 %7816 }
 0x347   : > { %v3789_v39 = vrot.slane %v3788_v56, 1  ;;  %v3795_v21 = vmax.f32 %v3793_v49, %v3794_v28  ;;  %v3802_v50 = vmax.f32 %v3800_v54, %v3801_v6  ;;  %v3808_v57 = vrot.slane %v3807_v29, 2  ;;  %v7807_v6 = vpop.permute.xlu1 %7806 }
 0x348   : > { %v3814_v17 = vmax.f32 %v3812_v43, %v3813_v22  ;;  %v3820_v0 = vrot.slane %v3819_v46, 4  ;;  %v3828_v58 = vmax.f32 %v3826_v35, %v3827_v31  ;;  %v3834_v4 = vrot.slane %v3833_v47, 4 }
 0x349   : > { %v3796_v3 = vrot.slane %v3795_v21, 1  ;;  %v3803_v1 = vrot.slane %v3802_v50, 1  ;;  %v3809_v25 = vmax.f32 %v3807_v29, %v3808_v57  ;;  %v3790_v13 = vmax.f32 %v3788_v56, %v3789_v39 }
 0x34a   : > { %v3815_v48 = vrot.slane %v3814_v17, 2  ;;  %v3821_v15 = vmax.f32 %v3819_v46, %v3820_v0  ;;  %v3829_v12 = vrot.slane %v3828_v58, 2  ;;  %v3835_v59 = vmax.f32 %v3833_v47, %v3834_v4  ;;  %v4115_v46 = vld [vmem:[#allocation3 + $0x92] sm:$0xff]  ;;  %v4043_v47 = vld [vmem:[#allocation3] sm:$0xff] }
 0x34b   : > { %v3797_v52 = vmax.f32 %v3795_v21, %v3796_v3  ;;  %v3804_v61 = vmax.f32 %v3802_v50, %v3803_v1  ;;  %v3810_v62 = vrot.slane %v3809_v25, 1  ;;  %v7885_v7 = vpack.i.bf16 %v9998_v27, %v9969_v2  ;;  %v7812_v22 = vpop.permute.xlu1 %7811 }
 0x34c   : > { %v3816_v34 = vmax.f32 %v3814_v17, %v3815_v48  ;;  %v3822_v16 = vrot.slane %v3821_v15, 2  ;;  %v3830_v33 = vmax.f32 %v3828_v58, %v3829_v12  ;;  %v3836_v41 = vrot.slane %v3835_v59, 2  ;;  %v4044_v58 = vld [vmem:[#allocation3 + $0x10] sm:$0xff] }
 0x34d   : > { %v3811_v53 = vmax.f32 %v3809_v25, %v3810_v62  ;;  %v3982_v26 = vsel %vm3926_vm5, %v3797_v52, %v3790_v13  ;;  %v7895_v38 = vpack.i.bf16 %v10000_v5, %v10003_v45  ;;  %7886 = vrot.lane.b32.xlu0 %v7885_v7, %s10888_s29  ;;  %v4364_v14 = vpack.c.bf16 %v4113_v11, %v9967_v10  ;;  %v4099_v25 = vld [vmem:[#allocation3 + $0x90] sm:$0xff] }
 0x34e   : > { %v3983_v42 = vsel %vm3928_vm6, %v3804_v61, %v3982_v26  ;;  %v3817_v55 = vrot.slane %v3816_v34, 1  ;;  %v3823_v8 = vmax.f32 %v3821_v15, %v3822_v16  ;;  %v3831_v63 = vrot.slane %v3830_v33, 1 }
 0x34f   : > { %v3984_v20 = vsel %vm3930_vm7, %v3811_v53, %v3983_v42  ;;  %v3837_v51 = vmax.f32 %v3835_v59, %v3836_v41  ;;  %7896 = vrot.lane.b32.xlu1 %v7895_v38, %s10889_s24  ;;  %7248 = vmatprep.mubr.msk.bf16.mxu1 %vm675_vm0, %v4364_v14  ;;  %v7900_v28 = vpack.i.bf16 %v4113_v11, %v9967_v10  ;;  %v7809_v35 = vunpack.i.h.bf16 %v7807_v6  ;;  %v7822_v17 = vpop.permute.xlu1 %7821  ;;  %v4075_v53 = vld [vmem:[#allocation3 + $0x11] sm:$0xff] }
 0x350   : > { %v3818_v19 = vmax.f32 %v3816_v34, %v3817_v55  ;;  %v3824_v37 = vrot.slane %v3823_v8, 1  ;;  %v3832_v54 = vmax.f32 %v3830_v33, %v3831_v63  ;;  %v7808_v57 = vunpack.i.l.bf16 %v7807_v6  ;;  %v4107_v42 = vld [vmem:[#allocation3 + $0x91] sm:$0xff] }
 0x351   : > { %v3838_v18 = vrot.slane %v3837_v51, 1  ;;  %7891 = vrot.lane.b32.xlu0 %v7895_v38, %s8238_s20  ;;  %v7814_v3 = vunpack.i.h.bf16 %v7812_v22  ;;  %v7813_v1 = vunpack.i.l.bf16 %v7812_v22  ;;  %v7819_v48 = vunpack.i.h.bf16 %v7817_v23  ;;  %v4045_v22 = vld [vmem:[#allocation3 + $0x20] sm:$0xff] }
 0x352   : > { %v3825_v24 = vmax.f32 %v3823_v8, %v3824_v37  ;;  %v3985_v49 = vsel %vm3932_vm8, %v3818_v19, %v3984_v20  ;;  %v7818_v15 = vunpack.i.l.bf16 %v7817_v23  ;;  %v7824_v4 = vunpack.i.h.bf16 %v7822_v17 }
 0x353   : > { %v3839_v43 = vmax.f32 %v3837_v51, %v3838_v18  ;;  %7901 = vrot.lane.b32.xlu1 %v7900_v28, %s10888_s29  ;;  %v7827_v50 = vpop.permute.xlu0 %7826  ;;  %v7823_v13 = vunpack.i.l.bf16 %v7822_v17  ;;  %v4309_v62 = vsel %vm675_vm0, %v4044_v58, %v7809_v35  ;;  %v4308_v34 = vsel %vm675_vm0, %v4043_v47, %v7808_v57 }
 0x354   : > { %v3986_v32 = vsel %vm3934_vm9, %v3825_v24, %v3985_v49  ;;  %v7829_v52 = vunpack.i.h.bf16 %v7827_v50  ;;  %v7828_v61 = vunpack.i.l.bf16 %v7827_v50  ;;  %v4316_v12 = vsel %vm2196_vm3, %v4308_v34, %v7813_v1 }
 0x355   : > { %v3987_v56 = vsel %vm3936_vm10, %v3832_v54, %v3986_v32  ;;  %v4317_v59 = vsel %vm2196_vm3, %v4309_v62, %v7814_v3  ;;  %v4333_v8 = vsel %vm675_vm0, %v9737_v36, %v7819_v48  ;;  %v4332_v33 = vsel %vm675_vm0, %v4075_v53, %v7818_v15 }
 0x356   : > { %v3988_v29 = vsel %vm3938_vm11, %v3839_v43, %v3987_v56  ;;  %v4324_v19 = vsel %vm2229_vm4, %v4316_v12, %v7823_v13  ;;  %v4325_v37 = vsel %vm2229_vm4, %v4317_v59, %v7824_v4  ;;  %v4340_v63 = vsel %vm2196_vm3, %v4332_v33, %v7828_v61 }
 0x357   : > { %4004 = vst.msk [vmem:[#allocation3 + $0x81] sm:$0xff] %vm675_vm0, %v3988_v29  ;;  %v4356_v24 = vpack.c.bf16 %v4325_v37, %v4324_v19 }
 0x35e   : > { %v4114_v39 = vld [vmem:[#allocation3 + $0x82] sm:$0xff] }
 0x35f   : > { %v4074_v21 = vld [vmem:[#allocation3 + $0x80] sm:$0xff]  ;;  %v4367_v0 = vpack.c.bf16 %v4115_v46, %v4114_v39  ;;  %v7905_v10 = vpack.i.bf16 %v4114_v39, %v4113_v11  ;;  %v4341_v11 = vsel %vm2196_vm3, %v4333_v8, %v7829_v52  ;;  %v4046_v46 = vld [vmem:[#allocation3 + $0x30] sm:$0xff] }
 0x360   : > { %v7920_v31 = vpack.i.bf16 %v4074_v21, %v9998_v27  ;;  %v7910_v16 = vpack.i.bf16 %v4099_v25, %v4074_v21  ;;  %v10029_v26 = vld [vmem:[#allocation3 + $0x81] sm:$0xff] }
 0x361   : > { %7249 = vmatmul.mubr.msk.bf16.gmra.mrb[68].mxu1 %vm675_vm0, %v4367_v0  ;;  %7906 = vrot.lane.b32.xlu0 %v7905_v10, %s10889_s24  ;;  %v7915_v51 = vpack.i.bf16 %v4107_v42, %v10029_v26  ;;  %s6509_s24 = scalar_lea.sflag [#allocation6], %s539_s0 }
 0x362   : > { %7921 = vrot.lane.b32.xlu1 %v7920_v31, %s8238_s20  ;;  %v4077_v31 = vld [vmem:[#allocation3 + $0x31] sm:$0xff] }
 0x364   : > { %v7837_v49 = vpop.permute.xlu1 %7836 }
 0x365   : > { %v7832_v55 = vpop.permute.xlu0 %7831  ;;  %7911 = vrot.lane.b32.xlu0 %v7910_v16, %s10888_s29  ;;  %v7839_v14 = vunpack.i.h.bf16 %v7837_v49  ;;  %v7838_v32 = vunpack.i.l.bf16 %v7837_v49 }
 0x366   : > { %v7834_v41 = vunpack.i.h.bf16 %v7832_v55  ;;  %v7833_v20 = vunpack.i.l.bf16 %v7832_v55 }
 0x367   : > { %v4311_v57 = vsel %vm675_vm0, %v4046_v46, %v7839_v14  ;;  %v4310_v17 = vsel %vm675_vm0, %v4045_v22, %v7838_v32 }
 0x368   : > { %v4348_v7 = vsel %vm2229_vm4, %v4340_v63, %v7833_v20  ;;  %v4349_v36 = vsel %vm2229_vm4, %v4341_v11, %v7834_v41  ;;  %v7842_v54 = vpop.permute.xlu1 %7841 }
 0x369   : > { %v4357_v38 = vpack.c.bf16 %v4349_v36, %v4348_v7  ;;  %7916 = vrot.lane.b32.xlu0 %v7915_v51, %s8238_s20  ;;  %v7844_v56 = vunpack.i.h.bf16 %v7842_v54  ;;  %v7843_v28 = vunpack.i.l.bf16 %v7842_v54 }
 0x36b   : > { %4520 = vmatprep.mubr.bf16.mxu0 %v4357_v38  ;;  %v4318_v0 = vsel %vm2196_vm3, %v4310_v17, %v7843_v28  ;;  %v4319_v10 = vsel %vm2196_vm3, %v4311_v57, %v7844_v56 }
 0x36c   : > { %4521 = vmatmul.mubr.bf16.vlgmr.msra.gmra.mrb[64].mxu0 %v4356_v24 }
 0x36f   : > { %v7847_v18 = vpop.permute.xlu0 %7846 }
 0x370   : > { %v7852_v43 = vpop.permute.xlu1 %7851  ;;  %v7849_v29 = vunpack.i.h.bf16 %v7847_v18  ;;  %v7848_v23 = vunpack.i.l.bf16 %v7847_v18 }
 0x371   : > { %v7854_v35 = vunpack.i.h.bf16 %v7852_v43  ;;  %v7853_v39 = vunpack.i.l.bf16 %v7852_v43 }
 0x372   : > { %v4335_v3 = vsel %vm675_vm0, %v9900_v44, %v7849_v29  ;;  %v4334_v1 = vsel %vm675_vm0, %v4077_v31, %v7848_v23  ;;  %v10890_v23 = vmov 0.0  }
 0x373   : > { %v4326_v4 = vsel %vm2229_vm4, %v4318_v0, %v7853_v39  ;;  %v4327_v13 = vsel %vm2229_vm4, %v4319_v10, %v7854_v35  ;;  %4656 = vst.msk [vmem:[#allocation4 + $0x8] sm:$0x3] %vm4655_vm12, %v10890_v23  ;;  %4659 = vst.msk [vmem:[#allocation4 + $0x98] sm:$0x3] %vm4655_vm12, %v10890_v23 }
 0x374   : > { %v4359_v34 = vpack.c.bf16 %v4327_v13, %v4326_v4  ;;  %4662 = vst.msk [vmem:[#allocation4 + $0x10] sm:$0x1] %vm4661_vm13, %v10890_v23  ;;  %4663 = vst.msk [vmem:[#allocation4 + $0x20] sm:$0x1] %vm4661_vm13, %v10890_v23 }
 0x375   : > { %4664 = vst.msk [vmem:[#allocation4 + $0x30] sm:$0x1] %vm4661_vm13, %v10890_v23  ;;  %4665 = vst.msk [vmem:[#allocation4 + $0x40] sm:$0x1] %vm4661_vm13, %v10890_v23 }
 0x376   : > { %4666 = vst.msk [vmem:[#allocation4 + $0x50] sm:$0x1] %vm4661_vm13, %v10890_v23  ;;  %4667 = vst.msk [vmem:[#allocation4 + $0x60] sm:$0x1] %vm4661_vm13, %v10890_v23 }
 0x377   : > { %4668 = vst.msk [vmem:[#allocation4 + $0x70] sm:$0x1] %vm4661_vm13, %v10890_v23  ;;  %4669 = vst.msk [vmem:[#allocation4 + $0x80] sm:$0x1] %vm4661_vm13, %v10890_v23 }
 0x378   : > { %4670 = vst.msk [vmem:[#allocation4 + $0x19] sm:$0x1] %vm4661_vm13, %v10890_v23  ;;  %4671 = vst.msk [vmem:[#allocation4 + $0x29] sm:$0x1] %vm4661_vm13, %v10890_v23 }
 0x379   : > { %4672 = vst.msk [vmem:[#allocation4 + $0x39] sm:$0x1] %vm4661_vm13, %v10890_v23  ;;  %4673 = vst.msk [vmem:[#allocation4 + $0x49] sm:$0x1] %vm4661_vm13, %v10890_v23 }
 0x37a   : > { %4674 = vst.msk [vmem:[#allocation4 + $0x59] sm:$0x1] %vm4661_vm13, %v10890_v23  ;;  %4675 = vst.msk [vmem:[#allocation4 + $0x69] sm:$0x1] %vm4661_vm13, %v10890_v23 }
 0x37b   : > { %4676 = vst.msk [vmem:[#allocation4 + $0x79] sm:$0x1] %vm4661_vm13, %v10890_v23  ;;  %4677 = vst.msk [vmem:[#allocation4 + $0x89] sm:$0x1] %vm4661_vm13, %v10890_v23 }
 0x390   : > { %v7857_v6 = vpop.permute.xlu0 %7856  ;;  %v7867_v44 = vpop.permute.xlu1 %7866 }
 0x391   : > { %v7859_v21 = vunpack.i.h.bf16 %v7857_v6  ;;  %v7858_v50 = vunpack.i.l.bf16 %v7857_v6  ;;  %v7869_v59 = vunpack.i.h.bf16 %v7867_v44  ;;  %v7868_v53 = vunpack.i.l.bf16 %v7867_v44 }
 0x393   : > { %v4342_v15 = vsel %vm2196_vm3, %v4334_v1, %v7858_v50  ;;  %v4343_v58 = vsel %vm2196_vm3, %v4335_v3, %v7859_v21  ;;  %v4313_v51 = vsel %vm675_vm0, %v9893_v60, %v7869_v59  ;;  %v4312_v7 = vsel %vm675_vm0, %v9795_v40, %v7868_v53 }
 0x394   : > { %v7862_v47 = vpop.permute.xlu0 %7861  ;;  %v7872_v16 = vpop.permute.xlu1 %7871 }
 0x395   : > { %v7864_v25 = vunpack.i.h.bf16 %v7862_v47  ;;  %v7863_v48 = vunpack.i.l.bf16 %v7862_v47  ;;  %v7874_v55 = vunpack.i.h.bf16 %v7872_v16  ;;  %v7873_v8 = vunpack.i.l.bf16 %v7872_v16 }
 0x397   : > { %v4350_v52 = vsel %vm2229_vm4, %v4342_v15, %v7863_v48  ;;  %v4351_v61 = vsel %vm2229_vm4, %v4343_v58, %v7864_v25  ;;  %v4320_v36 = vsel %vm2196_vm3, %v4312_v7, %v7873_v8  ;;  %v4321_v38 = vsel %vm2196_vm3, %v4313_v51, %v7874_v55  ;;  %v8063_v7 = vld [vmem:[%s10853_s10 + $0x50] sm:$0xff]  }
 0x398   : > { %v4360_v62 = vpack.c.bf16 %v4351_v61, %v4350_v52 }
 0x39a   : > { %4528 = vmatprep.mubr.bf16.mxu0 %v4360_v62 }
 0x39b   : > { %4529 = vmatmul.mubr.bf16.gmra.mrb[68].mxu0 %v4359_v34 }
 0x3ac   : > { %v7877_v12 = vpop.permute.xlu0 %7876  ;;  %v7882_v42 = vpop.permute.xlu1 %7881 }
 0x3ad   : > { %v7879_v41 = vunpack.i.h.bf16 %v7877_v12  ;;  %v7878_v20 = vunpack.i.l.bf16 %v7877_v12  ;;  %v7884_v19 = vunpack.i.h.bf16 %v7882_v42  ;;  %v7883_v37 = vunpack.i.l.bf16 %v7882_v42 }
 0x3af   : > { %v4337_v49 = vsel %vm675_vm0, %v10003_v45, %v7879_v41  ;;  %v4336_v54 = vsel %vm675_vm0, %v9895_v30, %v7878_v20  ;;  %v4328_v43 = vsel %vm2229_vm4, %v4320_v36, %v7883_v37  ;;  %v4329_v40 = vsel %vm2229_vm4, %v4321_v38, %v7884_v19  ;;  %v8059_v20 = vld [vmem:[%s10853_s10 + $0x40] sm:$0xff]   ;;  %v8061_v37 = vld [vmem:[%s10853_s10 + $0x48] sm:$0xff]  }
 0x3b0   : > { %v4362_v45 = vpack.c.bf16 %v4329_v40, %v4328_v43  ;;  %v8060_v19 = vld [vmem:[%s10853_s10] sm:$0xff]   ;;  %6987 = vmatprep.subr.bf16.mxu0 %v8059_v20  ;;  %v8066_v43 = vld [vmem:[%s10853_s10 + $0x18] sm:$0xff]   ;;  %v8078_v20 = vld [vmem:[%s10853_s10 + $0x88] sm:$0xff]  }
 0x3b1   : > { %6988 = vmatpush3.bf16.msra.mxu0 %v8060_v19  ;;  %v8067_v40 = vld [vmem:[%s10853_s10 + $0x60] sm:$0xff]  }
 0x3b2   : > { %6989 = vmatprep.subr.bf16.mxu0 %v8061_v37 }
 0x3bf   : > { %v7887_v33 = vpop.permute.xlu0 %7886 }
 0x3c0   : > { %v7889_v63 = vunpack.i.h.bf16 %v7887_v33  ;;  %v7888_v11 = vunpack.i.l.bf16 %v7887_v33 }
 0x3c1   : > { %v7897_v6 = vpop.permute.xlu1 %7896 }
 0x3c2   : > { %v4344_v32 = vsel %vm2196_vm3, %v4336_v54, %v7888_v11  ;;  %v4345_v60 = vsel %vm2196_vm3, %v4337_v49, %v7889_v63  ;;  %v7899_v46 = vunpack.i.h.bf16 %v7897_v6  ;;  %v7898_v35 = vunpack.i.l.bf16 %v7897_v6  ;;  %v8062_v63 = vld [vmem:[%s10853_s10 + $0x8] sm:$0xff]   ;;  %v10157_v49 = vld [vmem:[%s10851_s8] ss:$0 sm:$0xff] }
 0x3c3   : > { %v7892_v24 = vpop.permute.xlu0 %7891  ;;  %6990 = vmatpush3.bf16.msra.mxu0 %v8062_v63  ;;  %v8079_v63 = vld [vmem:[%s10853_s10 + $0xd0] sm:$0xff]  }
 0x3c4   : > { %v7894_v18 = vunpack.i.h.bf16 %v7892_v24  ;;  %v7893_v14 = vunpack.i.l.bf16 %v7892_v24  ;;  %v4315_v1 = vsel %vm675_vm0, %v9998_v27, %v7899_v46  ;;  %v4314_v25 = vsel %vm675_vm0, %v9969_v2, %v7898_v35  ;;  %v8064_v24 = vld [vmem:[%s10853_s10 + $0x10] sm:$0xff]   ;;  %6991 = vmatprep.subr.bf16.mxu0 %v8063_v7  ;;  %v8081_v7 = vld [vmem:[%s10853_s10 + $0xd8] sm:$0xff]  }
 0x3c5   : > { %v7902_v30 = vpop.permute.xlu1 %7901 }
 0x3c6   : > { %v4352_v56 = vsel %vm2229_vm4, %v4344_v32, %v7893_v14  ;;  %v4353_v28 = vsel %vm2229_vm4, %v4345_v60, %v7894_v18  ;;  %v7904_v21 = vunpack.i.h.bf16 %v7902_v30  ;;  %v7903_v50 = vunpack.i.l.bf16 %v7902_v30  ;;  %v10162_v18 = vld [vmem:[%s10852_s9] ss:$0 sm:$0xff]  ;;  %v8065_v60 = vld [vmem:[%s10853_s10 + $0x58] sm:$0xff]   ;;  %v8069_v30 = vld [vmem:[%s10853_s10 + $0x68] sm:$0xff]  }
 0x3c7   : > { %v4363_v29 = vpack.c.bf16 %v4353_v28, %v4352_v56  ;;  %6992 = vmatpush3.bf16.msra.mxu0 %v8064_v24  ;;  %v8084_v24 = vld [vmem:[%s10853_s10 + $0xa0] sm:$0xff]  }
 0x3c8   : > { %v4322_v48 = vsel %vm2196_vm3, %v4314_v25, %v7903_v50  ;;  %v4323_v15 = vsel %vm2196_vm3, %v4315_v1, %v7904_v21  ;;  %6993 = vmatprep.subr.bf16.mxu0 %v8065_v60  ;;  %v8071_v21 = vld [vmem:[%s10853_s10 + $0x70] sm:$0xff]  }
 0x3c9   : > { %4536 = vmatprep.mubr.bf16.mxu0 %v4363_v29  ;;  %v8072_v50 = vld [vmem:[%s10853_s10 + $0x30] sm:$0xff]  }
 0x3ca   : > { %4537 = vmatmul.mubr.bf16.gmra.mrb[72].mxu0 %v4362_v45  ;;  %v8068_v45 = vld [vmem:[%s10853_s10 + $0x20] sm:$0xff]  }
 0x3cb   : > { %6994 = vmatpush3.bf16.msra.mxu0 %v8066_v43 }
 0x3cc   : > { %6995 = vmatprep.subr.bf16.mxu0 %v8067_v40 }
 0x3cf   : > { %6996 = vmatpush3.bf16.msra.mxu0 %v8068_v45 }
 0x3d0   : > { %6997 = vmatprep.subr.bf16.mxu0 %v8069_v30  ;;  %v8085_v30 = vld [vmem:[%s10853_s10 + $0xe8] sm:$0xff]  }
 0x3d3   : > { %v7907_v22 = vpop.permute.xlu0 %7906 }
 0x3d4   : > { %v7922_v39 = vpop.permute.xlu1 %7921  ;;  %v7909_v17 = vunpack.i.h.bf16 %v7907_v22  ;;  %v7908_v0 = vunpack.i.l.bf16 %v7907_v22 }
 0x3d5   : > { %v7924_v10 = vunpack.i.h.bf16 %v7922_v39  ;;  %v7923_v31 = vunpack.i.l.bf16 %v7922_v39  ;;  %v8070_v39 = vld [vmem:[%s10853_s10 + $0x28] sm:$0xff]  }
 0x3d6   : > { %v4338_v4 = vsel %vm675_vm0, %v10000_v5, %v7908_v0  ;;  %v4339_v13 = vsel %vm675_vm0, %v10029_v26, %v7909_v17  ;;  %6998 = vmatpush3.bf16.msra.mxu0 %v8070_v39  ;;  %v8088_v39 = vld [vmem:[%s10853_s10 + $0xf0] sm:$0xff]  }
 0x3d7   : > { %v7912_v57 = vpop.permute.xlu0 %7911  ;;  %v4330_v34 = vsel %vm2229_vm4, %v4322_v48, %v7923_v31  ;;  %v4331_v2 = vsel %vm2229_vm4, %v4323_v15, %v7924_v10  ;;  %6999 = vmatprep.subr.bf16.mxu0 %v8071_v21  ;;  %v8073_v10 = vld [vmem:[%s10853_s10 + $0x78] sm:$0xff]   ;;  %v8089_v21 = vld [vmem:[%s10853_s10 + $0xb0] sm:$0xff]  }
 0x3d8   : > { %v7914_v47 = vunpack.i.h.bf16 %v7912_v57  ;;  %v7913_v3 = vunpack.i.l.bf16 %v7912_v57  ;;  %v4365_v59 = vpack.c.bf16 %v4331_v2, %v4330_v34  ;;  %v4768_v57 = vld [vmem:[#allocation4 + $0x1] sm:$0xff] }
 0x3d9   : > { %v8074_v31 = vld [vmem:[%s10853_s10 + $0x38] sm:$0xff]  }
 0x3da   : > { %v4346_v62 = vsel %vm2196_vm3, %v4338_v4, %v7913_v3  ;;  %v4347_v27 = vsel %vm2196_vm3, %v4339_v13, %v7914_v47  ;;  %7000 = vmatpush3.bf16.msra.mxu0 %v8072_v50  ;;  %v8090_v50 = vld [vmem:[%s10853_s10 + $0xf8] sm:$0xff]  }
 0x3db   : > { %v7917_v58 = vpop.permute.xlu0 %7916  ;;  %7001 = vmatprep.subr.bf16.mxu0 %v8073_v10 }
 0x3dc   : > { %v7919_v52 = vunpack.i.h.bf16 %v7917_v58  ;;  %v7918_v61 = vunpack.i.l.bf16 %v7917_v58 }
 0x3de   : > { %v4354_v44 = vsel %vm2229_vm4, %v4346_v62, %v7918_v61  ;;  %v4355_v16 = vsel %vm2229_vm4, %v4347_v27, %v7919_v52  ;;  %7002 = vmatpush3.bf16.msra.mxu0 %v8074_v31 }
 0x3df   : > { %v4366_v12 = vpack.c.bf16 %v4355_v16, %v4354_v44 }
 0x3e1   : > { %4544 = vmatprep.mubr.bf16.mxu0 %v4366_v12  ;;  %v8075_v12 = vld [vmem:[%s10853_s10 + $0xc0] sm:$0xff]  }
 0x3e2   : > { %4545 = vmatmul.mubr.bf16.gmra.mrb[76].mxu0 %v4365_v59  ;;  %v8076_v59 = vld [vmem:[%s10853_s10 + $0x80] sm:$0xff]   ;;  %7027 = vmatprep.subr.bf16.mxu1 %v8075_v12 }
 0x3e3   : > { %7028 = vmatpush3.bf16.msra.mxu1 %v8076_v59 }
 0x3f3   : > { %v10124_v5 = vpop.f32.mrb[64].mxu1 }
 0x3f4   : > { %v4587_v26 = vpop.f32.mrb[65].mxu1 }
 0x3f5   : > { %v10126_v53 = vpop.f32.mrb[66].mxu1 }
 0x3f6   : > { %v4590_v42 = vpop.f32.mrb[67].mxu1 }
 0x434   : > { %v10128_v55 = vpop.f32.mrb[68].mxu1 }
 0x435   : > { %v10130_v8 = vpop.f32.mrb[69].mxu1 }
 0x436   : > { %v10132_v33 = vpop.f32.mrb[70].mxu1 }
 0x437   : > { %v10134_v41 = vpop.f32.mrb[71].mxu1 }
 0x43f   : > { %v6957_v11 = vpop.f32.mrb[64].mxu0 }
 0x440   : > { %v6958_v51 = vpop.f32.mrb[65].mxu0 }
 0x441   : > { %v6959_v36 = vadd.f32 %v6958_v51, %v6957_v11  ;;  %v6960_v38 = vpop.f32.mrb[66].mxu0  ;;  %v8080_v51 = vld [vmem:[%s10853_s10 + $0x90] sm:$0xff]  }
 0x442   : > { %v6961_v54 = vpop.f32.mrb[67].mxu0 }
 0x443   : > { %v4588_v14 = vadd.f32 %v6959_v36, %v4587_v26  ;;  %v6962_v32 = vadd.f32 %v6961_v54, %v6960_v38  ;;  %v8082_v36 = vld [vmem:[%s10853_s10 + $0x98] sm:$0xff]   ;;  %v8083_v38 = vld [vmem:[%s10853_s10 + $0xe0] sm:$0xff]  }
 0x445   : > { %v4624_v56 = vmul.f32 %v10157_v49, %v4588_v14  ;;  %v4591_v28 = vadd.f32 %v6962_v32, %v4590_v42 }
 0x447   : > { %v4638_v6 = vadd.f32 %v10162_v18, %v4624_v56  ;;  %v4625_v29 = vmul.f32 %v10157_v49, %v4591_v28 }
 0x449   : > { %v4646_v22 = vmax.f32 %v4638_v6, 0.0  ;;  %v4639_v46 = vadd.f32 %v10162_v18, %v4625_v29 }
 0x44b   : > { %4678 = vst.msk [vmem:[#allocation4 + $0x11] sm:$0xff] %vm2196_vm3, %v4646_v22  ;;  %v4647_v35 = vmax.f32 %v4639_v46, 0.0  ;;  %v8086_v22 = vld [vmem:[%s10853_s10 + $0xa8] sm:$0xff]  }
 0x44d   : > { %4679 = vst.msk [vmem:[#allocation4 + $0x21] sm:$0xff] %vm2196_vm3, %v4647_v35 }
 0x452   : > { %v10194_v17 = vld [vmem:[#allocation4 + $0x11] sm:$0xff] }
 0x453   : > { %v7930_v0 = vpack.i.bf16 %v10194_v17, %v4768_v57  ;;  %v10203_v47 = vld [vmem:[#allocation4 + $0x10] sm:$0xff]  ;;  %v8091_v57 = vld [vmem:[%s10853_s10 + $0xb8] sm:$0xff]  }
 0x454   : > { %v10205_v3 = vld [vmem:[#allocation4 + $0x20] sm:$0xff] }
 0x455   : > { %7931 = vrot.lane.b32.xlu1 %v7930_v0, %s10888_s29  ;;  %v7925_v1 = vpack.i.bf16 %v10205_v3, %v10203_v47  ;;  %v10228_v26 = vld [vmem:[#allocation4 + $0x21] sm:$0xff] }
 0x457   : > { %7926 = vrot.lane.b32.xlu0 %v7925_v1, %s10888_s29 }
 0x46e   : > { %v6963_v25 = vpop.f32.mrb[68].mxu0 }
 0x46f   : > { %v6964_v48 = vpop.f32.mrb[69].mxu0 }
 0x470   : > { %v6965_v15 = vadd.f32 %v6964_v48, %v6963_v25  ;;  %v6966_v58 = vpop.f32.mrb[70].mxu0 }
 0x471   : > { %v6967_v4 = vpop.f32.mrb[71].mxu0 }
 0x472   : > { %v4596_v13 = vadd.f32 %v10124_v5, %v6965_v15  ;;  %v6968_v52 = vadd.f32 %v6967_v4, %v6966_v58  ;;  %v8077_v5 = vld [vmem:[%s10853_s10 + $0xc8] sm:$0xff]  }
 0x473   : > { %7029 = vmatprep.subr.bf16.mxu1 %v8077_v5 }
 0x474   : > { %v4626_v61 = vmul.f32 %v10157_v49, %v4596_v13  ;;  %v4599_v62 = vadd.f32 %v10126_v53, %v6968_v52  ;;  %7030 = vmatpush3.bf16.msra.mxu1 %v8078_v20  ;;  %v10308_v13 = vld [vmem:[#allocation4 + $0x22] sm:$0xff] }
 0x475   : > { %7031 = vmatprep.subr.bf16.mxu1 %v8079_v63 }
 0x476   : > { %v4640_v27 = vadd.f32 %v10162_v18, %v4626_v61  ;;  %v4627_v34 = vmul.f32 %v10157_v49, %v4599_v62 }
 0x478   : > { %v4648_v2 = vmax.f32 %v4640_v27, 0.0  ;;  %v4641_v44 = vadd.f32 %v10162_v18, %v4627_v34  ;;  %7032 = vmatpush3.bf16.msra.mxu1 %v8080_v51  ;;  %v4800_v34 = vld [vmem:[#allocation4 + $0x12] sm:$0xff] }
 0x479   : > { %7033 = vmatprep.subr.bf16.mxu1 %v8081_v7 }
 0x47a   : > { %4680 = vst.msk [vmem:[#allocation4 + $0x31] sm:$0xff] %vm2196_vm3, %v4648_v2  ;;  %v4649_v16 = vmax.f32 %v4641_v44, 0.0  ;;  %v7960_v2 = vpack.i.bf16 %v10308_v13, %v4800_v34 }
 0x47c   : > { %4681 = vst.msk [vmem:[#allocation4 + $0x41] sm:$0xff] %vm2196_vm3, %v4649_v16  ;;  %7034 = vmatpush3.bf16.msra.mxu1 %v8082_v36  ;;  %v4760_v36 = vld [vmem:[#allocation4] sm:$0xff] }
 0x47d   : > { %7035 = vmatprep.subr.bf16.mxu1 %v8083_v38 }
 0x480   : > { %7036 = vmatpush3.bf16.msra.mxu1 %v8084_v24  ;;  %v4776_v24 = vld [vmem:[#allocation4 + $0x2] sm:$0xff] }
 0x481   : > { %v10230_v53 = vld [vmem:[#allocation4 + $0x31] sm:$0xff]  ;;  %7037 = vmatprep.subr.bf16.mxu1 %v8085_v30 }
 0x482   : > { %v10234_v42 = vpack.i.bf16 %v10230_v53, %v10228_v26  ;;  %v10239_v19 = vld [vmem:[#allocation4 + $0x30] sm:$0xff] }
 0x483   : > { %v10241_v37 = vld [vmem:[#allocation4 + $0x40] sm:$0xff] }
 0x484   : > { %7941 = vrot.lane.b32.xlu1 %v10234_v42, %s10888_s29  ;;  %v7935_v11 = vpack.i.bf16 %v10241_v37, %v10239_v19  ;;  %7038 = vmatpush3.bf16.msra.mxu1 %v8086_v22  ;;  %v10298_v10 = vld [vmem:[#allocation4 + $0x41] sm:$0xff] }
 0x485   : > { %7039 = vmatprep.subr.bf16.mxu1 %v8088_v39  ;;  %v8093_v39 = vld [vmem:[%s10853_s10 + $0x110] sm:$0xff]  }
 0x486   : > { %7936 = vrot.lane.b32.xlu0 %v7935_v11, %s10888_s29 }
 0x488   : > { %7040 = vmatpush3.bf16.msra.mxu1 %v8089_v21 }
 0x489   : > { %7041 = vmatprep.subr.bf16.mxu1 %v8090_v50 }
 0x48c   : > { %7042 = vmatpush3.bf16.msra.mxu1 %v8091_v57  ;;  %v4824_v57 = vld [vmem:[#allocation4 + $0x91] sm:$0xff] }
 0x49d   : > { %v6969_v54 = vpop.f32.mrb[72].mxu0 }
 0x49e   : > { %v6970_v14 = vpop.f32.mrb[73].mxu0 }
 0x49f   : > { %v6971_v32 = vadd.f32 %v6970_v14, %v6969_v54  ;;  %v6972_v60 = vpop.f32.mrb[74].mxu0 }
 0x4a0   : > { %v6973_v43 = vpop.f32.mrb[75].mxu0 }
 0x4a1   : > { %v4604_v40 = vadd.f32 %v6971_v32, %v10130_v8  ;;  %v6974_v56 = vadd.f32 %v6973_v43, %v6972_v60  ;;  %v10336_v32 = vld [vmem:[#allocation4 + $0x42] sm:$0xff] }
 0x4a3   : > { %v4628_v28 = vmul.f32 %v10157_v49, %v4604_v40  ;;  %v4607_v6 = vadd.f32 %v6974_v56, %v10134_v41  ;;  %v10281_v41 = vld [vmem:[%s10853_s10 + $0x100] sm:$0xff]  }
 0x4a4   : > { %7252 = vmatprep.subr.bf16.mxu0 %v10281_v41 }
 0x4a5   : > { %v4642_v29 = vadd.f32 %v10162_v18, %v4628_v28  ;;  %v4629_v45 = vmul.f32 %v10157_v49, %v4607_v6  ;;  %v10345_v28 = vld [vmem:[#allocation4 + $0x32] sm:$0xff] }
 0x4a7   : > { %v4650_v46 = vmax.f32 %v4642_v29, 0.0  ;;  %v4643_v8 = vadd.f32 %v10162_v18, %v4629_v45  ;;  %v7980_v29 = vpack.i.bf16 %v10336_v32, %v10345_v28 }
 0x4a9   : > { %4682 = vst.msk [vmem:[#allocation4 + $0x51] sm:$0xff] %vm2196_vm3, %v4650_v46  ;;  %v4651_v35 = vmax.f32 %v4643_v8, 0.0 }
 0x4ab   : > { %4683 = vst.msk [vmem:[#allocation4 + $0x61] sm:$0xff] %vm2196_vm3, %v4651_v35 }
 0x4b0   : > { %v10300_v31 = vld [vmem:[#allocation4 + $0x51] sm:$0xff] }
 0x4b1   : > { %v7945_v25 = vpack.i.bf16 %v10300_v31, %v10298_v10  ;;  %v10304_v58 = vld [vmem:[#allocation4 + $0x50] sm:$0xff] }
 0x4b2   : > { %v10306_v4 = vld [vmem:[#allocation4 + $0x60] sm:$0xff]  ;;  %v10357_v46 = vld [vmem:[#allocation4 + $0x52] sm:$0xff] }
 0x4b3   : > { %7946 = vrot.lane.b32.xlu1 %v7945_v25, %s10888_s29  ;;  %v7950_v61 = vpack.i.bf16 %v10306_v4, %v10304_v58  ;;  %v10326_v51 = vld [vmem:[#allocation4 + $0x61] sm:$0xff] }
 0x4b4   : > { %v10351_v22 = vld [vmem:[#allocation4 + $0x62] sm:$0xff] }
 0x4b5   : > { %v6975_v0 = vpop.f32.mrb[76].mxu0  ;;  %7951 = vrot.lane.b32.xlu0 %v7950_v61, %s10888_s29  ;;  %v7990_v8 = vpack.i.bf16 %v10351_v22, %v10357_v46 }
 0x4b6   : > { %v6976_v1 = vpop.f32.mrb[77].mxu0 }
 0x4b7   : > { %v6977_v48 = vadd.f32 %v6976_v1, %v6975_v0  ;;  %v6978_v15 = vpop.f32.mrb[78].mxu0  ;;  %7961 = vrot.lane.b32.xlu1 %v7960_v2, %s10888_s29 }
 0x4b8   : > { %v6979_v52 = vpop.f32.mrb[79].mxu0 }
 0x4b9   : > { %v4612_v62 = vadd.f32 %v10128_v55, %v6977_v48  ;;  %v6980_v27 = vadd.f32 %v6979_v52, %v6978_v15  ;;  %7956 = vrot.lane.b32.xlu0 %v10234_v42, %s10888_s29 }
 0x4bb   : > { %v4630_v44 = vmul.f32 %v10157_v49, %v4612_v62  ;;  %v4615_v16 = vadd.f32 %v10132_v33, %v6980_v27 }
 0x4bd   : > { %v4644_v12 = vadd.f32 %v10162_v18, %v4630_v44  ;;  %v4631_v59 = vmul.f32 %v10157_v49, %v4615_v16 }
 0x4bf   : > { %v4652_v55 = vmax.f32 %v4644_v12, 0.0  ;;  %v4645_v5 = vadd.f32 %v10162_v18, %v4631_v59 }
 0x4c1   : > { %4684 = vst.msk [vmem:[#allocation4 + $0x71] sm:$0xff] %vm2196_vm3, %v4652_v55  ;;  %v4653_v20 = vmax.f32 %v4645_v5, 0.0 }
 0x4c3   : > { %4685 = vst.msk [vmem:[#allocation4 + $0x81] sm:$0xff] %vm2196_vm3, %v4653_v20 }
 0x4c7   : > { %v7932_v63 = vpop.permute.xlu1 %7931 }
 0x4c8   : > { %v7934_v11 = vunpack.i.h.bf16 %v7932_v63  ;;  %v7933_v33 = vunpack.i.l.bf16 %v7932_v63  ;;  %v10328_v7 = vld [vmem:[#allocation4 + $0x71] sm:$0xff] }
 0x4c9   : > { %v7927_v49 = vpop.permute.xlu0 %7926  ;;  %v7970_v42 = vpack.i.bf16 %v10328_v7, %v10326_v51  ;;  %v10332_v18 = vld [vmem:[#allocation4 + $0x70] sm:$0xff] }
 0x4ca   : > { %v7929_v38 = vunpack.i.h.bf16 %v7927_v49  ;;  %v10334_v54 = vld [vmem:[#allocation4 + $0x80] sm:$0xff]  ;;  %v7928_v14 = vunpack.i.l.bf16 %v7927_v49  ;;  %v4962_v60 = vsel %vm2196_vm3, %v10203_v47, %v7934_v11  ;;  %v4961_v43 = vsel %vm2196_vm3, %v4760_v36, %v7933_v33  ;;  %v8092_v47 = vld [vmem:[%s10853_s10 + $0x108] sm:$0xff]  }
 0x4cb   : > { %7971 = vrot.lane.b32.xlu1 %v7970_v42, %s10888_s29  ;;  %v7965_v40 = vpack.i.bf16 %v10334_v54, %v10332_v18  ;;  %v4993_v30 = vpack.c.bf16 %v4962_v60, %v4961_v43  ;;  %v10363_v35 = vld [vmem:[#allocation4 + $0x82] sm:$0xff]  ;;  %v10369_v21 = vld [vmem:[#allocation4 + $0x72] sm:$0xff] }
 0x4cc   : > { %v4970_v56 = vsel %vm2196_vm3, %v4800_v34, %v7929_v38  ;;  %v4969_v6 = vsel %vm2196_vm3, %v4776_v24, %v7928_v14  ;;  %v10371_v50 = vld [vmem:[#allocation4 + $0x81] sm:$0xff]  ;;  %v8000_v0 = vpack.i.bf16 %v10363_v35, %v10369_v21 }
 0x4cd   : > { %7966 = vrot.lane.b32.xlu0 %v7965_v40, %s10888_s29  ;;  %v4994_v45 = vpack.c.bf16 %v4970_v56, %v4969_v6  ;;  %v7995_v1 = vpack.i.bf16 %v4824_v57, %v10371_v50 }
 0x4cf   : > { %7981 = vrot.lane.b32.xlu1 %v7980_v29, %s10888_s29  ;;  %5273 = vmatprep.mubr.bf16.mxu0 %v4994_v45 }
 0x4d0   : > { %5274 = vmatmul.mubr.bf16.vlgmr.msra.gmra.mrb[80].mxu0 %v4993_v30 }
 0x4d1   : > { %7976 = vrot.lane.b32.xlu0 %v7945_v25, %s10888_s29  ;;  %7253 = vmatpush3.bf16.msra.mxu0 %v10281_v41  ;;  %v8094_v41 = vld [vmem:[%s10853_s10 + $0x118] sm:$0xff]  }
 0x4d2   : > { %7254 = vmatprep.subr.bf16.mxu0 %v8092_v47 }
 0x4d3   : > { %7991 = vrot.lane.b32.xlu1 %v7990_v8, %s10888_s29 }
 0x4d5   : > { %7986 = vrot.lane.b32.xlu0 %v7970_v42, %s10888_s29  ;;  %7255 = vmatpush3.bf16.msra.mxu0 %v8092_v47 }
 0x4d6   : > { %7256 = vmatprep.subr.bf16.mxu0 %v8093_v39 }
 0x4d7   : > { %8001 = vrot.lane.b32.xlu1 %v8000_v0, %s10888_s29 }
 0x4d9   : > { %7996 = vrot.lane.b32.xlu0 %v7995_v1, %s10888_s29  ;;  %7257 = vmatpush3.bf16.msra.mxu0 %v8093_v39 }
 0x4da   : > { %7258 = vmatprep.subr.bf16.mxu0 %v8094_v41 }
 0x4dd   : > { %7259 = vmatpush3.bf16.msra.mxu0 %v8094_v41 }
 0x4f6   : > { %v7942_v25 = vpop.permute.xlu1 %7941 }
 0x4f7   : > { %v7944_v48 = vunpack.i.h.bf16 %v7942_v25  ;;  %v7943_v15 = vunpack.i.l.bf16 %v7942_v25 }
 0x4f8   : > { %v7937_v52 = vpop.permute.xlu0 %7936 }
 0x4f9   : > { %v7939_v61 = vunpack.i.h.bf16 %v7937_v52  ;;  %v7938_v62 = vunpack.i.l.bf16 %v7937_v52  ;;  %v4963_v27 = vsel %vm2196_vm3, %v10205_v3, %v7943_v15  ;;  %v4964_v34 = vsel %vm2196_vm3, %v10239_v19, %v7944_v48 }
 0x4fa   : > { %v4998_v12 = vpack.c.bf16 %v4964_v34, %v4963_v27 }
 0x4fb   : > { %v4971_v2 = vsel %vm2196_vm3, %v10308_v13, %v7938_v62  ;;  %v4972_v44 = vsel %vm2196_vm3, %v10345_v28, %v7939_v61 }
 0x4fc   : > { %v4999_v16 = vpack.c.bf16 %v4972_v44, %v4971_v2 }
 0x4fe   : > { %5281 = vmatprep.mubr.bf16.mxu0 %v4999_v16  ;;  %v4997_v16 = vpack.c.bf16 %v10345_v28, %v10308_v13 }
 0x4ff   : > { %5282 = vmatmul.mubr.bf16.gmra.mrb[84].mxu0 %v4998_v12 }
 0x525   : > { %v7947_v59 = vpop.permute.xlu1 %7946 }
 0x526   : > { %v7949_v55 = vunpack.i.h.bf16 %v7947_v59  ;;  %v7948_v5 = vunpack.i.l.bf16 %v7947_v59 }
 0x527   : > { %v7952_v20 = vpop.permute.xlu0 %7951 }
 0x528   : > { %v7954_v63 = vunpack.i.h.bf16 %v7952_v20  ;;  %v7953_v11 = vunpack.i.l.bf16 %v7952_v20  ;;  %v4965_v36 = vsel %vm2196_vm3, %v10241_v37, %v7948_v5  ;;  %v4966_v49 = vsel %vm2196_vm3, %v10304_v58, %v7949_v55 }
 0x529   : > { %v7962_v33 = vpop.permute.xlu1 %7961  ;;  %v5003_v6 = vpack.c.bf16 %v4966_v49, %v4965_v36 }
 0x52a   : > { %v7964_v42 = vunpack.i.h.bf16 %v7962_v33  ;;  %v7963_v38 = vunpack.i.l.bf16 %v7962_v33  ;;  %v4973_v24 = vsel %vm2196_vm3, %v10336_v32, %v7953_v11  ;;  %v4974_v14 = vsel %vm2196_vm3, %v10357_v46, %v7954_v63 }
 0x52b   : > { %v7957_v60 = vpop.permute.xlu0 %7956  ;;  %v5004_v43 = vpack.c.bf16 %v4974_v14, %v4973_v24  ;;  %v5002_v14 = vpack.c.bf16 %v10357_v46, %v10336_v32 }
 0x52c   : > { %v7959_v40 = vunpack.i.h.bf16 %v7957_v60  ;;  %v7958_v56 = vunpack.i.l.bf16 %v7957_v60  ;;  %v4978_v29 = vsel %vm2196_vm3, %v10228_v26, %v7964_v42  ;;  %v4977_v45 = vsel %vm2196_vm3, %v10194_v17, %v7963_v38 }
 0x52d   : > { %5289 = vmatprep.mubr.bf16.mxu0 %v5004_v43  ;;  %v4995_v39 = vpack.c.bf16 %v4978_v29, %v4977_v45  ;;  %v5007_v60 = vpack.c.bf16 %v10369_v21, %v10351_v22 }
 0x52e   : > { %5290 = vmatmul.mubr.bf16.gmra.mrb[88].mxu0 %v5003_v6  ;;  %v4985_v30 = vsel %vm2196_vm3, %v10205_v3, %v7958_v56  ;;  %v4986_v47 = vsel %vm2196_vm3, %v10239_v19, %v7959_v40 }
 0x52f   : > { %v4996_v8 = vpack.c.bf16 %v4986_v47, %v4985_v30 }
 0x531   : > { %5338 = vmatprep.mubr.bf16.mxu1 %v4996_v8 }
 0x532   : > { %5339 = vmatmul.mubr.bf16.vlgmr.msra.gmra.mrb[72].mxu1 %v4995_v39 }
 0x53d   : > { %v7972_v57 = vpop.permute.xlu1 %7971 }
 0x53e   : > { %v7974_v0 = vunpack.i.h.bf16 %v7972_v57  ;;  %v7973_v41 = vunpack.i.l.bf16 %v7972_v57 }
 0x53f   : > { %v7967_v1 = vpop.permute.xlu0 %7966 }
 0x540   : > { %v7969_v26 = vunpack.i.h.bf16 %v7967_v1  ;;  %v7968_v25 = vunpack.i.l.bf16 %v7967_v1  ;;  %v4967_v17 = vsel %vm2196_vm3, %v10306_v4, %v7973_v41  ;;  %v4968_v3 = vsel %vm2196_vm3, %v10332_v18, %v7974_v0 }
 0x541   : > { %v7982_v48 = vpop.permute.xlu1 %7981  ;;  %v5008_v44 = vpack.c.bf16 %v4968_v3, %v4967_v17  ;;  %v8098_v17 = vld [vmem:[%s10856_s13 + $0xc0] sm:$0xff]  }
 0x542   : > { %v7984_v15 = vunpack.i.h.bf16 %v7982_v48  ;;  %v7983_v52 = vunpack.i.l.bf16 %v7982_v48  ;;  %v4975_v19 = vsel %vm2196_vm3, %v10351_v22, %v7968_v25  ;;  %v4976_v61 = vsel %vm2196_vm3, %v10369_v21, %v7969_v26  ;;  %v4832_v21 = vld [vmem:[#allocation4 + $0x92] sm:$0xff]  ;;  %7097 = vmatprep.subr.bf16.mxu0 %v8098_v17 }
 0x543   : > { %v7977_v62 = vpop.permute.xlu0 %7976  ;;  %v5009_v27 = vpack.c.bf16 %v4976_v61, %v4975_v19  ;;  %v8096_v25 = vld [vmem:[%s10856_s13] sm:$0xff]   ;;  %v8097_v48 = vld [vmem:[%s10856_s13 + $0x48] sm:$0xff]   ;;  %v8101_v19 = vld [vmem:[%s10856_s13 + $0x50] sm:$0xff]  }
 0x544   : > { %v7979_v34 = vunpack.i.h.bf16 %v7977_v62  ;;  %v7978_v2 = vunpack.i.l.bf16 %v7977_v62  ;;  %v4979_v12 = vsel %vm2196_vm3, %v10230_v53, %v7983_v52  ;;  %v4980_v59 = vsel %vm2196_vm3, %v10298_v10, %v7984_v15  ;;  %v8100_v3 = vld [vmem:[%s10856_s13 + $0x80] sm:$0xff]   ;;  %v8102_v15 = vld [vmem:[%s10856_s13 + $0xc8] sm:$0xff]   ;;  %v8106_v62 = vld [vmem:[%s10856_s13 + $0xd0] sm:$0xff]  }
 0x545   : > { %5297 = vmatprep.mubr.bf16.mxu0 %v5009_v27  ;;  %v7992_v55 = vpop.permute.xlu1 %7991  ;;  %v5000_v28 = vpack.c.bf16 %v4980_v59, %v4979_v12  ;;  %v8099_v52 = vld [vmem:[%s10856_s13 + $0x8] sm:$0xff]   ;;  %v8103_v27 = vld [vmem:[%s10856_s13 + $0x10] sm:$0xff]   ;;  %v8109_v12 = vld [vmem:[%s10856_s13 + $0x60] sm:$0xff]  }
 0x546   : > { %5298 = vmatmul.mubr.bf16.gmra.mrb[92].mxu0 %v5008_v44  ;;  %v4987_v5 = vsel %vm2196_vm3, %v10241_v37, %v7978_v2  ;;  %v4988_v20 = vsel %vm2196_vm3, %v10304_v58, %v7979_v34  ;;  %v7994_v36 = vunpack.i.h.bf16 %v7992_v55  ;;  %v7993_v53 = vunpack.i.l.bf16 %v7992_v55  ;;  %v4816_v58 = vld [vmem:[#allocation4 + $0x90] sm:$0xff]  ;;  %v8104_v61 = vld [vmem:[%s10856_s13 + $0x88] sm:$0xff]   ;;  %v8105_v34 = vld [vmem:[%s10856_s13 + $0x58] sm:$0xff]  }
 0x547   : > { %v7987_v63 = vpop.permute.xlu0 %7986  ;;  %7260 = vmatprep.mubr.msk.bf16.mxu0 %vm2196_vm3, %v4997_v16  ;;  %v5001_v11 = vpack.c.bf16 %v4988_v20, %v4987_v5  ;;  %v8108_v2 = vld [vmem:[%s10856_s13 + $0x90] sm:$0xff]   ;;  %v8110_v44 = vld [vmem:[%s10856_s13 + $0xd8] sm:$0xff]   ;;  %v8114_v55 = vld [vmem:[%s10856_s13 + $0xe0] sm:$0xff]  }
 0x548   : > { %v7989_v33 = vunpack.i.h.bf16 %v7987_v63  ;;  %v7988_v13 = vunpack.i.l.bf16 %v7987_v63  ;;  %v4981_v43 = vsel %vm2196_vm3, %v10300_v31, %v7993_v53  ;;  %v5012_v31 = vpack.c.bf16 %v4832_v21, %v10363_v35  ;;  %v8107_v16 = vld [vmem:[%s10856_s13 + $0x18] sm:$0xff]   ;;  %v8111_v5 = vld [vmem:[%s10856_s13 + $0x20] sm:$0xff]   ;;  %v8113_v20 = vld [vmem:[%s10856_s13 + $0x68] sm:$0xff]  }
 0x549   : > { %5346 = vmatprep.mubr.bf16.mxu1 %v5001_v11  ;;  %v8002_v40 = vpop.permute.xlu1 %8001  ;;  %v8112_v59 = vld [vmem:[%s10856_s13 + $0x98] sm:$0xff]   ;;  %v8116_v63 = vld [vmem:[%s10856_s13 + $0xa0] sm:$0xff]   ;;  %v8118_v11 = vld [vmem:[%s10856_s13 + $0xe8] sm:$0xff]  }
 0x54a   : > { %5347 = vmatmul.mubr.bf16.gmra.mrb[76].mxu1 %v5000_v28  ;;  %v4989_v10 = vsel %vm2196_vm3, %v10306_v4, %v7988_v13  ;;  %v4990_v37 = vsel %vm2196_vm3, %v10332_v18, %v7989_v33  ;;  %v4982_v4 = vsel %vm2196_vm3, %v10326_v51, %v7994_v36  ;;  %v8004_v46 = vunpack.i.h.bf16 %v8002_v40  ;;  %v8115_v33 = vld [vmem:[%s10856_s13 + $0x28] sm:$0xff]   ;;  %v8117_v13 = vld [vmem:[%s10856_s13 + $0x70] sm:$0xff]  }
 0x54b   : > { %v7997_v49 = vpop.permute.xlu0 %7996  ;;  %v5006_v42 = vpack.c.bf16 %v4990_v37, %v4989_v10  ;;  %v5005_v32 = vpack.c.bf16 %v4982_v4, %v4981_v43  ;;  %v8003_v6 = vunpack.i.l.bf16 %v8002_v40  ;;  %v8120_v28 = vld [vmem:[%s10856_s13 + $0xa8] sm:$0xff]   ;;  %v8122_v36 = vld [vmem:[%s10856_s13 + $0xf0] sm:$0xff]   ;;  %v8121_v10 = vld [vmem:[%s10856_s13 + $0x78] sm:$0xff]  }
 0x54c   : > { %v7999_v38 = vunpack.i.h.bf16 %v7997_v49  ;;  %v7998_v24 = vunpack.i.l.bf16 %v7997_v49  ;;  %v4984_v29 = vsel %vm2196_vm3, %v10371_v50, %v8004_v46  ;;  %v8095_v50 = vld [vmem:[%s10856_s13 + $0x40] sm:$0xff]   ;;  %v8119_v53 = vld [vmem:[%s10856_s13 + $0x30] sm:$0xff]  }
 0x54d   : > { %5354 = vmatprep.mubr.bf16.mxu1 %v5006_v42  ;;  %v4983_v51 = vsel %vm2196_vm3, %v10328_v7, %v8003_v6  ;;  %7075 = vmatprep.subr.bf16.mxu1 %v8095_v50 }
 0x54e   : > { %7261 = vmatmul.mubr.msk.bf16.vlgmr.msra.gmra.mrb[96].mxu0 %vm2196_vm3, %v5002_v14  ;;  %v4991_v18 = vsel %vm2196_vm3, %v10334_v54, %v7998_v24  ;;  %v4992_v56 = vsel %vm2196_vm3, %v4816_v58, %v7999_v38  ;;  %v5010_v54 = vpack.c.bf16 %v4984_v29, %v4983_v51  ;;  %7076 = vmatpush3.bf16.msra.mxu1 %v8096_v25 }
 0x54f   : > { %7264 = vmatprep.mubr.msk.bf16.mxu0 %vm2196_vm3, %v5007_v60  ;;  %v5011_v22 = vpack.c.bf16 %v4992_v56, %v4991_v18  ;;  %7077 = vmatprep.subr.bf16.mxu1 %v8097_v48  ;;  %v10556_v48 = vld [vmem:[%s10855_s12] ss:$0 sm:$0xff] }
 0x550   : > { %7098 = vmatpush3.bf16.msra.mxu0 %v8100_v3 }
 0x551   : > { %7099 = vmatprep.subr.bf16.mxu0 %v8102_v15 }
 0x552   : > { %5355 = vmatmul.mubr.bf16.gmra.mrb[80].mxu1 %v5005_v32 }
 0x553   : > { %5362 = vmatprep.mubr.bf16.mxu1 %v5011_v22  ;;  %7078 = vmatpush3.bf16.msra.mxu1 %v8099_v52 }
 0x554   : > { %7079 = vmatprep.subr.bf16.mxu1 %v8101_v19  ;;  %7100 = vmatpush3.bf16.msra.mxu0 %v8104_v61 }
 0x555   : > { %7101 = vmatprep.subr.bf16.mxu0 %v8106_v62 }
 0x556   : > { %7265 = vmatmul.mubr.msk.bf16.gmra.mrb[100].mxu0 %vm2196_vm3, %v5012_v31 }
 0x557   : > { %7080 = vmatpush3.bf16.msra.mxu1 %v8103_v27 }
 0x558   : > { %7081 = vmatprep.subr.bf16.mxu1 %v8105_v34  ;;  %7102 = vmatpush3.bf16.msra.mxu0 %v8108_v2 }
 0x559   : > { %7103 = vmatprep.subr.bf16.mxu0 %v8110_v44 }
 0x55a   : > { %5363 = vmatmul.mubr.bf16.gmra.mrb[84].mxu1 %v5010_v54 }
 0x55b   : > { %7082 = vmatpush3.bf16.msra.mxu1 %v8107_v16 }
 0x55c   : > { %7083 = vmatprep.subr.bf16.mxu1 %v8109_v12  ;;  %7104 = vmatpush3.bf16.msra.mxu0 %v8112_v59 }
 0x55d   : > { %7105 = vmatprep.subr.bf16.mxu0 %v8114_v55 }
 0x55f   : > { %7084 = vmatpush3.bf16.msra.mxu1 %v8111_v5 }
 0x560   : > { %7085 = vmatprep.subr.bf16.mxu1 %v8113_v20  ;;  %7106 = vmatpush3.bf16.msra.mxu0 %v8116_v63 }
 0x561   : > { %7107 = vmatprep.subr.bf16.mxu0 %v8118_v11 }
 0x563   : > { %7086 = vmatpush3.bf16.msra.mxu1 %v8115_v33 }
 0x564   : > { %7087 = vmatprep.subr.bf16.mxu1 %v8117_v13  ;;  %7108 = vmatpush3.bf16.msra.mxu0 %v8120_v28 }
 0x565   : > { %7109 = vmatprep.subr.bf16.mxu0 %v8122_v36 }
 0x567   : > { %7088 = vmatpush3.bf16.msra.mxu1 %v8119_v53 }
 0x568   : > { %7089 = vmatprep.subr.bf16.mxu1 %v8121_v10 }
 0x5a3   : > { %v7003_v45 = vpop.f32.mrb[80].mxu0 }
 0x5a4   : > { %v7004_v30 = vpop.f32.mrb[81].mxu0 }
 0x5a5   : > { %v10448_v47 = vadd.f32 %v7004_v30, %v7003_v45  ;;  %v7006_v8 = vpop.f32.mrb[82].mxu0 }
 0x5a6   : > { %v7007_v39 = vpop.f32.mrb[83].mxu0 }
 0x5a7   : > { %v10450_v57 = vadd.f32 %v7007_v39, %v7006_v8 }
 0x5d2   : > { %v7009_v0 = vpop.f32.mrb[84].mxu0 }
 0x5d3   : > { %v7010_v35 = vpop.f32.mrb[85].mxu0 }
 0x5d4   : > { %v10452_v41 = vadd.f32 %v7010_v35, %v7009_v0  ;;  %v7012_v7 = vpop.f32.mrb[86].mxu0 }
 0x5d5   : > { %v7013_v1 = vpop.f32.mrb[87].mxu0 }
 0x5d6   : > { %v10454_v26 = vadd.f32 %v7013_v1, %v7012_v7 }
 0x601   : > { %v7015_v37 = vpop.f32.mrb[88].mxu0 }
 0x602   : > { %v7016_v49 = vpop.f32.mrb[89].mxu0 }
 0x603   : > { %v7017_v42 = vadd.f32 %v7016_v49, %v7015_v37  ;;  %v7018_v58 = vpop.f32.mrb[90].mxu0 }
 0x604   : > { %v7019_v38 = vpop.f32.mrb[91].mxu0 }
 0x605   : > { %v7020_v24 = vadd.f32 %v7019_v38, %v7018_v58  ;;  %v7043_v14 = vpop.f32.mrb[72].mxu1 }
 0x606   : > { %v7044_v60 = vpop.f32.mrb[73].mxu1 }
 0x607   : > { %v7045_v43 = vadd.f32 %v7044_v60, %v7043_v14  ;;  %v7046_v4 = vpop.f32.mrb[74].mxu1 }
 0x608   : > { %v7047_v40 = vpop.f32.mrb[75].mxu1 }
 0x609   : > { %v7048_v18 = vadd.f32 %v7047_v40, %v7046_v4  ;;  %v5341_v56 = vadd.f32 %v7045_v43, %v10448_v47  ;;  %v10550_v47 = vld [vmem:[%s10854_s11] ss:$0 sm:$0xff] }
 0x60b   : > { %v5344_v32 = vadd.f32 %v7048_v18, %v10450_v57 }
 0x619   : > { %v7021_v46 = vpop.f32.mrb[92].mxu0 }
 0x61a   : > { %v7022_v6 = vpop.f32.mrb[93].mxu0 }
 0x61b   : > { %v10542_v22 = vadd.f32 %v7022_v6, %v7021_v46  ;;  %v7024_v21 = vpop.f32.mrb[94].mxu0 }
 0x61c   : > { %v7025_v31 = vpop.f32.mrb[95].mxu0 }
 0x61d   : > { %v10544_v51 = vadd.f32 %v7025_v31, %v7024_v21  ;;  %v7049_v29 = vpop.f32.mrb[76].mxu1 }
 0x61e   : > { %v7050_v54 = vpop.f32.mrb[77].mxu1 }
 0x61f   : > { %v7051_v45 = vadd.f32 %v7050_v54, %v7049_v29  ;;  %v7052_v30 = vpop.f32.mrb[78].mxu1 }
 0x620   : > { %v7053_v8 = vpop.f32.mrb[79].mxu1 }
 0x621   : > { %v7054_v39 = vadd.f32 %v7053_v8, %v7052_v30  ;;  %v5349_v0 = vadd.f32 %v7051_v45, %v10452_v41  ;;  %v7262_v35 = vpop.f32.mrb[96].mxu0 }
 0x622   : > { %v5405_v57 = vpop.f32.mrb[97].mxu0 }
 0x623   : > { %v5414_v7 = vadd.f32 %v7262_v35, %v5349_v0  ;;  %v5406_v1 = vadd.f32 %v5405_v57, %v5341_v56  ;;  %v5352_v50 = vadd.f32 %v7054_v39, %v10454_v26  ;;  %v7263_v25 = vpop.f32.mrb[98].mxu0 }
 0x624   : > { %v5408_v17 = vpop.f32.mrb[99].mxu0 }
 0x625   : > { %v5444_v41 = vmul.f32 %v10550_v47, %v5414_v7  ;;  %v5442_v3 = vmul.f32 %v10550_v47, %v5406_v1  ;;  %v5417_v15 = vadd.f32 %v7263_v25, %v5352_v50  ;;  %v5409_v52 = vadd.f32 %v5408_v17, %v5344_v32  ;;  %v7055_v19 = vpop.f32.mrb[80].mxu1 }
 0x626   : > { %v7056_v61 = vpop.f32.mrb[81].mxu1 }
 0x627   : > { %v5458_v62 = vadd.f32 %v10556_v48, %v5444_v41  ;;  %v5456_v27 = vadd.f32 %v10556_v48, %v5442_v3  ;;  %v5445_v26 = vmul.f32 %v10550_v47, %v5417_v15  ;;  %v5443_v34 = vmul.f32 %v10550_v47, %v5409_v52  ;;  %v7058_v2 = vpop.f32.mrb[82].mxu1 }
 0x628   : > { %v7057_v44 = vadd.f32 %v7056_v61, %v7055_v19  ;;  %v7059_v16 = vpop.f32.mrb[83].mxu1 }
 0x629   : > { %v5466_v12 = vmax.f32 %v5458_v62, 0.0  ;;  %v5464_v59 = vmax.f32 %v5456_v27, 0.0  ;;  %v5459_v55 = vadd.f32 %v10556_v48, %v5445_v26  ;;  %v5457_v5 = vadd.f32 %v10556_v48, %v5443_v34  ;;  %v7266_v20 = vpop.f32.mrb[100].mxu0 }
 0x62a   : > { %v7060_v63 = vadd.f32 %v7059_v16, %v7058_v2  ;;  %v5357_v11 = vadd.f32 %v7057_v44, %v7017_v42  ;;  %v5421_v33 = vpop.f32.mrb[101].mxu0  ;;  %v8123_v16 = vld [vmem:[%s10856_s13 + $0x38] sm:$0xff]  }
 0x62b   : > { %v5467_v13 = vmax.f32 %v5459_v55, 0.0  ;;  %v5465_v28 = vmax.f32 %v5457_v5, 0.0  ;;  %v7267_v36 = vpop.f32.mrb[102].mxu0  ;;  %v5475_v49 = vsel %vm2196_vm3, %v5466_v12, -inf  ;;  %v5472_v58 = vsel %vm2196_vm3, %v5464_v59, -inf  ;;  %v8124_v12 = vld [vmem:[%s10856_s13 + $0xb0] sm:$0xff]   ;;  %7090 = vmatpush3.bf16.msra.mxu1 %v8123_v16 }
 0x62c   : > { %v5422_v53 = vadd.f32 %v5421_v33, %v5357_v11  ;;  %v5360_v10 = vadd.f32 %v7060_v63, %v7020_v24  ;;  %v5424_v37 = vpop.f32.mrb[103].mxu0  ;;  %v8125_v59 = vld [vmem:[%s10856_s13 + $0xf8] sm:$0xff]   ;;  %7110 = vmatpush3.bf16.msra.mxu0 %v8124_v12 }
 0x62d   : > { %v5476_v38 = vsel %vm2196_vm3, %v5467_v13, -inf  ;;  %v5473_v14 = vsel %vm2196_vm3, %v5465_v28, -inf  ;;  %v7061_v60 = vpop.f32.mrb[84].mxu1  ;;  %7111 = vmatprep.subr.bf16.mxu0 %v8125_v59 }
 0x62e   : > { %v5477_v43 = vmax.f32 %v5475_v49, %v5476_v38  ;;  %v5474_v4 = vmax.f32 %v5472_v58, %v5473_v14  ;;  %v5446_v42 = vmul.f32 %v10550_v47, %v5422_v53  ;;  %v5425_v40 = vadd.f32 %v5424_v37, %v5360_v10  ;;  %v7062_v18 = vpop.f32.mrb[85].mxu1  ;;  %v8127_v38 = vld [vmem:[%s10856_s13 + $0xb8] sm:$0xff]  }
 0x62f   : > { %v7063_v56 = vadd.f32 %v7062_v18, %v7061_v60  ;;  %v7064_v32 = vpop.f32.mrb[86].mxu1 }
 0x630   : > { %v5505_v46 = vcombine.high %v5477_v43, %v5477_v43  ;;  %v10572_v24 = vrot.slane %v5477_v43, %v9458_v9  ;;  %v5488_v6 = vcombine.high %v5474_v4, %v5474_v4  ;;  %v10575_v21 = vrot.slane %v5474_v4, %v9458_v9  ;;  %v7065_v31 = vpop.f32.mrb[87].mxu1  ;;  %7112 = vmatpush3.bf16.msra.mxu0 %v8127_v38 }
 0x631   : > { %v5460_v29 = vadd.f32 %v10556_v48, %v5446_v42  ;;  %v5447_v54 = vmul.f32 %v10550_v47, %v5425_v40  ;;  %v5365_v45 = vadd.f32 %v7063_v56, %v10542_v22  ;;  %v7066_v30 = vadd.f32 %v7065_v31, %v7064_v32 }
 0x632   : > { %v10581_v8 = vrot.slane %v5505_v46, %v9458_v9  ;;  %v5520_v39 = vcombine.high %v10572_v24, %v10572_v24  ;;  %v10586_v0 = vrot.slane %v5488_v6, %v9458_v9  ;;  %v5503_v35 = vcombine.high %v10575_v21, %v10575_v21 }
 0x633   : > { %v5468_v57 = vmax.f32 %v5460_v29, 0.0  ;;  %v5461_v7 = vadd.f32 %v10556_v48, %v5447_v54  ;;  %v5430_v1 = vadd.f32 %v7266_v20, %v5365_v45  ;;  %v5368_v50 = vadd.f32 %v7066_v30, %v10544_v51 }
 0x634   : > { %v5521_v22 = vcombine.high %v10581_v8, %v10581_v8  ;;  %v5504_v25 = vcombine.high %v10586_v0, %v10586_v0  ;;  %v5579_v17 = vsel %vm4655_vm12, %v5503_v35, -inf  ;;  %v5607_v41 = vsel %vm4655_vm12, %v5520_v39, -inf }
 0x635   : > { %v5478_v3 = vsel %vm2196_vm3, %v5468_v57, -inf  ;;  %v5469_v15 = vmax.f32 %v5461_v7, 0.0  ;;  %v5448_v52 = vmul.f32 %v10550_v47, %v5430_v1  ;;  %v5433_v19 = vadd.f32 %v7267_v36, %v5368_v50 }
 0x636   : > { %v5580_v61 = vrot.slane %v5579_v17, 4  ;;  %v5593_v62 = vsel %vm4655_vm12, %v5504_v25, -inf  ;;  %v5608_v51 = vrot.slane %v5607_v41, 4  ;;  %v5621_v27 = vsel %vm4655_vm12, %v5521_v22, -inf }
 0x637   : > { %v5479_v26 = vsel %vm2196_vm3, %v5469_v15, -inf  ;;  %v5462_v34 = vadd.f32 %v10556_v48, %v5448_v52  ;;  %v5449_v2 = vmul.f32 %v10550_v47, %v5433_v19  ;;  %v5594_v44 = vrot.slane %v5593_v62, 4  ;;  %v8126_v47 = vld [vmem:[%s10856_s13 + $0x140] sm:$0xff]  }
 0x638   : > { %v5480_v55 = vmax.f32 %v5478_v3, %v5479_v26  ;;  %v5581_v5 = vmax.f32 %v5579_v17, %v5580_v61  ;;  %v5609_v20 = vmax.f32 %v5607_v41, %v5608_v51  ;;  %v5622_v63 = vrot.slane %v5621_v27, 4  ;;  %7119 = vmatprep.subr.bf16.mxu1 %v8126_v47 }
 0x639   : > { %v5470_v11 = vmax.f32 %v5462_v34, 0.0  ;;  %v5463_v33 = vadd.f32 %v10556_v48, %v5449_v2  ;;  %v5595_v13 = vmax.f32 %v5593_v62, %v5594_v44  ;;  %v8129_v48 = vld [vmem:[%s10856_s13 + $0x1c0] sm:$0xff]  }
 0x63a   : > { %v5522_v28 = vcombine.high %v5480_v55, %v5480_v55  ;;  %v10619_v36 = vrot.slane %v5480_v55, %v9458_v9  ;;  %v5582_v53 = vrot.slane %v5581_v5, 2  ;;  %v5610_v10 = vrot.slane %v5609_v20, 2  ;;  %7141 = vmatprep.subr.bf16.mxu0 %v8129_v48 }
 0x63b   : > { %v5471_v37 = vmax.f32 %v5463_v33, 0.0  ;;  %v5596_v49 = vrot.slane %v5595_v13, 2  ;;  %v5623_v58 = vmax.f32 %v5621_v27, %v5622_v63  ;;  %v5481_v42 = vsel %vm2196_vm3, %v5470_v11, -inf }
 0x63c   : > { %v10628_v14 = vrot.slane %v5522_v28, %v9458_v9  ;;  %v5537_v60 = vcombine.high %v10619_v36, %v10619_v36  ;;  %v5583_v43 = vmax.f32 %v5581_v5, %v5582_v53  ;;  %v5611_v4 = vmax.f32 %v5609_v20, %v5610_v10 }
 0x63d   : > { %v5482_v40 = vsel %vm2196_vm3, %v5471_v37, -inf  ;;  %v5597_v18 = vmax.f32 %v5595_v13, %v5596_v49  ;;  %v5624_v56 = vrot.slane %v5623_v58, 2 }
 0x63e   : > { %v5538_v32 = vcombine.high %v10628_v14, %v10628_v14  ;;  %v5483_v46 = vmax.f32 %v5481_v42, %v5482_v40  ;;  %v5584_v6 = vrot.slane %v5583_v43, 1  ;;  %v5612_v31 = vrot.slane %v5611_v4, 1 }
 0x63f   : > { %v5598_v29 = vrot.slane %v5597_v18, 1  ;;  %v5625_v54 = vmax.f32 %v5623_v58, %v5624_v56  ;;  %v5635_v45 = vsel %vm4655_vm12, %v5537_v60, -inf  ;;  %v5572_v42 = vsel %vm4655_vm12, %v10575_v21, -inf }
 0x640   : > { %v5539_v30 = vcombine.high %v5483_v46, %v5483_v46  ;;  %v10638_v39 = vrot.slane %v5483_v46, %v9458_v9  ;;  %v5585_v35 = vmax.f32 %v5583_v43, %v5584_v6  ;;  %v5636_v1 = vrot.slane %v5635_v45, 4 }
 0x641   : > { %v5599_v57 = vmax.f32 %v5597_v18, %v5598_v29  ;;  %v5626_v7 = vrot.slane %v5625_v54, 1  ;;  %v5649_v50 = vsel %vm4655_vm12, %v5538_v32, -inf  ;;  %v5613_v17 = vmax.f32 %v5611_v4, %v5612_v31 }
 0x642   : > { %v10642_v22 = vrot.slane %v5539_v30, %v9458_v9  ;;  %v5685_v25 = vpack.c.bf16 %v5585_v35, %v5585_v35  ;;  %v5650_v41 = vrot.slane %v5649_v50, 4  ;;  %v5637_v52 = vmax.f32 %v5635_v45, %v5636_v1 }
 0x643   : > { %v5687_v3 = vpack.c.bf16 %v5599_v57, %v5599_v57  ;;  %v5627_v15 = vmax.f32 %v5625_v54, %v5626_v7  ;;  %v5554_v19 = vcombine.high %v10638_v39, %v10638_v39  ;;  %v5689_v27 = vpack.c.bf16 %v5613_v17, %v5613_v17 }
 0x644   : > { %5701 = vrot.lane.b32.xlu1 %v5685_v25, %s10888_s29  ;;  %v5651_v61 = vmax.f32 %v5649_v50, %v5650_v41  ;;  %v5555_v62 = vcombine.high %v10642_v22, %v10642_v22  ;;  %v5638_v51 = vrot.slane %v5637_v52, 2  ;;  %v5586_v4 = vsel %vm4655_vm12, %v10586_v0, -inf }
 0x645   : > { %5704 = vrot.lane.b32.xlu0 %v5687_v3, %s10888_s29  ;;  %v5663_v9 = vsel %vm4655_vm12, %v5554_v19, -inf  ;;  %v5691_v44 = vpack.c.bf16 %v5627_v15, %v5627_v15  ;;  %v5587_v40 = vrot.slane %v5586_v4, 4  ;;  %v5573_v18 = vrot.slane %v5572_v42, 4 }
 0x646   : > { %v5652_v26 = vrot.slane %v5651_v61, 2  ;;  %v5664_v34 = vrot.slane %v5663_v9, 4  ;;  %v5677_v2 = vsel %vm4655_vm12, %v5555_v62, -inf  ;;  %v5639_v16 = vmax.f32 %v5637_v52, %v5638_v51 }
 0x647   : > { %v5678_v12 = vrot.slane %v5677_v2, 4  ;;  %v5614_v56 = vsel %vm4655_vm12, %v10581_v8, -inf  ;;  %v5600_v32 = vsel %vm4655_vm12, %v10572_v24, -inf  ;;  %v5588_v46 = vmax.f32 %v5586_v4, %v5587_v40  ;;  %v8136_v4 = vld [vmem:[%s10856_s13 + $0x188] sm:$0xff]  }
 0x648   : > { %5707 = vrot.lane.b32.xlu1 %v5689_v27, %s10888_s29  ;;  %v5653_v59 = vmax.f32 %v5651_v61, %v5652_v26  ;;  %v5665_v55 = vmax.f32 %v5663_v9, %v5664_v34  ;;  %v5640_v5 = vrot.slane %v5639_v16, 1  ;;  %v5615_v6 = vrot.slane %v5614_v56, 4 }
 0x649   : > { %5710 = vrot.lane.b32.xlu0 %v5691_v44, %s10888_s29  ;;  %v5679_v20 = vmax.f32 %v5677_v2, %v5678_v12  ;;  %v5574_v31 = vmax.f32 %v5572_v42, %v5573_v18  ;;  %v5601_v29 = vrot.slane %v5600_v32, 4  ;;  %v5589_v54 = vrot.slane %v5588_v46, 2  ;;  %v8128_v12 = vld [vmem:[%s10856_s13 + $0x100] sm:$0xff]   ;;  %v8137_v42 = vld [vmem:[%s10856_s13 + $0x158] sm:$0xff]  }
 0x64a   : > { %v5654_v63 = vrot.slane %v5653_v59, 1  ;;  %v5666_v47 = vrot.slane %v5665_v55, 2  ;;  %v5641_v11 = vmax.f32 %v5639_v16, %v5640_v5  ;;  %v5616_v45 = vmax.f32 %v5614_v56, %v5615_v6  ;;  %v8138_v56 = vld [vmem:[%s10856_s13 + $0x1d0] sm:$0xff]  }
 0x64b   : > { %v5680_v33 = vrot.slane %v5679_v20, 2  ;;  %v5642_v0 = vsel %vm4655_vm12, %v10628_v14, -inf  ;;  %v5575_v30 = vrot.slane %v5574_v31, 2  ;;  %v5602_v35 = vmax.f32 %v5600_v32, %v5601_v29 }
 0x64c   : > { %v5655_v13 = vmax.f32 %v5653_v59, %v5654_v63  ;;  %v5667_v28 = vmax.f32 %v5665_v55, %v5666_v47  ;;  %v5693_v53 = vpack.c.bf16 %v5641_v11, %v5641_v11  ;;  %v5643_v21 = vrot.slane %v5642_v0, 4  ;;  %v8130_v55 = vld [vmem:[%s10856_s13 + $0x148] sm:$0xff]  }
 0x64d   : > { %v5681_v10 = vmax.f32 %v5679_v20, %v5680_v33  ;;  %v5590_v57 = vmax.f32 %v5588_v46, %v5589_v54  ;;  %v5617_v7 = vrot.slane %v5616_v45, 2  ;;  %v5576_v1 = vmax.f32 %v5574_v31, %v5575_v30  ;;  %v8139_v54 = vld [vmem:[%s10856_s13 + $0x118] sm:$0xff]  }
 0x64e   : > { %v5695_v37 = vpack.c.bf16 %v5655_v13, %v5655_v13  ;;  %v5668_v49 = vrot.slane %v5667_v28, 1  ;;  %5713 = vrot.lane.b32.xlu1 %v5693_v53, %s10888_s29  ;;  %v5603_v50 = vrot.slane %v5602_v35, 2  ;;  %v5670_v8 = vsel %vm4655_vm12, %v10642_v22, -inf  ;;  %v8132_v53 = vld [vmem:[%s10856_s13 + $0x180] sm:$0xff]  }
 0x64f   : > { %v5682_v58 = vrot.slane %v5681_v10, 1  ;;  %v5644_v24 = vmax.f32 %v5642_v0, %v5643_v21  ;;  %v5591_v25 = vrot.slane %v5590_v57, 1  ;;  %v5618_v17 = vmax.f32 %v5616_v45, %v5617_v7  ;;  %v8141_v45 = vld [vmem:[%s10856_s13 + $0x160] sm:$0xff]   ;;  %v8142_v0 = vld [vmem:[%s10856_s13 + $0x1d8] sm:$0xff]  }
 0x650   : > { %5716 = vrot.lane.b32.xlu0 %v5695_v37, %s10888_s29  ;;  %v5669_v38 = vmax.f32 %v5667_v28, %v5668_v49  ;;  %v5671_v41 = vrot.slane %v5670_v8, 4  ;;  %v5577_v3 = vrot.slane %v5576_v1, 1  ;;  %v5604_v15 = vmax.f32 %v5602_v35, %v5603_v50  ;;  %v8131_v28 = vld [vmem:[%s10856_s13 + $0x108] sm:$0xff]   ;;  %v8133_v49 = vld [vmem:[%s10856_s13 + $0x150] sm:$0xff]   ;;  %v8143_v7 = vld [vmem:[%s10856_s13 + $0x120] sm:$0xff]  }
 0x651   : > { %v5683_v48 = vmax.f32 %v5681_v10, %v5682_v58  ;;  %v5645_v52 = vrot.slane %v5644_v24, 2  ;;  %v5592_v19 = vmax.f32 %v5590_v57, %v5591_v25  ;;  %v5619_v61 = vrot.slane %v5618_v17, 1  ;;  %v8134_v58 = vld [vmem:[%s10856_s13 + $0x1c8] sm:$0xff]  }
 0x652   : > { %v5697_v60 = vpack.c.bf16 %v5669_v38, %v5669_v38  ;;  %v5672_v14 = vmax.f32 %v5670_v8, %v5671_v41  ;;  %v5578_v62 = vmax.f32 %v5576_v1, %v5577_v3  ;;  %v5605_v51 = vrot.slane %v5604_v15, 1  ;;  %v8144_v1 = vld [vmem:[%s10856_s13 + $0x198] sm:$0xff]   ;;  %v8145_v8 = vld [vmem:[%s10856_s13 + $0x168] sm:$0xff]   ;;  %v8148_v3 = vld [vmem:[%s10856_s13 + $0x1a0] sm:$0xff]  }
 0x653   : > { %v5699_v43 = vpack.c.bf16 %v5683_v48, %v5683_v48  ;;  %v5646_v9 = vmax.f32 %v5644_v24, %v5645_v52  ;;  %v5686_v26 = vpack.c.bf16 %v5592_v19, %v5592_v19  ;;  %v5620_v34 = vmax.f32 %v5618_v17, %v5619_v61  ;;  %v8146_v24 = vld [vmem:[%s10856_s13 + $0x1e0] sm:$0xff]   ;;  %v8147_v41 = vld [vmem:[%s10856_s13 + $0x128] sm:$0xff]  }
 0x654   : > { %5719 = vrot.lane.b32.xlu1 %v5697_v60, %s10888_s29  ;;  %v5673_v2 = vrot.slane %v5672_v14, 2  ;;  %v5684_v44 = vpack.c.bf16 %v5578_v62, %v5578_v62  ;;  %v5606_v22 = vmax.f32 %v5604_v15, %v5605_v51  ;;  %v5628_v10 = vsel %vm4655_vm12, %v10619_v36, -inf  ;;  %v8135_v36 = vld [vmem:[%s10856_s13 + $0x110] sm:$0xff]   ;;  %v8150_v52 = vld [vmem:[%s10856_s13 + $0x1e8] sm:$0xff]   ;;  %v8153_v51 = vld [vmem:[%s10856_s13 + $0x178] sm:$0xff]  }
 0x655   : > { %5722 = vrot.lane.b32.xlu0 %v5699_v43, %s10888_s29  ;;  %v5647_v20 = vrot.slane %v5646_v9, 1  ;;  %v5690_v47 = vpack.c.bf16 %v5620_v34, %v5620_v34  ;;  %v5629_v43 = vrot.slane %v5628_v10, 4  ;;  %v5656_v40 = vsel %vm4655_vm12, %v10638_v39, -inf  ;;  %v8140_v39 = vld [vmem:[%s10856_s13 + $0x190] sm:$0xff]   ;;  %v8152_v62 = vld [vmem:[%s10856_s13 + $0x1a8] sm:$0xff]   ;;  %v8155_v34 = vld [vmem:[%s10856_s13 + $0x138] sm:$0xff]  }
 0x656   : > { %v5674_v11 = vmax.f32 %v5672_v14, %v5673_v2  ;;  %v5688_v33 = vpack.c.bf16 %v5606_v22, %v5606_v22  ;;  %v5657_v29 = vrot.slane %v5656_v40, 4  ;;  %v8149_v15 = vld [vmem:[%s10856_s13 + $0x170] sm:$0xff]  }
 0x657   : > { %v5648_v48 = vmax.f32 %v5646_v9, %v5647_v20  ;;  %v5630_v6 = vmax.f32 %v5628_v10, %v5629_v43  ;;  %v8151_v14 = vld [vmem:[%s10856_s13 + $0x130] sm:$0xff]  }
 0x658   : > { %v5675_v60 = vrot.slane %v5674_v11, 1  ;;  %v5658_v21 = vmax.f32 %v5656_v40, %v5657_v29  ;;  %v8154_v9 = vld [vmem:[%s10856_s13 + $0x1f0] sm:$0xff]  }
 0x659   : > { %v5694_v18 = vpack.c.bf16 %v5648_v48, %v5648_v48  ;;  %v5631_v35 = vrot.slane %v5630_v6, 2  ;;  %v8156_v2 = vld [vmem:[%s10856_s13 + $0x1b0] sm:$0xff]  }
 0x65a   : > { %v5676_v46 = vmax.f32 %v5674_v11, %v5675_v60  ;;  %v5659_v17 = vrot.slane %v5658_v21, 2  ;;  %v8160_v11 = vld [vmem:[%s10858_s15 + $0x8] sm:$0xff]  }
 0x65b   : > { %v5632_v25 = vmax.f32 %v5630_v6, %v5631_v35  ;;  %v6439_v35 = vld [vmem:[%s10859_s16] sm:$0x1] }
 0x65c   : > { %v5698_v30 = vpack.c.bf16 %v5676_v46, %v5676_v46  ;;  %v5660_v61 = vmax.f32 %v5658_v21, %v5659_v17 }
 0x65d   : > { %v5633_v19 = vrot.slane %v5632_v25, 1 }
 0x6b6   : > { %v5702_v27 = vpop.permute.xlu1 %5701 }
 0x6b7   : > { %v5705_v16 = vpop.permute.xlu0 %5704  ;;  %v5726_v5 = vsel %vm2196_vm3, %v5684_v44, %v5702_v27  ;;  %v5634_v27 = vmax.f32 %v5632_v25, %v5633_v19  ;;  %v8157_v44 = vld [vmem:[%s10856_s13 + $0x1f8] sm:$0xff]  }
 0x6b8   : > { %v5730_v59 = vsel %vm2196_vm3, %v5686_v26, %v5705_v16  ;;  %v5661_v26 = vrot.slane %v5660_v61, 1 }
 0x6b9   : > { %6301 = vmatprep.mubr.bf16.mxu1 %v5730_v59  ;;  %v5692_v22 = vpack.c.bf16 %v5634_v27, %v5634_v27  ;;  %v8158_v59 = vld [vmem:[%s10856_s13 + $0x1b8] sm:$0xff]  }
 0x6ba   : > { %v5708_v63 = vpop.permute.xlu1 %5707  ;;  %6302 = vmatmul.mubr.bf16.vlgmr.msra.gmra.mrb[88].mxu1 %v5726_v5 }
 0x6bb   : > { %7120 = vmatpush3.bf16.msra.mxu1 %v8128_v12  ;;  %v5711_v13 = vpop.permute.xlu0 %5710  ;;  %v5734_v38 = vsel %vm2196_vm3, %v5688_v33, %v5708_v63  ;;  %v5662_v12 = vmax.f32 %v5660_v61, %v5661_v26  ;;  %v8161_v33 = vld [vmem:[%s10858_s15 + $0x10] sm:$0xff]  }
 0x6bc   : > { %v5738_v37 = vsel %vm2196_vm3, %v5690_v47, %v5711_v13  ;;  %7121 = vmatprep.subr.bf16.mxu1 %v8130_v55  ;;  %v8159_v47 = vld [vmem:[%s10858_s15] sm:$0xff]   ;;  %v8162_v13 = vld [vmem:[%s10858_s15 + $0x18] sm:$0xff]  }
 0x6bd   : > { %6341 = vmatprep.mubr.bf16.mxu0 %v5738_v37  ;;  %v5696_v20 = vpack.c.bf16 %v5662_v12, %v5662_v12 }
 0x6be   : > { %6342 = vmatmul.mubr.bf16.vlgmr.msra.gmra.mrb[104].mxu0 %v5734_v38 }
 0x6bf   : > { %7122 = vmatpush3.bf16.msra.mxu1 %v8131_v28  ;;  %7142 = vmatpush3.bf16.msra.mxu0 %v8132_v53 }
 0x6c0   : > { %7123 = vmatprep.subr.bf16.mxu1 %v8133_v49  ;;  %7143 = vmatprep.subr.bf16.mxu0 %v8134_v58  ;;  %v5714_v16 = vpop.permute.xlu1 %5713  ;;  %v5884_v49 = vld [vmem:[%s10857_s14] sm:$0x1] }
 0x6c1   : > { %v5742_v55 = vsel %vm2196_vm3, %v5692_v22, %v5714_v16 }
 0x6c2   : > { %v5717_v32 = vpop.permute.xlu0 %5716 }
 0x6c3   : > { %v5746_v31 = vsel %vm2196_vm3, %v5694_v18, %v5717_v32  ;;  %7124 = vmatpush3.bf16.msra.mxu1 %v8135_v36  ;;  %7144 = vmatpush3.bf16.msra.mxu0 %v8136_v4 }
 0x6c4   : > { %6381 = vmatprep.mubr.bf16.mxu1 %v5746_v31  ;;  %7125 = vmatprep.subr.bf16.mxu1 %v8137_v42 }
 0x6c5   : > { %7145 = vmatprep.subr.bf16.mxu0 %v8138_v56 }
 0x6c6   : > { %v5720_v5 = vpop.permute.xlu1 %5719 }
 0x6c7   : > { %7126 = vmatpush3.bf16.msra.mxu1 %v8139_v54  ;;  %7146 = vmatpush3.bf16.msra.mxu0 %v8140_v39  ;;  %v5723_v57 = vpop.permute.xlu0 %5722  ;;  %v5750_v63 = vsel %vm2196_vm3, %v5696_v20, %v5720_v5 }
 0x6c8   : > { %7127 = vmatprep.subr.bf16.mxu1 %v8141_v45  ;;  %7147 = vmatprep.subr.bf16.mxu0 %v8142_v0  ;;  %v5754_v50 = vsel %vm2196_vm3, %v5698_v30, %v5723_v57 }
 0x6c9   : > { %6421 = vmatprep.mubr.bf16.mxu0 %v5754_v50 }
 0x6cb   : > { %7128 = vmatpush3.bf16.msra.mxu1 %v8143_v7  ;;  %7148 = vmatpush3.bf16.msra.mxu0 %v8144_v1 }
 0x6cc   : > { %7129 = vmatprep.subr.bf16.mxu1 %v8145_v8  ;;  %7149 = vmatprep.subr.bf16.mxu0 %v8146_v24 }
 0x6cf   : > { %7130 = vmatpush3.bf16.msra.mxu1 %v8147_v41  ;;  %7150 = vmatpush3.bf16.msra.mxu0 %v8148_v3 }
 0x6d0   : > { %7131 = vmatprep.subr.bf16.mxu1 %v8149_v15  ;;  %7151 = vmatprep.subr.bf16.mxu0 %v8150_v52 }
 0x6d3   : > { %7132 = vmatpush3.bf16.msra.mxu1 %v8151_v14  ;;  %7152 = vmatpush3.bf16.msra.mxu0 %v8152_v62 }
 0x6d4   : > { %7133 = vmatprep.subr.bf16.mxu1 %v8153_v51  ;;  %7153 = vmatprep.subr.bf16.mxu0 %v8154_v9 }
 0x6d7   : > { %7134 = vmatpush3.bf16.msra.mxu1 %v8155_v34  ;;  %7154 = vmatpush3.bf16.msra.mxu0 %v8156_v2 }
 0x6d8   : > { %7155 = vmatprep.subr.bf16.mxu0 %v8157_v44  ;;  %7268 = vmatprep.subr.bf16.mxu1 %v10890_v23 }
 0x6da   : > { %6382 = vmatmul.mubr.bf16.vlgmr.msra.gmra.mrb[92].mxu1 %v5742_v55 }
 0x6db   : > { %7156 = vmatpush3.bf16.msra.mxu0 %v8158_v59  ;;  %7269 = vmatpush3.bf16.msra.mxu1 %v8159_v47 }
 0x6dc   : > { %7270 = vmatprep.subr.bf16.mxu1 %v10890_v23  ;;  %7276 = vmatprep.mubr.msk.bf16.mxu1 %vm8240_vm14, %v10890_v23 }
 0x6de   : > { %6422 = vmatmul.mubr.bf16.vlgmr.msra.gmra.mrb[108].mxu0 %v5750_v63 }
 0x6df   : > { %7271 = vmatpush3.bf16.msra.mxu1 %v8160_v11 }
 0x6e0   : > { %7272 = vmatprep.subr.bf16.mxu1 %v10890_v23 }
 0x6e3   : > { %7273 = vmatpush3.bf16.msra.mxu1 %v8161_v33 }
 0x6e4   : > { %7274 = vmatprep.subr.bf16.mxu1 %v10890_v23 }
 0x6e7   : > { %7275 = vmatpush3.bf16.msra.mxu1 %v8162_v13 }
 0x78d   : > { %v7091_v28 = vpop.f32.mrb[88].mxu1 }
 0x78e   : > { %v7092_v53 = vpop.f32.mrb[89].mxu1 }
 0x78f   : > { %v7093_v10 = vadd.f32 %v7092_v53, %v7091_v28  ;;  %v7094_v37 = vpop.f32.mrb[90].mxu1 }
 0x790   : > { %v7095_v58 = vpop.f32.mrb[91].mxu1 }
 0x791   : > { %v7113_v38 = vpop.f32.mrb[104].mxu0  ;;  %v6304_v60 = vadd.f32 %v7093_v10, %v5884_v49 }
 0x792   : > { %v7114_v48 = vpop.f32.mrb[105].mxu0 }
 0x793   : > { %v7115_v43 = vadd.f32 %v7114_v48, %v7113_v38  ;;  %v7116_v36 = vpop.f32.mrb[106].mxu0 }
 0x794   : > { %v7117_v4 = vpop.f32.mrb[107].mxu0 }
 0x795   : > { %v6344_v42 = vadd.f32 %v7115_v43, %v6304_v60 }
 0x7ad   : > { %v7135_v40 = vpop.f32.mrb[92].mxu1 }
 0x7ae   : > { %v7136_v23 = vpop.f32.mrb[93].mxu1 }
 0x7af   : > { %v7137_v18 = vadd.f32 %v7136_v23, %v7135_v40  ;;  %v7138_v56 = vpop.f32.mrb[94].mxu1 }
 0x7b0   : > { %v7139_v32 = vpop.f32.mrb[95].mxu1 }
 0x7b1   : > { %v6384_v46 = vadd.f32 %v7137_v18, %v6344_v42  ;;  %v7157_v6 = vpop.f32.mrb[108].mxu0 }
 0x7b2   : > { %v7158_v31 = vpop.f32.mrb[109].mxu0 }
 0x7b3   : > { %v7159_v29 = vadd.f32 %v7158_v31, %v7157_v6  ;;  %v7160_v54 = vpop.f32.mrb[110].mxu0 }
 0x7b4   : > { %v7161_v39 = vpop.f32.mrb[111].mxu0 }
 0x7b5   : > { %v6424_v45 = vadd.f32 %v7159_v29, %v6384_v46 }
 0x7b7   : > { %v6429_v0 = vmax.f32 %v6424_v45, 0.0 }
 0x7b9   : > { %v6430_v30 = vpack.c.bf16 %v6429_v0, %v6429_v0 }
 0x7bb   : > { %7277 = vmatmul.mubr.msk.bf16.vlgmr.msra.gmra.mrb[96].mxu1 %vm2196_vm3, %v6430_v30 }
 0x88e   : > { %v6501_v21 = vpop.f32.mrb[96].mxu1 }
 0x88f   : > { %v6502_v57 = vadd.f32 %v6501_v21, %v6439_v35  ;;  %v7278_v7 = vpop.f32.mrb[97].mxu1 }
 0x890   : > { %v6504_v1 = vpop.f32.mrb[98].mxu1 }
 0x891   : > { %6507 = vst [vmem:[%s540_s22] sm:$0x1] %v6502_v57  ;;  %v7279_v50 = vpop.f32.mrb[99].mxu1 }
 0x892   : > { %8184 = shalt.err (!%p8181_p3)
}
 0x893   : > { %s8185_s0 = scalar_lea.hbm %s10801_s2, 16  ;;  %s8189_s22 = scalar_lea.hbm %s10860_s17, 32 }
 0x894   : > { %p8186_p4 = scmp.ne.s32.totalorder %s10801_s2, %s8185_s0  ;;  %p8190_p9 = scmp.lt.u32.totalorder %s10801_s2, %s10860_s17 }
 0x895   : > { %p8191_p10 = scmp.lt.u32.totalorder %s8189_s22, %s8185_s0  ;;  %p8193_p12 = scmp.lt.u32.totalorder %s8185_s0, %s10801_s2 }
 0x896   : > { %p8187_p7 = pnand %p8186_p4, %p8370_p5 }
 0x897   : > { %p8192_p11 = por %p8191_p10, %p8190_p9 }
 0x898   : > { %p8188_p8 = pneg %p8187_p7 }
 0x899   : > { %p8194_p13 = por %p8193_p12, %p8192_p11 }
 0x89b   : > { %p8195_p0 = pnand %p8194_p13, %p8188_p8 }
 0x89d   : > { %8198 = shalt.err (!%p8195_p0)
}
 0x89e   : > { %7280 = dma.vmem_to_hbm [thread:$0]  (%p8370_p5), %s10803_s3, 16, %s10801_s2, %s6509_s24  }
 0x89f PF: > { %s10891_s28 = sld [smem:[#allocation8_spill]]  ;;  %p7286_p1 = scmp.ge.s32.totalorder %s8233_s27, 2 }
 0x8a1   : > { %p7283_p2 = pnand %p7286_p1, %p8374_p6 }
 0x8a5   : > { %s6533_s18 = sand.u32 1, %s10891_s28  }
 0x8a6   : > { %s6534_s19 = scalar_lea.sflag [#allocation6], %s6533_s18 }
 0x8a7   : > { %8216 = dma.done.wait (!%p7283_p2), %s6534_s19, 16  }
 0x8a8   : > { %8218 = vsyncadd (!%p7283_p2), %s6534_s19, 4294967280  ;;  %s10893_s27 = sld [smem:[#allocation10_spill]]  ;;  %s10894_s0 = sld [smem:[#allocation9_spill]] }
 0x8a9   : > { %s10895_s26 = sld [smem:[#allocation11_spill]]  ;;  %s10896_s24 = smov %s8225_s25 }
 0x8ae   : > { %p27_p3 = scmp.ge.s32.totalorder %s10893_s27, 4   ;;  %s10897_s25 = smov %s10894_s0 }
 0x8b0   :  { %29 = sbr.rel (!%p27_p3) target bundleno = 8 (0x8), region = 132 }
 0x8b7   :  { %6538 = vsyncpa [#allocation6], 1 }
 0x8b8   :  { %6540 = vsyncpa [#allocation6 + $0x1], 1 }

</bundles_post_ra>
